<compile_context>
chip_gen: v5e
topology: v5e:2x2
jax: 0.10.0
libtpu: 0.0.40
codegen_flags: <defaults>
</compile_context>

<pallas_src>
import functools

import jax
import jax.numpy as jnp
from jax import lax
from jax.experimental import pallas as pl
from jax.experimental.pallas import tpu as pltpu

# ---------------- config (matches the PyTorch module hyperparams) -----------
NUM_HEADS = 2
BLOCK_CNT = 2
EMBED_DIM = 64
CONTEXT_LEN = 128
LN_EPS = 1e-5
LANE = 128


def _layernorm(x, gamma, beta):
    # One-pass LN: sum and sum-of-squares together, var = E[x^2] - mu^2.
    n = x.shape[-1]
    s1 = jnp.sum(x, axis=-1, keepdims=True)
    s2 = jnp.sum(x * x, axis=-1, keepdims=True)
    mu = s1 * (1.0 / n)
    var = s2 * (1.0 / n) - mu * mu
    return (x - mu) * lax.rsqrt(var + LN_EPS) * gamma + beta


def _mm(a, b, use_bf16):
    # bf16-operand / f32-accumulate matmul (only where the review allows it).
    if use_bf16:
        a = a.astype(jnp.bfloat16)
        b = b.astype(jnp.bfloat16)
    return jnp.dot(a, b, preferred_element_type=jnp.float32)


def mygpt_kernel(
    ids_ref,                              # (Mb, 1) int32 token ids
    tok_ref, pos_ref,                     # (Vp, C), (CTX, C)
    g1_ref, bt1_ref,                      # (L, 1, C)
    wqkv_ref, bqkv_ref,                   # (L, C, nh*3*HP), (L, 1, nh*3*HP)
    wp_ref, bp_ref,                       # (L, nh*HP, C), (L, 1, C)
    g2_ref, bt2_ref,                      # (L, 1, C)
    w1_ref, b1_ref,                       # (L, C, 4C), (L, 1, 4C)
    w2_ref, b2_ref,                       # (L, 4C, C), (L, 1, C)
    lmw_ref, lmb_ref,                     # (C, Vp), (1, Vp)
    out_ref,                              # (Mb, Vp) logits (lane-dense)
    *, num_heads, seq_len, batch_block, head_pad, use_bf16,
):
    Vp, C = tok_ref.shape
    L = wqkv_ref.shape[0]
    T = seq_len
    hp = head_pad
    Mb = batch_block * T

    # ---- token + positional embedding (gather as a one-hot MXU matmul) ----
    ids = ids_ref[...]                                                 # (Mb, 1)
    onehot = (ids == lax.broadcasted_iota(jnp.int32, (Mb, Vp), 1)).astype(jnp.float32)
    x = _mm(onehot, tok_ref[...], use_bf16)                            # (Mb, C)

    pos = pos_ref[0:T, :]                                              # (T, C)
    if batch_block > 1:
        pos = jnp.broadcast_to(pos[None], (batch_block, T, C)).reshape(Mb, C)
    x = x + pos

    # ---- per-batch (T, T) causal mask, reused for every batch/head/layer --
    row = lax.broadcasted_iota(jnp.int32, (T, T), 0)
    col = lax.broadcasted_iota(jnp.int32, (T, T), 1)
    causal = row >= col

    # ---- transformer blocks (static loop; L = 2) ---------------------------
    for layer in range(L):
        # LN1 + fused head-padded QKV projection (kept f32: exact-zero quirk)
        ln1x = _layernorm(x, g1_ref[layer], bt1_ref[layer])
        qkv = (jnp.dot(ln1x, wqkv_ref[layer], preferred_element_type=jnp.float32)
               + bqkv_ref[layer])                                      # (Mb, nh*3*HP)
        wp = wp_ref[layer]                                             # (nh*HP, C)

        attn_rows = []
        for b in range(batch_block):                                   # static loop
            qkv_b = qkv[b * T:(b + 1) * T, :]                          # aligned sublane slice
            attn_b = None
            for h in range(num_heads):                                 # static loop
                base = h * 3 * hp                                      # 128-aligned lane slices
                qh = qkv_b[:, base + 0 * hp: base + 1 * hp]
                kh = qkv_b[:, base + 1 * hp: base + 2 * hp]
                vh = qkv_b[:, base + 2 * hp: base + 3 * hp]
                # scores without explicit transpose (contract dim 1 of both);
                # padded lanes are exact zeros -> contribute nothing.
                s = lax.dot_general(qh, kh, (((1,), (1,)), ((), ())),
                                    preferred_element_type=jnp.float32)  # (T, T)
                # reference quirk fused into one select:
                #   wei = tril(Q@K); wei[wei == 0] = -inf
                wei = jnp.where(causal & (s != 0.0), s, -jnp.inf)
                wei = wei - jnp.max(wei, axis=-1, keepdims=True)
                p = jnp.exp(wei)
                # EUP approx reciprocal + one Newton step (~f32-exact).
                d = jnp.sum(p, axis=-1, keepdims=True)
                r = pl.reciprocal(d, approx=True)
                r = r * (2.0 - d * r)
                p = p * r
                hv = jnp.dot(p, vh, preferred_element_type=jnp.float32)   # (T, HP)
                # per-head contribution to the output projection (no concat);
                # wp rows for padded lanes are zero.
                contrib = _mm(hv, wp[h * hp:(h + 1) * hp, :], use_bf16)   # (T, C)
                attn_b = contrib if attn_b is None else attn_b + contrib
            attn_rows.append(attn_b)
        attn = attn_rows[0] if batch_block == 1 else jnp.concatenate(attn_rows, axis=0)
        x = x + attn + bp_ref[layer]                                   # residual 1

        # LN2 + feed-forward
        ln2x = _layernorm(x, g2_ref[layer], bt2_ref[layer])
        hdn = _mm(ln2x, w1_ref[layer], use_bf16) + b1_ref[layer]
        hdn = jnp.maximum(hdn, 0.0)                                    # ReLU
        ff = _mm(hdn, w2_ref[layer], use_bf16) + b2_ref[layer]
        x = x + ff                                                     # residual 2

    # ---- final LM head (lane-dense Vp-wide output) --------------------------
    logits = jnp.dot(x, lmw_ref[...], preferred_element_type=jnp.float32) + lmb_ref[...]
    out_ref[...] = logits


def mygpt_forward(ids, params, *, num_heads=NUM_HEADS, batch_splits=1,
                  use_bf16=False, core_parallel=True):
    """Full MyGPT forward.  batch_splits=1 fully collapses the grid (best on
    v5e/v6e and for tiny problems); batch_splits=2 + core_parallel uses
    pltpu.CORE_PARALLEL to feed both v7x TensorCores when per-core work is
    large enough."""
    B, T = ids.shape
    V, C = params["tok_emb"].shape
    blocks = params["blocks"]
    hd = C // num_heads
    assert B % batch_splits == 0
    bb = B // batch_splits
    Mb = bb * T

    hp = LANE * pl.cdiv(hd, LANE)        # padded per-head lane width (32 -> 128)
    Vp = LANE * pl.cdiv(V, LANE)         # padded vocab (65 -> 128)

    # --- pad vocab dimension (zero rows/cols; sliced off after the call) ---
    tok_p = jnp.pad(params["tok_emb"], ((0, Vp - V), (0, 0)))
    lmw_p = jnp.pad(params["lm_w"], ((0, 0), (0, Vp - V)))
    lmb_p = jnp.pad(params["lm_b"], ((0, 0), (0, Vp - V)))

    # --- pack fused QKV with each head's q/k/v in its own 128-lane segment --
    def pack_qkv(blk):
        w = jnp.zeros((C, num_heads * 3 * hp), jnp.float32)
        b = jnp.zeros((1, num_heads * 3 * hp), jnp.float32)
        for h in range(num_heads):
            base = h * 3 * hp
            for j, nm in enumerate(("q", "k", "v")):
                w = w.at[:, base + j * hp: base + j * hp + hd].set(
                    blk["w" + nm][:, h * hd:(h + 1) * hd])
                b = b.at[:, base + j * hp: base + j * hp + hd].set(
                    blk["b" + nm][:, h * hd:(h + 1) * hd])
        return w, b

    def pack_wp(blk):
        w = jnp.zeros((num_heads * hp, C), jnp.float32)
        for h in range(num_heads):
            w = w.at[h * hp: h * hp + hd, :].set(blk["wp"][h * hd:(h + 1) * hd, :])
        return w

    packed = [pack_qkv(b) for b in blocks]
    wqkv = jnp.stack([p[0] for p in packed])
    bqkv = jnp.stack([p[1] for p in packed])
    wp_p = jnp.stack([pack_wp(b) for b in blocks])
    stack = lambda name: jnp.stack([blk[name] for blk in blocks])

    args = [
        ids.reshape(B * T, 1).astype(jnp.int32),
        tok_p, params["pos_emb"],
        stack("g1"), stack("bt1"),
        wqkv, bqkv,
        wp_p, stack("bp"),
        stack("g2"), stack("bt2"),
        stack("w1"), stack("b1"),
        stack("w2"), stack("b2"),
        lmw_p, lmb_p,
    ]

    def _full(a):  # whole-array block, constant index map
        return pl.BlockSpec(a.shape, lambda i, _n=a.ndim: (0,) * _n)

    in_specs = [pl.BlockSpec((Mb, 1), lambda i: (i, 0))] + [_full(a) for a in args[1:]]
    out_specs = pl.BlockSpec((Mb, Vp), lambda i: (i, 0))

    kernel = functools.partial(mygpt_kernel, num_heads=num_heads, seq_len=T,
                               batch_block=bb, head_pad=hp, use_bf16=use_bf16)

    if batch_splits > 1:
        # Only CORE_PARALLEL actually shards the grid across v7x's 2 TCs.
        dims = (pltpu.CORE_PARALLEL,) if core_parallel else ("parallel",)
    else:
        dims = ("arbitrary",)

    out = pl.pallas_call(
        kernel,
        out_shape=jax.ShapeDtypeStruct((B * T, Vp), jnp.float32),
        grid_spec=pltpu.PrefetchScalarGridSpec(
            num_scalar_prefetch=0,
            grid=(batch_splits,),
            in_specs=in_specs,
            out_specs=out_specs,
        ),
        compiler_params=pltpu.CompilerParams(dimension_semantics=dims),
    )(*args)
    return out[:, :V].reshape(B, T, V)


# ---------------- pure-JAX reference (correctness sanity check) -------------
def _reference_block(x, p, num_heads):
    def ln(y, g, b):
        mu = jnp.mean(y, axis=-1, keepdims=True)
        var = jnp.mean((y - mu) ** 2, axis=-1, keepdims=True)
        return (y - mu) / jnp.sqrt(var + LN_EPS) * g + b

    B, T, C = x.shape
    hd = C // num_heads
    ln1x = ln(x, p["g1"], p["bt1"])
    q = ln1x @ p["wq"] + p["bq"]
    k = ln1x @ p["wk"] + p["bk"]
    v = ln1x @ p["wv"] + p["bv"]
    tril = jnp.tril(jnp.ones((T, T), bool))
    outs = []
    for h in range(num_heads):
        qh, kh, vh = (a[..., h * hd:(h + 1) * hd] for a in (q, k, v))
        s = jnp.einsum("btd,bsd->bts", qh, kh)
        wei = jnp.where(tril, s, 0.0)
        wei = jnp.where(wei == 0.0, -jnp.inf, wei)
        pa = jax.nn.softmax(wei, axis=-1)
        outs.append(jnp.einsum("bts,bsd->btd", pa, vh))
    cat = jnp.concatenate(outs, axis=-1)
    x2 = cat @ p["wp"] + p["bp"] + x
    ln2x = ln(x2, p["g2"], p["bt2"])
    ff = jnp.maximum(ln2x @ p["w1"] + p["b1"], 0.0) @ p["w2"] + p["b2"]
    return ff + x2


def mygpt_reference(ids, params, *, num_heads=NUM_HEADS):
    B, T = ids.shape
    x = params["tok_emb"][ids] + params["pos_emb"][:T][None]
    for blk in params["blocks"]:
        x = _reference_block(x, blk, num_heads)
    return x @ params["lm_w"] + params["lm_b"]


def init_params(key, vocab_size, C, context_len, num_heads, block_cnt):
    hd = C // num_heads
    # 9 random tensors per block + tok_emb + pos_emb + lm_w
    keys = iter(jax.random.split(key, 9 * block_cnt + 3))
    nrm = lambda shape, s: s * jax.random.normal(next(keys), shape, jnp.float32)
    blocks = []
    for _ in range(block_cnt):
        blocks.append({
            "g1": jnp.ones((1, C), jnp.float32), "bt1": jnp.zeros((1, C), jnp.float32),
            "wq": nrm((C, num_heads * hd), 0.08), "bq": nrm((1, num_heads * hd), 0.02),
            "wk": nrm((C, num_heads * hd), 0.08), "bk": nrm((1, num_heads * hd), 0.02),
            "wv": nrm((C, num_heads * hd), 0.08), "bv": nrm((1, num_heads * hd), 0.02),
            "wp": nrm((num_heads * hd, C), 0.08), "bp": jnp.zeros((1, C), jnp.float32),
            "g2": jnp.ones((1, C), jnp.float32), "bt2": jnp.zeros((1, C), jnp.float32),
            "w1": nrm((C, 4 * C), 0.08), "b1": jnp.zeros((1, 4 * C), jnp.float32),
            "w2": nrm((4 * C, C), 0.08), "b2": jnp.zeros((1, C), jnp.float32),
        })
    return {
        "tok_emb": nrm((vocab_size, C), 0.5),
        "pos_emb": nrm((context_len, C), 0.5),
        "blocks": blocks,
        "lm_w": nrm((C, vocab_size), 0.08),
        "lm_b": jnp.zeros((1, vocab_size), jnp.float32),
    }


if __name__ == "__main__":
    B, T = 2, 8                    # batch, sequence length
    C, H, L = EMBED_DIM, NUM_HEADS, BLOCK_CNT
    V, CTX = 65, CONTEXT_LEN       # vocab size, context length

    key = jax.random.PRNGKey(0)
    kid, kp = jax.random.split(key)
    ids = jax.random.randint(kid, (B, T), 0, V, dtype=jnp.int32)
    params = init_params(kp, V, C, CTX, H, L)

    out = jax.block_until_ready(mygpt_forward(ids, params, num_heads=H))
    ref = mygpt_reference(ids, params, num_heads=H)

    assert out.shape == (B, T, V)
    err = jnp.max(jnp.abs(out - ref))
    assert jnp.allclose(out, ref, atol=1e-3, rtol=1e-3), f"mismatch vs reference, max err {err}"
    print("KERNEL_OK")
</pallas_src>

<mosaic_0001>
module attributes {stable_mosaic.version = 11 : i64} {
  func.func @mygpt_kernel(%arg0: i32, %arg1: memref<16x1xi32, #tpu.memory_space<vmem>>, %arg2: memref<128x64xf32, #tpu.memory_space<vmem>>, %arg3: memref<128x64xf32, #tpu.memory_space<vmem>>, %arg4: memref<2x1x64xf32, #tpu.memory_space<vmem>>, %arg5: memref<2x1x64xf32, #tpu.memory_space<vmem>>, %arg6: memref<2x64x768xf32, #tpu.memory_space<vmem>>, %arg7: memref<2x1x768xf32, #tpu.memory_space<vmem>>, %arg8: memref<2x256x64xf32, #tpu.memory_space<vmem>>, %arg9: memref<2x1x64xf32, #tpu.memory_space<vmem>>, %arg10: memref<2x1x64xf32, #tpu.memory_space<vmem>>, %arg11: memref<2x1x64xf32, #tpu.memory_space<vmem>>, %arg12: memref<2x64x256xf32, #tpu.memory_space<vmem>>, %arg13: memref<2x1x256xf32, #tpu.memory_space<vmem>>, %arg14: memref<2x256x64xf32, #tpu.memory_space<vmem>>, %arg15: memref<2x1x64xf32, #tpu.memory_space<vmem>>, %arg16: memref<64x128xf32, #tpu.memory_space<vmem>>, %arg17: memref<1x128xf32, #tpu.memory_space<vmem>>, %arg18: memref<16x128xf32, #tpu.memory_space<vmem>>) attributes {dimension_semantics = [#tpu.dimension_semantics<arbitrary>], iteration_bounds = array<i64: 1>, scalar_prefetch = 0 : i64, scratch_operands = 0 : i64, tpu.core_type = #tpu.core_type<tc>, window_params = [{transform_indices = @transform_0, window_bounds = array<i64: 16, 1>}, {pipeline_mode = #tpu.pipeline_mode<synchronous>, transform_indices = @transform_1, window_bounds = array<i64: 128, 64>}, {pipeline_mode = #tpu.pipeline_mode<synchronous>, transform_indices = @transform_2, window_bounds = array<i64: 128, 64>}, {pipeline_mode = #tpu.pipeline_mode<synchronous>, transform_indices = @transform_3, window_bounds = array<i64: 2, 1, 64>}, {pipeline_mode = #tpu.pipeline_mode<synchronous>, transform_indices = @transform_4, window_bounds = array<i64: 2, 1, 64>}, {pipeline_mode = #tpu.pipeline_mode<synchronous>, transform_indices = @transform_5, window_bounds = array<i64: 2, 64, 768>}, {pipeline_mode = #tpu.pipeline_mode<synchronous>, transform_indices = @transform_6, window_bounds = array<i64: 2, 1, 768>}, {pipeline_mode = #tpu.pipeline_mode<synchronous>, transform_indices = @transform_7, window_bounds = array<i64: 2, 256, 64>}, {pipeline_mode = #tpu.pipeline_mode<synchronous>, transform_indices = @transform_8, window_bounds = array<i64: 2, 1, 64>}, {pipeline_mode = #tpu.pipeline_mode<synchronous>, transform_indices = @transform_9, window_bounds = array<i64: 2, 1, 64>}, {pipeline_mode = #tpu.pipeline_mode<synchronous>, transform_indices = @transform_10, window_bounds = array<i64: 2, 1, 64>}, {pipeline_mode = #tpu.pipeline_mode<synchronous>, transform_indices = @transform_11, window_bounds = array<i64: 2, 64, 256>}, {pipeline_mode = #tpu.pipeline_mode<synchronous>, transform_indices = @transform_12, window_bounds = array<i64: 2, 1, 256>}, {pipeline_mode = #tpu.pipeline_mode<synchronous>, transform_indices = @transform_13, window_bounds = array<i64: 2, 256, 64>}, {pipeline_mode = #tpu.pipeline_mode<synchronous>, transform_indices = @transform_14, window_bounds = array<i64: 2, 1, 64>}, {pipeline_mode = #tpu.pipeline_mode<synchronous>, transform_indices = @transform_15, window_bounds = array<i64: 64, 128>}, {pipeline_mode = #tpu.pipeline_mode<synchronous>, transform_indices = @transform_16, window_bounds = array<i64: 1, 128>}, {transform_indices = @transform_17, window_bounds = array<i64: 16, 128>}]} {
    %c0 = arith.constant 0 : index
    %c0_0 = arith.constant 0 : index
    %0 = vector.load %arg1[%c0, %c0_0] : memref<16x1xi32, #tpu.memory_space<vmem>>, vector<16x1xi32>
    %1 = tpu.iota {dimensions = array<i32: 1>} : vector<16x128xi32>
    %2 = vector.broadcast %0 : vector<16x1xi32> to vector<16x128xi32>
    %3 = arith.cmpi eq, %2, %1 : vector<16x128xi32>
    %4 = arith.extui %3 : vector<16x128xi1> to vector<16x128xi32>
    %5 = arith.sitofp %4 : vector<16x128xi32> to vector<16x128xf32>
    %c0_1 = arith.constant 0 : index
    %c0_2 = arith.constant 0 : index
    %6 = vector.load %arg2[%c0_1, %c0_2] : memref<128x64xf32, #tpu.memory_space<vmem>>, vector<128x64xf32>
    %cst = arith.constant dense<0.000000e+00> : vector<16x64xf32>
    %7 = tpu.matmul %5, %6, %cst {dimension_numbers = #tpu.dot_dimension_numbers<[1], [0], [0], [1], [0, 0, 1, 1], [], []>} : vector<16x128xf32>, vector<128x64xf32>, vector<16x64xf32> -> vector<16x64xf32>
    %c0_3 = arith.constant 0 : index
    %c0_4 = arith.constant 0 : index
    %8 = vector.load %arg3[%c0_3, %c0_4] : memref<128x64xf32, #tpu.memory_space<vmem>>, vector<8x64xf32>
    %9 = vector.shape_cast %8 : vector<8x64xf32> to vector<1x8x64xf32>
    %10 = vector.shape_cast %9 : vector<1x8x64xf32> to vector<1x8x64xf32>
    %11 = vector.broadcast %10 : vector<1x8x64xf32> to vector<2x8x64xf32>
    %12 = vector.shape_cast %11 : vector<2x8x64xf32> to vector<16x64xf32>
    %13 = arith.addf %7, %12 : vector<16x64xf32>
    %14 = tpu.iota {dimensions = array<i32: 0>} : vector<8x8xi32>
    %15 = tpu.iota {dimensions = array<i32: 1>} : vector<8x8xi32>
    %16 = arith.cmpi sge, %14, %15 : vector<8x8xi32>
    %c0_5 = arith.constant 0 : index
    %c0_6 = arith.constant 0 : index
    %c0_7 = arith.constant 0 : index
    %17 = vector.load %arg4[%c0_5, %c0_6, %c0_7] : memref<2x1x64xf32, #tpu.memory_space<vmem>>, vector<1x1x64xf32>
    %18 = vector.shape_cast %17 : vector<1x1x64xf32> to vector<1x64xf32>
    %c0_8 = arith.constant 0 : index
    %c0_9 = arith.constant 0 : index
    %c0_10 = arith.constant 0 : index
    %19 = vector.load %arg5[%c0_8, %c0_9, %c0_10] : memref<2x1x64xf32, #tpu.memory_space<vmem>>, vector<1x1x64xf32>
    %20 = vector.shape_cast %19 : vector<1x1x64xf32> to vector<1x64xf32>
    %cst_11 = arith.constant dense<0.000000e+00> : vector<16xf32>
    %21 = vector.multi_reduction <add>, %13, %cst_11 [1] : vector<16x64xf32> to vector<16xf32>
    %22 = vector.shape_cast %21 : vector<16xf32> to vector<16x1xf32>
    %23 = arith.mulf %13, %13 : vector<16x64xf32>
    %cst_12 = arith.constant dense<0.000000e+00> : vector<16xf32>
    %24 = vector.multi_reduction <add>, %23, %cst_12 [1] : vector<16x64xf32> to vector<16xf32>
    %25 = vector.shape_cast %24 : vector<16xf32> to vector<16x1xf32>
    %cst_13 = arith.constant 1.562500e-02 : f32
    %26 = vector.broadcast %cst_13 : f32 to vector<16x1xf32>
    %27 = arith.mulf %22, %26 : vector<16x1xf32>
    %cst_14 = arith.constant 1.562500e-02 : f32
    %28 = vector.broadcast %cst_14 : f32 to vector<16x1xf32>
    %29 = arith.mulf %25, %28 : vector<16x1xf32>
    %30 = arith.mulf %27, %27 : vector<16x1xf32>
    %31 = arith.subf %29, %30 : vector<16x1xf32>
    %32 = vector.broadcast %27 : vector<16x1xf32> to vector<16x64xf32>
    %33 = arith.subf %13, %32 : vector<16x64xf32>
    %cst_15 = arith.constant 9.99999974E-6 : f32
    %34 = vector.broadcast %cst_15 : f32 to vector<16x1xf32>
    %35 = arith.addf %31, %34 : vector<16x1xf32>
    %36 = math.rsqrt %35 : vector<16x1xf32>
    %37 = vector.broadcast %36 : vector<16x1xf32> to vector<16x64xf32>
    %38 = arith.mulf %33, %37 : vector<16x64xf32>
    %39 = vector.broadcast %18 : vector<1x64xf32> to vector<16x64xf32>
    %40 = arith.mulf %38, %39 : vector<16x64xf32>
    %41 = vector.broadcast %20 : vector<1x64xf32> to vector<16x64xf32>
    %42 = arith.addf %40, %41 : vector<16x64xf32>
    %c0_16 = arith.constant 0 : index
    %c0_17 = arith.constant 0 : index
    %c0_18 = arith.constant 0 : index
    %43 = vector.load %arg6[%c0_16, %c0_17, %c0_18] : memref<2x64x768xf32, #tpu.memory_space<vmem>>, vector<1x64x768xf32>
    %44 = vector.shape_cast %43 : vector<1x64x768xf32> to vector<64x768xf32>
    %cst_19 = arith.constant dense<0.000000e+00> : vector<16x768xf32>
    %45 = tpu.matmul %42, %44, %cst_19 {dimension_numbers = #tpu.dot_dimension_numbers<[1], [0], [0], [1], [0, 0, 1, 1], [], []>} : vector<16x64xf32>, vector<64x768xf32>, vector<16x768xf32> -> vector<16x768xf32>
    %c0_20 = arith.constant 0 : index
    %c0_21 = arith.constant 0 : index
    %c0_22 = arith.constant 0 : index
    %46 = vector.load %arg7[%c0_20, %c0_21, %c0_22] : memref<2x1x768xf32, #tpu.memory_space<vmem>>, vector<1x1x768xf32>
    %47 = vector.shape_cast %46 : vector<1x1x768xf32> to vector<1x768xf32>
    %48 = vector.broadcast %47 : vector<1x768xf32> to vector<16x768xf32>
    %49 = arith.addf %45, %48 : vector<16x768xf32>
    %c0_23 = arith.constant 0 : index
    %c0_24 = arith.constant 0 : index
    %c0_25 = arith.constant 0 : index
    %50 = vector.load %arg8[%c0_23, %c0_24, %c0_25] : memref<2x256x64xf32, #tpu.memory_space<vmem>>, vector<1x256x64xf32>
    %51 = vector.shape_cast %50 : vector<1x256x64xf32> to vector<256x64xf32>
    %52 = vector.extract_strided_slice %49 {offsets = [0, 0], sizes = [8, 768], strides = [1, 1]} : vector<16x768xf32> to vector<8x768xf32>
    %53 = vector.extract_strided_slice %52 {offsets = [0, 0], sizes = [8, 128], strides = [1, 1]} : vector<8x768xf32> to vector<8x128xf32>
    %54 = vector.extract_strided_slice %52 {offsets = [0, 128], sizes = [8, 128], strides = [1, 1]} : vector<8x768xf32> to vector<8x128xf32>
    %55 = vector.extract_strided_slice %52 {offsets = [0, 256], sizes = [8, 128], strides = [1, 1]} : vector<8x768xf32> to vector<8x128xf32>
    %cst_26 = arith.constant dense<0.000000e+00> : vector<8x8xf32>
    %56 = tpu.matmul %53, %54, %cst_26 {dimension_numbers = #tpu.dot_dimension_numbers<[1], [1], [0], [0], [0, 0, 1, 0], [], []>} : vector<8x128xf32>, vector<8x128xf32>, vector<8x8xf32> -> vector<8x8xf32>
    %cst_27 = arith.constant 0.000000e+00 : f32
    %57 = vector.broadcast %cst_27 : f32 to vector<8x8xf32>
    %58 = arith.cmpf one, %56, %57 : vector<8x8xf32>
    %59 = arith.andi %16, %58 : vector<8x8xi1>
    %cst_28 = arith.constant 0xFF800000 : f32
    %60 = vector.broadcast %cst_28 : f32 to vector<8x8xf32>
    %61 = arith.select %59, %56, %60 : vector<8x8xi1>, vector<8x8xf32>
    %cst_29 = arith.constant dense<0xFF800000> : vector<8xf32>
    %62 = vector.multi_reduction <maximumf>, %61, %cst_29 [1] : vector<8x8xf32> to vector<8xf32>
    %63 = vector.shape_cast %62 : vector<8xf32> to vector<8x1xf32>
    %64 = vector.broadcast %63 : vector<8x1xf32> to vector<8x8xf32>
    %65 = arith.subf %61, %64 : vector<8x8xf32>
    %66 = math.exp %65 : vector<8x8xf32>
    %cst_30 = arith.constant dense<0.000000e+00> : vector<8xf32>
    %67 = vector.multi_reduction <add>, %66, %cst_30 [1] : vector<8x8xf32> to vector<8xf32>
    %68 = vector.shape_cast %67 : vector<8xf32> to vector<8x1xf32>
    %69 = tpu.reciprocal %68 {approx = true} : vector<8x1xf32> -> vector<8x1xf32>
    %70 = arith.mulf %68, %69 : vector<8x1xf32>
    %cst_31 = arith.constant 2.000000e+00 : f32
    %71 = vector.broadcast %cst_31 : f32 to vector<8x1xf32>
    %72 = arith.subf %71, %70 : vector<8x1xf32>
    %73 = arith.mulf %69, %72 : vector<8x1xf32>
    %74 = vector.broadcast %73 : vector<8x1xf32> to vector<8x8xf32>
    %75 = arith.mulf %66, %74 : vector<8x8xf32>
    %cst_32 = arith.constant dense<0.000000e+00> : vector<8x128xf32>
    %76 = tpu.matmul %75, %55, %cst_32 {dimension_numbers = #tpu.dot_dimension_numbers<[1], [0], [0], [1], [0, 0, 1, 1], [], []>} : vector<8x8xf32>, vector<8x128xf32>, vector<8x128xf32> -> vector<8x128xf32>
    %77 = vector.extract_strided_slice %51 {offsets = [0, 0], sizes = [128, 64], strides = [1, 1]} : vector<256x64xf32> to vector<128x64xf32>
    %cst_33 = arith.constant dense<0.000000e+00> : vector<8x64xf32>
    %78 = tpu.matmul %76, %77, %cst_33 {dimension_numbers = #tpu.dot_dimension_numbers<[1], [0], [0], [1], [0, 0, 1, 1], [], []>} : vector<8x128xf32>, vector<128x64xf32>, vector<8x64xf32> -> vector<8x64xf32>
    %79 = vector.extract_strided_slice %52 {offsets = [0, 384], sizes = [8, 128], strides = [1, 1]} : vector<8x768xf32> to vector<8x128xf32>
    %80 = vector.extract_strided_slice %52 {offsets = [0, 512], sizes = [8, 128], strides = [1, 1]} : vector<8x768xf32> to vector<8x128xf32>
    %81 = vector.extract_strided_slice %52 {offsets = [0, 640], sizes = [8, 128], strides = [1, 1]} : vector<8x768xf32> to vector<8x128xf32>
    %cst_34 = arith.constant dense<0.000000e+00> : vector<8x8xf32>
    %82 = tpu.matmul %79, %80, %cst_34 {dimension_numbers = #tpu.dot_dimension_numbers<[1], [1], [0], [0], [0, 0, 1, 0], [], []>} : vector<8x128xf32>, vector<8x128xf32>, vector<8x8xf32> -> vector<8x8xf32>
    %cst_35 = arith.constant 0.000000e+00 : f32
    %83 = vector.broadcast %cst_35 : f32 to vector<8x8xf32>
    %84 = arith.cmpf one, %82, %83 : vector<8x8xf32>
    %85 = arith.andi %16, %84 : vector<8x8xi1>
    %cst_36 = arith.constant 0xFF800000 : f32
    %86 = vector.broadcast %cst_36 : f32 to vector<8x8xf32>
    %87 = arith.select %85, %82, %86 : vector<8x8xi1>, vector<8x8xf32>
    %cst_37 = arith.constant dense<0xFF800000> : vector<8xf32>
    %88 = vector.multi_reduction <maximumf>, %87, %cst_37 [1] : vector<8x8xf32> to vector<8xf32>
    %89 = vector.shape_cast %88 : vector<8xf32> to vector<8x1xf32>
    %90 = vector.broadcast %89 : vector<8x1xf32> to vector<8x8xf32>
    %91 = arith.subf %87, %90 : vector<8x8xf32>
    %92 = math.exp %91 : vector<8x8xf32>
    %cst_38 = arith.constant dense<0.000000e+00> : vector<8xf32>
    %93 = vector.multi_reduction <add>, %92, %cst_38 [1] : vector<8x8xf32> to vector<8xf32>
    %94 = vector.shape_cast %93 : vector<8xf32> to vector<8x1xf32>
    %95 = tpu.reciprocal %94 {approx = true} : vector<8x1xf32> -> vector<8x1xf32>
    %96 = arith.mulf %94, %95 : vector<8x1xf32>
    %cst_39 = arith.constant 2.000000e+00 : f32
    %97 = vector.broadcast %cst_39 : f32 to vector<8x1xf32>
    %98 = arith.subf %97, %96 : vector<8x1xf32>
    %99 = arith.mulf %95, %98 : vector<8x1xf32>
    %100 = vector.broadcast %99 : vector<8x1xf32> to vector<8x8xf32>
    %101 = arith.mulf %92, %100 : vector<8x8xf32>
    %cst_40 = arith.constant dense<0.000000e+00> : vector<8x128xf32>
    %102 = tpu.matmul %101, %81, %cst_40 {dimension_numbers = #tpu.dot_dimension_numbers<[1], [0], [0], [1], [0, 0, 1, 1], [], []>} : vector<8x8xf32>, vector<8x128xf32>, vector<8x128xf32> -> vector<8x128xf32>
    %103 = vector.extract_strided_slice %51 {offsets = [128, 0], sizes = [128, 64], strides = [1, 1]} : vector<256x64xf32> to vector<128x64xf32>
    %cst_41 = arith.constant dense<0.000000e+00> : vector<8x64xf32>
    %104 = tpu.matmul %102, %103, %cst_41 {dimension_numbers = #tpu.dot_dimension_numbers<[1], [0], [0], [1], [0, 0, 1, 1], [], []>} : vector<8x128xf32>, vector<128x64xf32>, vector<8x64xf32> -> vector<8x64xf32>
    %105 = arith.addf %78, %104 : vector<8x64xf32>
    %106 = vector.extract_strided_slice %49 {offsets = [8, 0], sizes = [8, 768], strides = [1, 1]} : vector<16x768xf32> to vector<8x768xf32>
    %107 = vector.extract_strided_slice %106 {offsets = [0, 0], sizes = [8, 128], strides = [1, 1]} : vector<8x768xf32> to vector<8x128xf32>
    %108 = vector.extract_strided_slice %106 {offsets = [0, 128], sizes = [8, 128], strides = [1, 1]} : vector<8x768xf32> to vector<8x128xf32>
    %109 = vector.extract_strided_slice %106 {offsets = [0, 256], sizes = [8, 128], strides = [1, 1]} : vector<8x768xf32> to vector<8x128xf32>
    %cst_42 = arith.constant dense<0.000000e+00> : vector<8x8xf32>
    %110 = tpu.matmul %107, %108, %cst_42 {dimension_numbers = #tpu.dot_dimension_numbers<[1], [1], [0], [0], [0, 0, 1, 0], [], []>} : vector<8x128xf32>, vector<8x128xf32>, vector<8x8xf32> -> vector<8x8xf32>
    %cst_43 = arith.constant 0.000000e+00 : f32
    %111 = vector.broadcast %cst_43 : f32 to vector<8x8xf32>
    %112 = arith.cmpf one, %110, %111 : vector<8x8xf32>
    %113 = arith.andi %16, %112 : vector<8x8xi1>
    %cst_44 = arith.constant 0xFF800000 : f32
    %114 = vector.broadcast %cst_44 : f32 to vector<8x8xf32>
    %115 = arith.select %113, %110, %114 : vector<8x8xi1>, vector<8x8xf32>
    %cst_45 = arith.constant dense<0xFF800000> : vector<8xf32>
    %116 = vector.multi_reduction <maximumf>, %115, %cst_45 [1] : vector<8x8xf32> to vector<8xf32>
    %117 = vector.shape_cast %116 : vector<8xf32> to vector<8x1xf32>
    %118 = vector.broadcast %117 : vector<8x1xf32> to vector<8x8xf32>
    %119 = arith.subf %115, %118 : vector<8x8xf32>
    %120 = math.exp %119 : vector<8x8xf32>
    %cst_46 = arith.constant dense<0.000000e+00> : vector<8xf32>
    %121 = vector.multi_reduction <add>, %120, %cst_46 [1] : vector<8x8xf32> to vector<8xf32>
    %122 = vector.shape_cast %121 : vector<8xf32> to vector<8x1xf32>
    %123 = tpu.reciprocal %122 {approx = true} : vector<8x1xf32> -> vector<8x1xf32>
    %124 = arith.mulf %122, %123 : vector<8x1xf32>
    %cst_47 = arith.constant 2.000000e+00 : f32
    %125 = vector.broadcast %cst_47 : f32 to vector<8x1xf32>
    %126 = arith.subf %125, %124 : vector<8x1xf32>
    %127 = arith.mulf %123, %126 : vector<8x1xf32>
    %128 = vector.broadcast %127 : vector<8x1xf32> to vector<8x8xf32>
    %129 = arith.mulf %120, %128 : vector<8x8xf32>
    %cst_48 = arith.constant dense<0.000000e+00> : vector<8x128xf32>
    %130 = tpu.matmul %129, %109, %cst_48 {dimension_numbers = #tpu.dot_dimension_numbers<[1], [0], [0], [1], [0, 0, 1, 1], [], []>} : vector<8x8xf32>, vector<8x128xf32>, vector<8x128xf32> -> vector<8x128xf32>
    %131 = vector.extract_strided_slice %51 {offsets = [0, 0], sizes = [128, 64], strides = [1, 1]} : vector<256x64xf32> to vector<128x64xf32>
    %cst_49 = arith.constant dense<0.000000e+00> : vector<8x64xf32>
    %132 = tpu.matmul %130, %131, %cst_49 {dimension_numbers = #tpu.dot_dimension_numbers<[1], [0], [0], [1], [0, 0, 1, 1], [], []>} : vector<8x128xf32>, vector<128x64xf32>, vector<8x64xf32> -> vector<8x64xf32>
    %133 = vector.extract_strided_slice %106 {offsets = [0, 384], sizes = [8, 128], strides = [1, 1]} : vector<8x768xf32> to vector<8x128xf32>
    %134 = vector.extract_strided_slice %106 {offsets = [0, 512], sizes = [8, 128], strides = [1, 1]} : vector<8x768xf32> to vector<8x128xf32>
    %135 = vector.extract_strided_slice %106 {offsets = [0, 640], sizes = [8, 128], strides = [1, 1]} : vector<8x768xf32> to vector<8x128xf32>
    %cst_50 = arith.constant dense<0.000000e+00> : vector<8x8xf32>
    %136 = tpu.matmul %133, %134, %cst_50 {dimension_numbers = #tpu.dot_dimension_numbers<[1], [1], [0], [0], [0, 0, 1, 0], [], []>} : vector<8x128xf32>, vector<8x128xf32>, vector<8x8xf32> -> vector<8x8xf32>
    %cst_51 = arith.constant 0.000000e+00 : f32
    %137 = vector.broadcast %cst_51 : f32 to vector<8x8xf32>
    %138 = arith.cmpf one, %136, %137 : vector<8x8xf32>
    %139 = arith.andi %16, %138 : vector<8x8xi1>
    %cst_52 = arith.constant 0xFF800000 : f32
    %140 = vector.broadcast %cst_52 : f32 to vector<8x8xf32>
    %141 = arith.select %139, %136, %140 : vector<8x8xi1>, vector<8x8xf32>
    %cst_53 = arith.constant dense<0xFF800000> : vector<8xf32>
    %142 = vector.multi_reduction <maximumf>, %141, %cst_53 [1] : vector<8x8xf32> to vector<8xf32>
    %143 = vector.shape_cast %142 : vector<8xf32> to vector<8x1xf32>
    %144 = vector.broadcast %143 : vector<8x1xf32> to vector<8x8xf32>
    %145 = arith.subf %141, %144 : vector<8x8xf32>
    %146 = math.exp %145 : vector<8x8xf32>
    %cst_54 = arith.constant dense<0.000000e+00> : vector<8xf32>
    %147 = vector.multi_reduction <add>, %146, %cst_54 [1] : vector<8x8xf32> to vector<8xf32>
    %148 = vector.shape_cast %147 : vector<8xf32> to vector<8x1xf32>
    %149 = tpu.reciprocal %148 {approx = true} : vector<8x1xf32> -> vector<8x1xf32>
    %150 = arith.mulf %148, %149 : vector<8x1xf32>
    %cst_55 = arith.constant 2.000000e+00 : f32
    %151 = vector.broadcast %cst_55 : f32 to vector<8x1xf32>
    %152 = arith.subf %151, %150 : vector<8x1xf32>
    %153 = arith.mulf %149, %152 : vector<8x1xf32>
    %154 = vector.broadcast %153 : vector<8x1xf32> to vector<8x8xf32>
    %155 = arith.mulf %146, %154 : vector<8x8xf32>
    %cst_56 = arith.constant dense<0.000000e+00> : vector<8x128xf32>
    %156 = tpu.matmul %155, %135, %cst_56 {dimension_numbers = #tpu.dot_dimension_numbers<[1], [0], [0], [1], [0, 0, 1, 1], [], []>} : vector<8x8xf32>, vector<8x128xf32>, vector<8x128xf32> -> vector<8x128xf32>
    %157 = vector.extract_strided_slice %51 {offsets = [128, 0], sizes = [128, 64], strides = [1, 1]} : vector<256x64xf32> to vector<128x64xf32>
    %cst_57 = arith.constant dense<0.000000e+00> : vector<8x64xf32>
    %158 = tpu.matmul %156, %157, %cst_57 {dimension_numbers = #tpu.dot_dimension_numbers<[1], [0], [0], [1], [0, 0, 1, 1], [], []>} : vector<8x128xf32>, vector<128x64xf32>, vector<8x64xf32> -> vector<8x64xf32>
    %159 = arith.addf %132, %158 : vector<8x64xf32>
    %160 = tpu.concatenate %105, %159 in 0 : vector<8x64xf32>, vector<8x64xf32> -> vector<16x64xf32>
    %161 = arith.addf %13, %160 : vector<16x64xf32>
    %c0_58 = arith.constant 0 : index
    %c0_59 = arith.constant 0 : index
    %c0_60 = arith.constant 0 : index
    %162 = vector.load %arg9[%c0_58, %c0_59, %c0_60] : memref<2x1x64xf32, #tpu.memory_space<vmem>>, vector<1x1x64xf32>
    %163 = vector.shape_cast %162 : vector<1x1x64xf32> to vector<1x64xf32>
    %164 = vector.broadcast %163 : vector<1x64xf32> to vector<16x64xf32>
    %165 = arith.addf %161, %164 : vector<16x64xf32>
    %c0_61 = arith.constant 0 : index
    %c0_62 = arith.constant 0 : index
    %c0_63 = arith.constant 0 : index
    %166 = vector.load %arg10[%c0_61, %c0_62, %c0_63] : memref<2x1x64xf32, #tpu.memory_space<vmem>>, vector<1x1x64xf32>
    %167 = vector.shape_cast %166 : vector<1x1x64xf32> to vector<1x64xf32>
    %c0_64 = arith.constant 0 : index
    %c0_65 = arith.constant 0 : index
    %c0_66 = arith.constant 0 : index
    %168 = vector.load %arg11[%c0_64, %c0_65, %c0_66] : memref<2x1x64xf32, #tpu.memory_space<vmem>>, vector<1x1x64xf32>
    %169 = vector.shape_cast %168 : vector<1x1x64xf32> to vector<1x64xf32>
    %cst_67 = arith.constant dense<0.000000e+00> : vector<16xf32>
    %170 = vector.multi_reduction <add>, %165, %cst_67 [1] : vector<16x64xf32> to vector<16xf32>
    %171 = vector.shape_cast %170 : vector<16xf32> to vector<16x1xf32>
    %172 = arith.mulf %165, %165 : vector<16x64xf32>
    %cst_68 = arith.constant dense<0.000000e+00> : vector<16xf32>
    %173 = vector.multi_reduction <add>, %172, %cst_68 [1] : vector<16x64xf32> to vector<16xf32>
    %174 = vector.shape_cast %173 : vector<16xf32> to vector<16x1xf32>
    %cst_69 = arith.constant 1.562500e-02 : f32
    %175 = vector.broadcast %cst_69 : f32 to vector<16x1xf32>
    %176 = arith.mulf %171, %175 : vector<16x1xf32>
    %cst_70 = arith.constant 1.562500e-02 : f32
    %177 = vector.broadcast %cst_70 : f32 to vector<16x1xf32>
    %178 = arith.mulf %174, %177 : vector<16x1xf32>
    %179 = arith.mulf %176, %176 : vector<16x1xf32>
    %180 = arith.subf %178, %179 : vector<16x1xf32>
    %181 = vector.broadcast %176 : vector<16x1xf32> to vector<16x64xf32>
    %182 = arith.subf %165, %181 : vector<16x64xf32>
    %cst_71 = arith.constant 9.99999974E-6 : f32
    %183 = vector.broadcast %cst_71 : f32 to vector<16x1xf32>
    %184 = arith.addf %180, %183 : vector<16x1xf32>
    %185 = math.rsqrt %184 : vector<16x1xf32>
    %186 = vector.broadcast %185 : vector<16x1xf32> to vector<16x64xf32>
    %187 = arith.mulf %182, %186 : vector<16x64xf32>
    %188 = vector.broadcast %167 : vector<1x64xf32> to vector<16x64xf32>
    %189 = arith.mulf %187, %188 : vector<16x64xf32>
    %190 = vector.broadcast %169 : vector<1x64xf32> to vector<16x64xf32>
    %191 = arith.addf %189, %190 : vector<16x64xf32>
    %c0_72 = arith.constant 0 : index
    %c0_73 = arith.constant 0 : index
    %c0_74 = arith.constant 0 : index
    %192 = vector.load %arg12[%c0_72, %c0_73, %c0_74] : memref<2x64x256xf32, #tpu.memory_space<vmem>>, vector<1x64x256xf32>
    %193 = vector.shape_cast %192 : vector<1x64x256xf32> to vector<64x256xf32>
    %cst_75 = arith.constant dense<0.000000e+00> : vector<16x256xf32>
    %194 = tpu.matmul %191, %193, %cst_75 {dimension_numbers = #tpu.dot_dimension_numbers<[1], [0], [0], [1], [0, 0, 1, 1], [], []>} : vector<16x64xf32>, vector<64x256xf32>, vector<16x256xf32> -> vector<16x256xf32>
    %c0_76 = arith.constant 0 : index
    %c0_77 = arith.constant 0 : index
    %c0_78 = arith.constant 0 : index
    %195 = vector.load %arg13[%c0_76, %c0_77, %c0_78] : memref<2x1x256xf32, #tpu.memory_space<vmem>>, vector<1x1x256xf32>
    %196 = vector.shape_cast %195 : vector<1x1x256xf32> to vector<1x256xf32>
    %197 = vector.broadcast %196 : vector<1x256xf32> to vector<16x256xf32>
    %198 = arith.addf %194, %197 : vector<16x256xf32>
    %cst_79 = arith.constant 0.000000e+00 : f32
    %199 = vector.broadcast %cst_79 : f32 to vector<16x256xf32>
    %200 = arith.maximumf %198, %199 : vector<16x256xf32>
    %c0_80 = arith.constant 0 : index
    %c0_81 = arith.constant 0 : index
    %c0_82 = arith.constant 0 : index
    %201 = vector.load %arg14[%c0_80, %c0_81, %c0_82] : memref<2x256x64xf32, #tpu.memory_space<vmem>>, vector<1x256x64xf32>
    %202 = vector.shape_cast %201 : vector<1x256x64xf32> to vector<256x64xf32>
    %cst_83 = arith.constant dense<0.000000e+00> : vector<16x64xf32>
    %203 = tpu.matmul %200, %202, %cst_83 {dimension_numbers = #tpu.dot_dimension_numbers<[1], [0], [0], [1], [0, 0, 1, 1], [], []>} : vector<16x256xf32>, vector<256x64xf32>, vector<16x64xf32> -> vector<16x64xf32>
    %c0_84 = arith.constant 0 : index
    %c0_85 = arith.constant 0 : index
    %c0_86 = arith.constant 0 : index
    %204 = vector.load %arg15[%c0_84, %c0_85, %c0_86] : memref<2x1x64xf32, #tpu.memory_space<vmem>>, vector<1x1x64xf32>
    %205 = vector.shape_cast %204 : vector<1x1x64xf32> to vector<1x64xf32>
    %206 = vector.broadcast %205 : vector<1x64xf32> to vector<16x64xf32>
    %207 = arith.addf %203, %206 : vector<16x64xf32>
    %208 = arith.addf %165, %207 : vector<16x64xf32>
    %c1 = arith.constant 1 : index
    %c0_87 = arith.constant 0 : index
    %c0_88 = arith.constant 0 : index
    %209 = vector.load %arg4[%c1, %c0_87, %c0_88] : memref<2x1x64xf32, #tpu.memory_space<vmem>>, vector<1x1x64xf32>
    %210 = vector.shape_cast %209 : vector<1x1x64xf32> to vector<1x64xf32>
    %c1_89 = arith.constant 1 : index
    %c0_90 = arith.constant 0 : index
    %c0_91 = arith.constant 0 : index
    %211 = vector.load %arg5[%c1_89, %c0_90, %c0_91] : memref<2x1x64xf32, #tpu.memory_space<vmem>>, vector<1x1x64xf32>
    %212 = vector.shape_cast %211 : vector<1x1x64xf32> to vector<1x64xf32>
    %cst_92 = arith.constant dense<0.000000e+00> : vector<16xf32>
    %213 = vector.multi_reduction <add>, %208, %cst_92 [1] : vector<16x64xf32> to vector<16xf32>
    %214 = vector.shape_cast %213 : vector<16xf32> to vector<16x1xf32>
    %215 = arith.mulf %208, %208 : vector<16x64xf32>
    %cst_93 = arith.constant dense<0.000000e+00> : vector<16xf32>
    %216 = vector.multi_reduction <add>, %215, %cst_93 [1] : vector<16x64xf32> to vector<16xf32>
    %217 = vector.shape_cast %216 : vector<16xf32> to vector<16x1xf32>
    %cst_94 = arith.constant 1.562500e-02 : f32
    %218 = vector.broadcast %cst_94 : f32 to vector<16x1xf32>
    %219 = arith.mulf %214, %218 : vector<16x1xf32>
    %cst_95 = arith.constant 1.562500e-02 : f32
    %220 = vector.broadcast %cst_95 : f32 to vector<16x1xf32>
    %221 = arith.mulf %217, %220 : vector<16x1xf32>
    %222 = arith.mulf %219, %219 : vector<16x1xf32>
    %223 = arith.subf %221, %222 : vector<16x1xf32>
    %224 = vector.broadcast %219 : vector<16x1xf32> to vector<16x64xf32>
    %225 = arith.subf %208, %224 : vector<16x64xf32>
    %cst_96 = arith.constant 9.99999974E-6 : f32
    %226 = vector.broadcast %cst_96 : f32 to vector<16x1xf32>
    %227 = arith.addf %223, %226 : vector<16x1xf32>
    %228 = math.rsqrt %227 : vector<16x1xf32>
    %229 = vector.broadcast %228 : vector<16x1xf32> to vector<16x64xf32>
    %230 = arith.mulf %225, %229 : vector<16x64xf32>
    %231 = vector.broadcast %210 : vector<1x64xf32> to vector<16x64xf32>
    %232 = arith.mulf %230, %231 : vector<16x64xf32>
    %233 = vector.broadcast %212 : vector<1x64xf32> to vector<16x64xf32>
    %234 = arith.addf %232, %233 : vector<16x64xf32>
    %c1_97 = arith.constant 1 : index
    %c0_98 = arith.constant 0 : index
    %c0_99 = arith.constant 0 : index
    %235 = vector.load %arg6[%c1_97, %c0_98, %c0_99] : memref<2x64x768xf32, #tpu.memory_space<vmem>>, vector<1x64x768xf32>
    %236 = vector.shape_cast %235 : vector<1x64x768xf32> to vector<64x768xf32>
    %cst_100 = arith.constant dense<0.000000e+00> : vector<16x768xf32>
    %237 = tpu.matmul %234, %236, %cst_100 {dimension_numbers = #tpu.dot_dimension_numbers<[1], [0], [0], [1], [0, 0, 1, 1], [], []>} : vector<16x64xf32>, vector<64x768xf32>, vector<16x768xf32> -> vector<16x768xf32>
    %c1_101 = arith.constant 1 : index
    %c0_102 = arith.constant 0 : index
    %c0_103 = arith.constant 0 : index
    %238 = vector.load %arg7[%c1_101, %c0_102, %c0_103] : memref<2x1x768xf32, #tpu.memory_space<vmem>>, vector<1x1x768xf32>
    %239 = vector.shape_cast %238 : vector<1x1x768xf32> to vector<1x768xf32>
    %240 = vector.broadcast %239 : vector<1x768xf32> to vector<16x768xf32>
    %241 = arith.addf %237, %240 : vector<16x768xf32>
    %c1_104 = arith.constant 1 : index
    %c0_105 = arith.constant 0 : index
    %c0_106 = arith.constant 0 : index
    %242 = vector.load %arg8[%c1_104, %c0_105, %c0_106] : memref<2x256x64xf32, #tpu.memory_space<vmem>>, vector<1x256x64xf32>
    %243 = vector.shape_cast %242 : vector<1x256x64xf32> to vector<256x64xf32>
    %244 = vector.extract_strided_slice %241 {offsets = [0, 0], sizes = [8, 768], strides = [1, 1]} : vector<16x768xf32> to vector<8x768xf32>
    %245 = vector.extract_strided_slice %244 {offsets = [0, 0], sizes = [8, 128], strides = [1, 1]} : vector<8x768xf32> to vector<8x128xf32>
    %246 = vector.extract_strided_slice %244 {offsets = [0, 128], sizes = [8, 128], strides = [1, 1]} : vector<8x768xf32> to vector<8x128xf32>
    %247 = vector.extract_strided_slice %244 {offsets = [0, 256], sizes = [8, 128], strides = [1, 1]} : vector<8x768xf32> to vector<8x128xf32>
    %cst_107 = arith.constant dense<0.000000e+00> : vector<8x8xf32>
    %248 = tpu.matmul %245, %246, %cst_107 {dimension_numbers = #tpu.dot_dimension_numbers<[1], [1], [0], [0], [0, 0, 1, 0], [], []>} : vector<8x128xf32>, vector<8x128xf32>, vector<8x8xf32> -> vector<8x8xf32>
    %cst_108 = arith.constant 0.000000e+00 : f32
    %249 = vector.broadcast %cst_108 : f32 to vector<8x8xf32>
    %250 = arith.cmpf one, %248, %249 : vector<8x8xf32>
    %251 = arith.andi %16, %250 : vector<8x8xi1>
    %cst_109 = arith.constant 0xFF800000 : f32
    %252 = vector.broadcast %cst_109 : f32 to vector<8x8xf32>
    %253 = arith.select %251, %248, %252 : vector<8x8xi1>, vector<8x8xf32>
    %cst_110 = arith.constant dense<0xFF800000> : vector<8xf32>
    %254 = vector.multi_reduction <maximumf>, %253, %cst_110 [1] : vector<8x8xf32> to vector<8xf32>
    %255 = vector.shape_cast %254 : vector<8xf32> to vector<8x1xf32>
    %256 = vector.broadcast %255 : vector<8x1xf32> to vector<8x8xf32>
    %257 = arith.subf %253, %256 : vector<8x8xf32>
    %258 = math.exp %257 : vector<8x8xf32>
    %cst_111 = arith.constant dense<0.000000e+00> : vector<8xf32>
    %259 = vector.multi_reduction <add>, %258, %cst_111 [1] : vector<8x8xf32> to vector<8xf32>
    %260 = vector.shape_cast %259 : vector<8xf32> to vector<8x1xf32>
    %261 = tpu.reciprocal %260 {approx = true} : vector<8x1xf32> -> vector<8x1xf32>
    %262 = arith.mulf %260, %261 : vector<8x1xf32>
    %cst_112 = arith.constant 2.000000e+00 : f32
    %263 = vector.broadcast %cst_112 : f32 to vector<8x1xf32>
    %264 = arith.subf %263, %262 : vector<8x1xf32>
    %265 = arith.mulf %261, %264 : vector<8x1xf32>
    %266 = vector.broadcast %265 : vector<8x1xf32> to vector<8x8xf32>
    %267 = arith.mulf %258, %266 : vector<8x8xf32>
    %cst_113 = arith.constant dense<0.000000e+00> : vector<8x128xf32>
    %268 = tpu.matmul %267, %247, %cst_113 {dimension_numbers = #tpu.dot_dimension_numbers<[1], [0], [0], [1], [0, 0, 1, 1], [], []>} : vector<8x8xf32>, vector<8x128xf32>, vector<8x128xf32> -> vector<8x128xf32>
    %269 = vector.extract_strided_slice %243 {offsets = [0, 0], sizes = [128, 64], strides = [1, 1]} : vector<256x64xf32> to vector<128x64xf32>
    %cst_114 = arith.constant dense<0.000000e+00> : vector<8x64xf32>
    %270 = tpu.matmul %268, %269, %cst_114 {dimension_numbers = #tpu.dot_dimension_numbers<[1], [0], [0], [1], [0, 0, 1, 1], [], []>} : vector<8x128xf32>, vector<128x64xf32>, vector<8x64xf32> -> vector<8x64xf32>
    %271 = vector.extract_strided_slice %244 {offsets = [0, 384], sizes = [8, 128], strides = [1, 1]} : vector<8x768xf32> to vector<8x128xf32>
    %272 = vector.extract_strided_slice %244 {offsets = [0, 512], sizes = [8, 128], strides = [1, 1]} : vector<8x768xf32> to vector<8x128xf32>
    %273 = vector.extract_strided_slice %244 {offsets = [0, 640], sizes = [8, 128], strides = [1, 1]} : vector<8x768xf32> to vector<8x128xf32>
    %cst_115 = arith.constant dense<0.000000e+00> : vector<8x8xf32>
    %274 = tpu.matmul %271, %272, %cst_115 {dimension_numbers = #tpu.dot_dimension_numbers<[1], [1], [0], [0], [0, 0, 1, 0], [], []>} : vector<8x128xf32>, vector<8x128xf32>, vector<8x8xf32> -> vector<8x8xf32>
    %cst_116 = arith.constant 0.000000e+00 : f32
    %275 = vector.broadcast %cst_116 : f32 to vector<8x8xf32>
    %276 = arith.cmpf one, %274, %275 : vector<8x8xf32>
    %277 = arith.andi %16, %276 : vector<8x8xi1>
    %cst_117 = arith.constant 0xFF800000 : f32
    %278 = vector.broadcast %cst_117 : f32 to vector<8x8xf32>
    %279 = arith.select %277, %274, %278 : vector<8x8xi1>, vector<8x8xf32>
    %cst_118 = arith.constant dense<0xFF800000> : vector<8xf32>
    %280 = vector.multi_reduction <maximumf>, %279, %cst_118 [1] : vector<8x8xf32> to vector<8xf32>
    %281 = vector.shape_cast %280 : vector<8xf32> to vector<8x1xf32>
    %282 = vector.broadcast %281 : vector<8x1xf32> to vector<8x8xf32>
    %283 = arith.subf %279, %282 : vector<8x8xf32>
    %284 = math.exp %283 : vector<8x8xf32>
    %cst_119 = arith.constant dense<0.000000e+00> : vector<8xf32>
    %285 = vector.multi_reduction <add>, %284, %cst_119 [1] : vector<8x8xf32> to vector<8xf32>
    %286 = vector.shape_cast %285 : vector<8xf32> to vector<8x1xf32>
    %287 = tpu.reciprocal %286 {approx = true} : vector<8x1xf32> -> vector<8x1xf32>
    %288 = arith.mulf %286, %287 : vector<8x1xf32>
    %cst_120 = arith.constant 2.000000e+00 : f32
    %289 = vector.broadcast %cst_120 : f32 to vector<8x1xf32>
    %290 = arith.subf %289, %288 : vector<8x1xf32>
    %291 = arith.mulf %287, %290 : vector<8x1xf32>
    %292 = vector.broadcast %291 : vector<8x1xf32> to vector<8x8xf32>
    %293 = arith.mulf %284, %292 : vector<8x8xf32>
    %cst_121 = arith.constant dense<0.000000e+00> : vector<8x128xf32>
    %294 = tpu.matmul %293, %273, %cst_121 {dimension_numbers = #tpu.dot_dimension_numbers<[1], [0], [0], [1], [0, 0, 1, 1], [], []>} : vector<8x8xf32>, vector<8x128xf32>, vector<8x128xf32> -> vector<8x128xf32>
    %295 = vector.extract_strided_slice %243 {offsets = [128, 0], sizes = [128, 64], strides = [1, 1]} : vector<256x64xf32> to vector<128x64xf32>
    %cst_122 = arith.constant dense<0.000000e+00> : vector<8x64xf32>
    %296 = tpu.matmul %294, %295, %cst_122 {dimension_numbers = #tpu.dot_dimension_numbers<[1], [0], [0], [1], [0, 0, 1, 1], [], []>} : vector<8x128xf32>, vector<128x64xf32>, vector<8x64xf32> -> vector<8x64xf32>
    %297 = arith.addf %270, %296 : vector<8x64xf32>
    %298 = vector.extract_strided_slice %241 {offsets = [8, 0], sizes = [8, 768], strides = [1, 1]} : vector<16x768xf32> to vector<8x768xf32>
    %299 = vector.extract_strided_slice %298 {offsets = [0, 0], sizes = [8, 128], strides = [1, 1]} : vector<8x768xf32> to vector<8x128xf32>
    %300 = vector.extract_strided_slice %298 {offsets = [0, 128], sizes = [8, 128], strides = [1, 1]} : vector<8x768xf32> to vector<8x128xf32>
    %301 = vector.extract_strided_slice %298 {offsets = [0, 256], sizes = [8, 128], strides = [1, 1]} : vector<8x768xf32> to vector<8x128xf32>
    %cst_123 = arith.constant dense<0.000000e+00> : vector<8x8xf32>
    %302 = tpu.matmul %299, %300, %cst_123 {dimension_numbers = #tpu.dot_dimension_numbers<[1], [1], [0], [0], [0, 0, 1, 0], [], []>} : vector<8x128xf32>, vector<8x128xf32>, vector<8x8xf32> -> vector<8x8xf32>
    %cst_124 = arith.constant 0.000000e+00 : f32
    %303 = vector.broadcast %cst_124 : f32 to vector<8x8xf32>
    %304 = arith.cmpf one, %302, %303 : vector<8x8xf32>
    %305 = arith.andi %16, %304 : vector<8x8xi1>
    %cst_125 = arith.constant 0xFF800000 : f32
    %306 = vector.broadcast %cst_125 : f32 to vector<8x8xf32>
    %307 = arith.select %305, %302, %306 : vector<8x8xi1>, vector<8x8xf32>
    %cst_126 = arith.constant dense<0xFF800000> : vector<8xf32>
    %308 = vector.multi_reduction <maximumf>, %307, %cst_126 [1] : vector<8x8xf32> to vector<8xf32>
    %309 = vector.shape_cast %308 : vector<8xf32> to vector<8x1xf32>
    %310 = vector.broadcast %309 : vector<8x1xf32> to vector<8x8xf32>
    %311 = arith.subf %307, %310 : vector<8x8xf32>
    %312 = math.exp %311 : vector<8x8xf32>
    %cst_127 = arith.constant dense<0.000000e+00> : vector<8xf32>
    %313 = vector.multi_reduction <add>, %312, %cst_127 [1] : vector<8x8xf32> to vector<8xf32>
    %314 = vector.shape_cast %313 : vector<8xf32> to vector<8x1xf32>
    %315 = tpu.reciprocal %314 {approx = true} : vector<8x1xf32> -> vector<8x1xf32>
    %316 = arith.mulf %314, %315 : vector<8x1xf32>
    %cst_128 = arith.constant 2.000000e+00 : f32
    %317 = vector.broadcast %cst_128 : f32 to vector<8x1xf32>
    %318 = arith.subf %317, %316 : vector<8x1xf32>
    %319 = arith.mulf %315, %318 : vector<8x1xf32>
    %320 = vector.broadcast %319 : vector<8x1xf32> to vector<8x8xf32>
    %321 = arith.mulf %312, %320 : vector<8x8xf32>
    %cst_129 = arith.constant dense<0.000000e+00> : vector<8x128xf32>
    %322 = tpu.matmul %321, %301, %cst_129 {dimension_numbers = #tpu.dot_dimension_numbers<[1], [0], [0], [1], [0, 0, 1, 1], [], []>} : vector<8x8xf32>, vector<8x128xf32>, vector<8x128xf32> -> vector<8x128xf32>
    %323 = vector.extract_strided_slice %243 {offsets = [0, 0], sizes = [128, 64], strides = [1, 1]} : vector<256x64xf32> to vector<128x64xf32>
    %cst_130 = arith.constant dense<0.000000e+00> : vector<8x64xf32>
    %324 = tpu.matmul %322, %323, %cst_130 {dimension_numbers = #tpu.dot_dimension_numbers<[1], [0], [0], [1], [0, 0, 1, 1], [], []>} : vector<8x128xf32>, vector<128x64xf32>, vector<8x64xf32> -> vector<8x64xf32>
    %325 = vector.extract_strided_slice %298 {offsets = [0, 384], sizes = [8, 128], strides = [1, 1]} : vector<8x768xf32> to vector<8x128xf32>
    %326 = vector.extract_strided_slice %298 {offsets = [0, 512], sizes = [8, 128], strides = [1, 1]} : vector<8x768xf32> to vector<8x128xf32>
    %327 = vector.extract_strided_slice %298 {offsets = [0, 640], sizes = [8, 128], strides = [1, 1]} : vector<8x768xf32> to vector<8x128xf32>
    %cst_131 = arith.constant dense<0.000000e+00> : vector<8x8xf32>
    %328 = tpu.matmul %325, %326, %cst_131 {dimension_numbers = #tpu.dot_dimension_numbers<[1], [1], [0], [0], [0, 0, 1, 0], [], []>} : vector<8x128xf32>, vector<8x128xf32>, vector<8x8xf32> -> vector<8x8xf32>
    %cst_132 = arith.constant 0.000000e+00 : f32
    %329 = vector.broadcast %cst_132 : f32 to vector<8x8xf32>
    %330 = arith.cmpf one, %328, %329 : vector<8x8xf32>
    %331 = arith.andi %16, %330 : vector<8x8xi1>
    %cst_133 = arith.constant 0xFF800000 : f32
    %332 = vector.broadcast %cst_133 : f32 to vector<8x8xf32>
    %333 = arith.select %331, %328, %332 : vector<8x8xi1>, vector<8x8xf32>
    %cst_134 = arith.constant dense<0xFF800000> : vector<8xf32>
    %334 = vector.multi_reduction <maximumf>, %333, %cst_134 [1] : vector<8x8xf32> to vector<8xf32>
    %335 = vector.shape_cast %334 : vector<8xf32> to vector<8x1xf32>
    %336 = vector.broadcast %335 : vector<8x1xf32> to vector<8x8xf32>
    %337 = arith.subf %333, %336 : vector<8x8xf32>
    %338 = math.exp %337 : vector<8x8xf32>
    %cst_135 = arith.constant dense<0.000000e+00> : vector<8xf32>
    %339 = vector.multi_reduction <add>, %338, %cst_135 [1] : vector<8x8xf32> to vector<8xf32>
    %340 = vector.shape_cast %339 : vector<8xf32> to vector<8x1xf32>
    %341 = tpu.reciprocal %340 {approx = true} : vector<8x1xf32> -> vector<8x1xf32>
    %342 = arith.mulf %340, %341 : vector<8x1xf32>
    %cst_136 = arith.constant 2.000000e+00 : f32
    %343 = vector.broadcast %cst_136 : f32 to vector<8x1xf32>
    %344 = arith.subf %343, %342 : vector<8x1xf32>
    %345 = arith.mulf %341, %344 : vector<8x1xf32>
    %346 = vector.broadcast %345 : vector<8x1xf32> to vector<8x8xf32>
    %347 = arith.mulf %338, %346 : vector<8x8xf32>
    %cst_137 = arith.constant dense<0.000000e+00> : vector<8x128xf32>
    %348 = tpu.matmul %347, %327, %cst_137 {dimension_numbers = #tpu.dot_dimension_numbers<[1], [0], [0], [1], [0, 0, 1, 1], [], []>} : vector<8x8xf32>, vector<8x128xf32>, vector<8x128xf32> -> vector<8x128xf32>
    %349 = vector.extract_strided_slice %243 {offsets = [128, 0], sizes = [128, 64], strides = [1, 1]} : vector<256x64xf32> to vector<128x64xf32>
    %cst_138 = arith.constant dense<0.000000e+00> : vector<8x64xf32>
    %350 = tpu.matmul %348, %349, %cst_138 {dimension_numbers = #tpu.dot_dimension_numbers<[1], [0], [0], [1], [0, 0, 1, 1], [], []>} : vector<8x128xf32>, vector<128x64xf32>, vector<8x64xf32> -> vector<8x64xf32>
    %351 = arith.addf %324, %350 : vector<8x64xf32>
    %352 = tpu.concatenate %297, %351 in 0 : vector<8x64xf32>, vector<8x64xf32> -> vector<16x64xf32>
    %353 = arith.addf %208, %352 : vector<16x64xf32>
    %c1_139 = arith.constant 1 : index
    %c0_140 = arith.constant 0 : index
    %c0_141 = arith.constant 0 : index
    %354 = vector.load %arg9[%c1_139, %c0_140, %c0_141] : memref<2x1x64xf32, #tpu.memory_space<vmem>>, vector<1x1x64xf32>
    %355 = vector.shape_cast %354 : vector<1x1x64xf32> to vector<1x64xf32>
    %356 = vector.broadcast %355 : vector<1x64xf32> to vector<16x64xf32>
    %357 = arith.addf %353, %356 : vector<16x64xf32>
    %c1_142 = arith.constant 1 : index
    %c0_143 = arith.constant 0 : index
    %c0_144 = arith.constant 0 : index
    %358 = vector.load %arg10[%c1_142, %c0_143, %c0_144] : memref<2x1x64xf32, #tpu.memory_space<vmem>>, vector<1x1x64xf32>
    %359 = vector.shape_cast %358 : vector<1x1x64xf32> to vector<1x64xf32>
    %c1_145 = arith.constant 1 : index
    %c0_146 = arith.constant 0 : index
    %c0_147 = arith.constant 0 : index
    %360 = vector.load %arg11[%c1_145, %c0_146, %c0_147] : memref<2x1x64xf32, #tpu.memory_space<vmem>>, vector<1x1x64xf32>
    %361 = vector.shape_cast %360 : vector<1x1x64xf32> to vector<1x64xf32>
    %cst_148 = arith.constant dense<0.000000e+00> : vector<16xf32>
    %362 = vector.multi_reduction <add>, %357, %cst_148 [1] : vector<16x64xf32> to vector<16xf32>
    %363 = vector.shape_cast %362 : vector<16xf32> to vector<16x1xf32>
    %364 = arith.mulf %357, %357 : vector<16x64xf32>
    %cst_149 = arith.constant dense<0.000000e+00> : vector<16xf32>
    %365 = vector.multi_reduction <add>, %364, %cst_149 [1] : vector<16x64xf32> to vector<16xf32>
    %366 = vector.shape_cast %365 : vector<16xf32> to vector<16x1xf32>
    %cst_150 = arith.constant 1.562500e-02 : f32
    %367 = vector.broadcast %cst_150 : f32 to vector<16x1xf32>
    %368 = arith.mulf %363, %367 : vector<16x1xf32>
    %cst_151 = arith.constant 1.562500e-02 : f32
    %369 = vector.broadcast %cst_151 : f32 to vector<16x1xf32>
    %370 = arith.mulf %366, %369 : vector<16x1xf32>
    %371 = arith.mulf %368, %368 : vector<16x1xf32>
    %372 = arith.subf %370, %371 : vector<16x1xf32>
    %373 = vector.broadcast %368 : vector<16x1xf32> to vector<16x64xf32>
    %374 = arith.subf %357, %373 : vector<16x64xf32>
    %cst_152 = arith.constant 9.99999974E-6 : f32
    %375 = vector.broadcast %cst_152 : f32 to vector<16x1xf32>
    %376 = arith.addf %372, %375 : vector<16x1xf32>
    %377 = math.rsqrt %376 : vector<16x1xf32>
    %378 = vector.broadcast %377 : vector<16x1xf32> to vector<16x64xf32>
    %379 = arith.mulf %374, %378 : vector<16x64xf32>
    %380 = vector.broadcast %359 : vector<1x64xf32> to vector<16x64xf32>
    %381 = arith.mulf %379, %380 : vector<16x64xf32>
    %382 = vector.broadcast %361 : vector<1x64xf32> to vector<16x64xf32>
    %383 = arith.addf %381, %382 : vector<16x64xf32>
    %c1_153 = arith.constant 1 : index
    %c0_154 = arith.constant 0 : index
    %c0_155 = arith.constant 0 : index
    %384 = vector.load %arg12[%c1_153, %c0_154, %c0_155] : memref<2x64x256xf32, #tpu.memory_space<vmem>>, vector<1x64x256xf32>
    %385 = vector.shape_cast %384 : vector<1x64x256xf32> to vector<64x256xf32>
    %cst_156 = arith.constant dense<0.000000e+00> : vector<16x256xf32>
    %386 = tpu.matmul %383, %385, %cst_156 {dimension_numbers = #tpu.dot_dimension_numbers<[1], [0], [0], [1], [0, 0, 1, 1], [], []>} : vector<16x64xf32>, vector<64x256xf32>, vector<16x256xf32> -> vector<16x256xf32>
    %c1_157 = arith.constant 1 : index
    %c0_158 = arith.constant 0 : index
    %c0_159 = arith.constant 0 : index
    %387 = vector.load %arg13[%c1_157, %c0_158, %c0_159] : memref<2x1x256xf32, #tpu.memory_space<vmem>>, vector<1x1x256xf32>
    %388 = vector.shape_cast %387 : vector<1x1x256xf32> to vector<1x256xf32>
    %389 = vector.broadcast %388 : vector<1x256xf32> to vector<16x256xf32>
    %390 = arith.addf %386, %389 : vector<16x256xf32>
    %cst_160 = arith.constant 0.000000e+00 : f32
    %391 = vector.broadcast %cst_160 : f32 to vector<16x256xf32>
    %392 = arith.maximumf %390, %391 : vector<16x256xf32>
    %c1_161 = arith.constant 1 : index
    %c0_162 = arith.constant 0 : index
    %c0_163 = arith.constant 0 : index
    %393 = vector.load %arg14[%c1_161, %c0_162, %c0_163] : memref<2x256x64xf32, #tpu.memory_space<vmem>>, vector<1x256x64xf32>
    %394 = vector.shape_cast %393 : vector<1x256x64xf32> to vector<256x64xf32>
    %cst_164 = arith.constant dense<0.000000e+00> : vector<16x64xf32>
    %395 = tpu.matmul %392, %394, %cst_164 {dimension_numbers = #tpu.dot_dimension_numbers<[1], [0], [0], [1], [0, 0, 1, 1], [], []>} : vector<16x256xf32>, vector<256x64xf32>, vector<16x64xf32> -> vector<16x64xf32>
    %c1_165 = arith.constant 1 : index
    %c0_166 = arith.constant 0 : index
    %c0_167 = arith.constant 0 : index
    %396 = vector.load %arg15[%c1_165, %c0_166, %c0_167] : memref<2x1x64xf32, #tpu.memory_space<vmem>>, vector<1x1x64xf32>
    %397 = vector.shape_cast %396 : vector<1x1x64xf32> to vector<1x64xf32>
    %398 = vector.broadcast %397 : vector<1x64xf32> to vector<16x64xf32>
    %399 = arith.addf %395, %398 : vector<16x64xf32>
    %400 = arith.addf %357, %399 : vector<16x64xf32>
    %c0_168 = arith.constant 0 : index
    %c0_169 = arith.constant 0 : index
    %401 = vector.load %arg16[%c0_168, %c0_169] : memref<64x128xf32, #tpu.memory_space<vmem>>, vector<64x128xf32>
    %cst_170 = arith.constant dense<0.000000e+00> : vector<16x128xf32>
    %402 = tpu.matmul %400, %401, %cst_170 {dimension_numbers = #tpu.dot_dimension_numbers<[1], [0], [0], [1], [0, 0, 1, 1], [], []>} : vector<16x64xf32>, vector<64x128xf32>, vector<16x128xf32> -> vector<16x128xf32>
    %c0_171 = arith.constant 0 : index
    %c0_172 = arith.constant 0 : index
    %403 = vector.load %arg17[%c0_171, %c0_172] : memref<1x128xf32, #tpu.memory_space<vmem>>, vector<1x128xf32>
    %404 = vector.broadcast %403 : vector<1x128xf32> to vector<16x128xf32>
    %405 = arith.addf %402, %404 : vector<16x128xf32>
    %c0_173 = arith.constant 0 : index
    %c0_174 = arith.constant 0 : index
    %406 = vector.load %arg18[%c0_173, %c0_174] : memref<16x128xf32, #tpu.memory_space<vmem>>, vector<16x128xf32>
    tpu.vector_store %arg18[%c0_173, %c0_174], %405 {strides = array<i32>} : memref<16x128xf32, #tpu.memory_space<vmem>>, vector<16x128xf32>,
    return
  }
  func.func @transform_0(%arg0: i32) -> (i32, i32) {
    %c0_i32 = arith.constant 0 : i32
    %c0_i32_0 = arith.constant 0 : i32
    return %arg0, %c0_i32 : i32, i32
  }
  func.func @transform_1(%arg0: i32) -> (i32, i32) {
    %c0_i32 = arith.constant 0 : i32
    %c0_i32_0 = arith.constant 0 : i32
    %c0_i32_1 = arith.constant 0 : i32
    return %c0_i32, %c0_i32_0 : i32, i32
  }
  func.func @transform_2(%arg0: i32) -> (i32, i32) {
    %c0_i32 = arith.constant 0 : i32
    %c0_i32_0 = arith.constant 0 : i32
    %c0_i32_1 = arith.constant 0 : i32
    return %c0_i32, %c0_i32_0 : i32, i32
  }
  func.func @transform_3(%arg0: i32) -> (i32, i32, i32) {
    %c0_i32 = arith.constant 0 : i32
    %c0_i32_0 = arith.constant 0 : i32
    %c0_i32_1 = arith.constant 0 : i32
    %c0_i32_2 = arith.constant 0 : i32
    return %c0_i32, %c0_i32_0, %c0_i32_1 : i32, i32, i32
  }
  func.func @transform_4(%arg0: i32) -> (i32, i32, i32) {
    %c0_i32 = arith.constant 0 : i32
    %c0_i32_0 = arith.constant 0 : i32
    %c0_i32_1 = arith.constant 0 : i32
    %c0_i32_2 = arith.constant 0 : i32
    return %c0_i32, %c0_i32_0, %c0_i32_1 : i32, i32, i32
  }
  func.func @transform_5(%arg0: i32) -> (i32, i32, i32) {
    %c0_i32 = arith.constant 0 : i32
    %c0_i32_0 = arith.constant 0 : i32
    %c0_i32_1 = arith.constant 0 : i32
    %c0_i32_2 = arith.constant 0 : i32
    return %c0_i32, %c0_i32_0, %c0_i32_1 : i32, i32, i32
  }
  func.func @transform_6(%arg0: i32) -> (i32, i32, i32) {
    %c0_i32 = arith.constant 0 : i32
    %c0_i32_0 = arith.constant 0 : i32
    %c0_i32_1 = arith.constant 0 : i32
    %c0_i32_2 = arith.constant 0 : i32
    return %c0_i32, %c0_i32_0, %c0_i32_1 : i32, i32, i32
  }
  func.func @transform_7(%arg0: i32) -> (i32, i32, i32) {
    %c0_i32 = arith.constant 0 : i32
    %c0_i32_0 = arith.constant 0 : i32
    %c0_i32_1 = arith.constant 0 : i32
    %c0_i32_2 = arith.constant 0 : i32
    return %c0_i32, %c0_i32_0, %c0_i32_1 : i32, i32, i32
  }
  func.func @transform_8(%arg0: i32) -> (i32, i32, i32) {
    %c0_i32 = arith.constant 0 : i32
    %c0_i32_0 = arith.constant 0 : i32
    %c0_i32_1 = arith.constant 0 : i32
    %c0_i32_2 = arith.constant 0 : i32
    return %c0_i32, %c0_i32_0, %c0_i32_1 : i32, i32, i32
  }
  func.func @transform_9(%arg0: i32) -> (i32, i32, i32) {
    %c0_i32 = arith.constant 0 : i32
    %c0_i32_0 = arith.constant 0 : i32
    %c0_i32_1 = arith.constant 0 : i32
    %c0_i32_2 = arith.constant 0 : i32
    return %c0_i32, %c0_i32_0, %c0_i32_1 : i32, i32, i32
  }
  func.func @transform_10(%arg0: i32) -> (i32, i32, i32) {
    %c0_i32 = arith.constant 0 : i32
    %c0_i32_0 = arith.constant 0 : i32
    %c0_i32_1 = arith.constant 0 : i32
    %c0_i32_2 = arith.constant 0 : i32
    return %c0_i32, %c0_i32_0, %c0_i32_1 : i32, i32, i32
  }
  func.func @transform_11(%arg0: i32) -> (i32, i32, i32) {
    %c0_i32 = arith.constant 0 : i32
    %c0_i32_0 = arith.constant 0 : i32
    %c0_i32_1 = arith.constant 0 : i32
    %c0_i32_2 = arith.constant 0 : i32
    return %c0_i32, %c0_i32_0, %c0_i32_1 : i32, i32, i32
  }
  func.func @transform_12(%arg0: i32) -> (i32, i32, i32) {
    %c0_i32 = arith.constant 0 : i32
    %c0_i32_0 = arith.constant 0 : i32
    %c0_i32_1 = arith.constant 0 : i32
    %c0_i32_2 = arith.constant 0 : i32
    return %c0_i32, %c0_i32_0, %c0_i32_1 : i32, i32, i32
  }
  func.func @transform_13(%arg0: i32) -> (i32, i32, i32) {
    %c0_i32 = arith.constant 0 : i32
    %c0_i32_0 = arith.constant 0 : i32
    %c0_i32_1 = arith.constant 0 : i32
    %c0_i32_2 = arith.constant 0 : i32
    return %c0_i32, %c0_i32_0, %c0_i32_1 : i32, i32, i32
  }
  func.func @transform_14(%arg0: i32) -> (i32, i32, i32) {
    %c0_i32 = arith.constant 0 : i32
    %c0_i32_0 = arith.constant 0 : i32
    %c0_i32_1 = arith.constant 0 : i32
    %c0_i32_2 = arith.constant 0 : i32
    return %c0_i32, %c0_i32_0, %c0_i32_1 : i32, i32, i32
  }
  func.func @transform_15(%arg0: i32) -> (i32, i32) {
    %c0_i32 = arith.constant 0 : i32
    %c0_i32_0 = arith.constant 0 : i32
    %c0_i32_1 = arith.constant 0 : i32
    return %c0_i32, %c0_i32_0 : i32, i32
  }
  func.func @transform_16(%arg0: i32) -> (i32, i32) {
    %c0_i32 = arith.constant 0 : i32
    %c0_i32_0 = arith.constant 0 : i32
    %c0_i32_1 = arith.constant 0 : i32
    return %c0_i32, %c0_i32_0 : i32, i32
  }
  func.func @transform_17(%arg0: i32) -> (i32, i32) {
    %c0_i32 = arith.constant 0 : i32
    %c0_i32_0 = arith.constant 0 : i32
    return %arg0, %c0_i32 : i32, i32
  }
}

</mosaic_0001>

<bundles_post_ra>
// kernel: tpu_custom_call.1
= control target key start
LH: loop header
LB: loop body
LE: loop exit
PB: predicated region body
PF: predicated region fallthrough
CT: control target
= control target key end

     0   :  { %s3419_s0 = inlined_call_operand.vmem [shape: s32[16,1], index: 0, kind: input, shape index: {}]   ;;  %s3420_s1 = inlined_call_operand.vmem [shape: f32[128,64], index: 1, kind: input, shape index: {}]   ;;  %s3421_s2 = inlined_call_operand.vmem [shape: f32[128,64], index: 2, kind: input, shape index: {}]   ;;  %s3422_s3 = inlined_call_operand.vmem [shape: f32[2,1,64], index: 3, kind: input, shape index: {}]   ;;  %s3423_s4 = inlined_call_operand.vmem [shape: f32[2,1,64], index: 4, kind: input, shape index: {}]   ;;  %s3424_s5 = inlined_call_operand.vmem [shape: f32[2,64,768], index: 5, kind: input, shape index: {}]   ;;  %s3425_s6 = inlined_call_operand.vmem [shape: f32[2,1,768], index: 6, kind: input, shape index: {}]   ;;  %s3426_s7 = inlined_call_operand.vmem [shape: f32[2,256,64], index: 7, kind: input, shape index: {}]   ;;  %s3427_s8 = inlined_call_operand.vmem [shape: f32[2,1,64], index: 8, kind: input, shape index: {}]   ;;  %s3428_s9 = inlined_call_operand.vmem [shape: f32[2,1,64], index: 9, kind: input, shape index: {}]   ;;  %s3429_s10 = inlined_call_operand.vmem [shape: f32[2,1,64], index: 10, kind: input, shape index: {}]   ;;  %s3430_s11 = inlined_call_operand.vmem [shape: f32[2,64,256], index: 11, kind: input, shape index: {}]   ;;  %s3431_s12 = inlined_call_operand.vmem [shape: f32[2,1,256], index: 12, kind: input, shape index: {}]   ;;  %s3432_s13 = inlined_call_operand.vmem [shape: f32[2,256,64], index: 13, kind: input, shape index: {}]   ;;  %s3433_s14 = inlined_call_operand.vmem [shape: f32[2,1,64], index: 14, kind: input, shape index: {}]   ;;  %s3434_s15 = inlined_call_operand.vmem [shape: f32[64,128], index: 15, kind: input, shape index: {}]   ;;  %s3435_s16 = inlined_call_operand.vmem [shape: f32[1,128], index: 16, kind: input, shape index: {}]   ;;  %s3436_s17 = inlined_call_operand.hbm [shape: f32[16,128], index: 17, kind: output, shape index: {}]  }
   0x1   :  { %3440 = sst [smem:[#allocation5_spill]] %s3419_s0 }
   0x2   :  { %3441 = sst [smem:[#allocation6_spill]] %s3420_s1 }
   0x3   :  { %3442 = sst [smem:[#allocation7_spill]] %s3431_s12 }
   0x4   :  { %s3443_s26 = sld [smem:[#allocation5_spill]]  ;;  %v2162_v2 = vmov 0  }
   0x5   :  { %s3444_s12 = sld [smem:[#allocation6_spill]]  ;;  %2074 = vset.pattern.permute.xlu0 %v2162_v2 }
   0xa   :  { %v57_v0 = vld [vmem:[%s3443_s26] sm:$0xff]  ;;  %v58_v6 = vld [vmem:[%s3443_s26 + $0x8] sm:$0xff] }
   0xb   :  { %v88_v1 = vld [vmem:[%s3444_s12 + $0x78] sm:$0xff]  ;;  %v87_v3 = vld [vmem:[%s3444_s12 + $0x70] sm:$0xff]  ;;  %62 = vperm.xlu0 %2074, %v57_v0   ;;  %v86_v4 = vld [vmem:[%s3444_s12 + $0x68] sm:$0xff] }
   0xc   :  { %90 = vmatpush.msra.mxu0 %v88_v1  ;;  %v85_v5 = vld [vmem:[%s3444_s12 + $0x60] sm:$0xff]  ;;  %v84_v7 = vld [vmem:[%s3444_s12 + $0x58] sm:$0xff]  ;;  %v83_v8 = vld [vmem:[%s3444_s12 + $0x50] sm:$0xff] }
   0xd   :  { %v82_v9 = vld [vmem:[%s3444_s12 + $0x48] sm:$0xff] }
   0xe   :  { %91 = vmatpush.msra.mxu0 %v87_v3 }
  0x10   :  { %92 = vmatpush.msra.mxu0 %v86_v4 }
  0x12   :  { %93 = vmatpush.msra.mxu0 %v85_v5 }
  0x13   :  { %65 = vperm.xlu0 %2074, %v58_v6  }
  0x14   :  { %94 = vmatpush.msra.mxu0 %v84_v7 }
  0x15   :  { %22 = vsyncpa [#allocation3], 0  ;;  %v81_v10 = vld [vmem:[%s3444_s12 + $0x40] sm:$0xff]  ;;  %v80_v11 = vld [vmem:[%s3444_s12 + $0x38] sm:$0xff]  ;;  %v59_v19 = vlaneseq  ;;  %v2163_v22 = vmov 1.0   ;;  %vm118_vm2 = vcmask 523264  }
  0x16   :  { %95 = vmatpush.msra.mxu0 %v83_v8  ;;  %v79_v12 = vld [vmem:[%s3444_s12 + $0x30] sm:$0xff]  ;;  %v78_v13 = vld [vmem:[%s3444_s12 + $0x28] sm:$0xff]  ;;  %v77_v14 = vld [vmem:[%s3444_s12 + $0x20] sm:$0xff]  ;;  %vm438_vm11 = vcmask 64512   ;;  %s3447_s30 = sld [smem:[#allocation7_spill]]  ;;  %s2165_s25 = smov 128  }
  0x17   :  { %v76_v15 = vld [vmem:[%s3444_s12 + $0x18] sm:$0xff]  ;;  %v75_v16 = vld [vmem:[%s3444_s12 + $0x10] sm:$0xff]  ;;  %v74_v17 = vld [vmem:[%s3444_s12 + $0x8] sm:$0xff]  ;;  %v2312_v20 = vand.u32 127, %v59_v19  ;;  %s2166_s27 = smov 8  }
  0x18   :  { %96 = vmatpush.msra.mxu0 %v82_v9  ;;  %v73_v18 = vld [vmem:[%s3444_s12] sm:$0xff]  ;;  %v219_v35 = vld [vmem:[%s3424_s5 + $0x150] sm:$0xff]  ;;  %v220_v36 = vld [vmem:[%s3424_s5 + $0x158] sm:$0xff] }
  0x19   :  { %v89_v24 = vld [vmem:[%s3421_s2] sm:$0xff]  ;;  %253 = vmatpush.msra.mxu1 %v219_v35  ;;  %276 = vmatpush.msra.mxu2 %v220_v36  ;;  %v214_v39 = vld [vmem:[%s3424_s5 + $0x128] sm:$0xff]  ;;  %v215_v40 = vld [vmem:[%s3424_s5 + $0x130] sm:$0xff] }
  0x1a   :  { %97 = vmatpush.msra.mxu0 %v81_v10  ;;  %v221_v37 = vld [vmem:[%s3424_s5 + $0x160] sm:$0xff]  ;;  %v207_v41 = vld [vmem:[%s3424_s5 + $0xf0] sm:$0xff]  ;;  %v208_v42 = vld [vmem:[%s3424_s5 + $0xf8] sm:$0xff] }
  0x1b   :  { %299 = vmatpush.msra.mxu3 %v221_v37  ;;  %v213_v38 = vld [vmem:[%s3424_s5 + $0x120] sm:$0xff]  ;;  %277 = vmatpush.msra.mxu2 %v214_v39  ;;  %v202_v45 = vld [vmem:[%s3424_s5 + $0xc8] sm:$0xff]  ;;  %v203_v46 = vld [vmem:[%s3424_s5 + $0xd0] sm:$0xff] }
  0x1c   :  { %98 = vmatpush.msra.mxu0 %v80_v11  ;;  %254 = vmatpush.msra.mxu1 %v213_v38  ;;  %v209_v43 = vld [vmem:[%s3424_s5 + $0x100] sm:$0xff]  ;;  %v195_v47 = vld [vmem:[%s3424_s5 + $0x90] sm:$0xff]  ;;  %v196_v48 = vld [vmem:[%s3424_s5 + $0x98] sm:$0xff] }
  0x1d   :  { %300 = vmatpush.msra.mxu3 %v215_v40  ;;  %278 = vmatpush.msra.mxu2 %v208_v42  ;;  %v201_v44 = vld [vmem:[%s3424_s5 + $0xc0] sm:$0xff]  ;;  %v190_v52 = vld [vmem:[%s3424_s5 + $0x68] sm:$0xff]  ;;  %v191_v53 = vld [vmem:[%s3424_s5 + $0x70] sm:$0xff] }
  0x1e   :  { %99 = vmatpush.msra.mxu0 %v79_v12  ;;  %255 = vmatpush.msra.mxu1 %v207_v41  ;;  %v197_v49 = vld [vmem:[%s3424_s5 + $0xa0] sm:$0xff]  ;;  %v183_v54 = vld [vmem:[%s3424_s5 + $0x30] sm:$0xff]  ;;  %v184_v55 = vld [vmem:[%s3424_s5 + $0x38] sm:$0xff] }
  0x1f   :  { %301 = vmatpush.msra.mxu3 %v209_v43  ;;  %279 = vmatpush.msra.mxu2 %v202_v45  ;;  %v189_v51 = vld [vmem:[%s3424_s5 + $0x60] sm:$0xff]  ;;  %v178_v59 = vld [vmem:[%s3424_s5 + $0x8] sm:$0xff]  ;;  %v179_v60 = vld [vmem:[%s3424_s5 + $0x10] sm:$0xff] }
  0x20   :  { %100 = vmatpush.msra.mxu0 %v78_v13  ;;  %256 = vmatpush.msra.mxu1 %v201_v44  ;;  %v185_v56 = vld [vmem:[%s3424_s5 + $0x40] sm:$0xff]  ;;  %v222_v63 = vld [vmem:[%s3424_s5 + $0x168] sm:$0xff]  ;;  %v223_v0 = vld [vmem:[%s3424_s5 + $0x170] sm:$0xff] }
  0x21   :  { %302 = vmatpush.msra.mxu3 %v203_v46  ;;  %280 = vmatpush.msra.mxu2 %v196_v48  ;;  %v177_v58 = vld [vmem:[%s3424_s5] sm:$0xff]  ;;  %v224_v1 = vld [vmem:[%s3424_s5 + $0x178] sm:$0xff]  ;;  %v218_v6 = vld [vmem:[%s3424_s5 + $0x148] sm:$0xff] }
  0x22   :  { %101 = vmatpush.msra.mxu0 %v77_v14  ;;  %257 = vmatpush.msra.mxu1 %v195_v47  ;;  %v216_v4 = vld [vmem:[%s3424_s5 + $0x138] sm:$0xff]  ;;  %v217_v5 = vld [vmem:[%s3424_s5 + $0x140] sm:$0xff]  ;;  %v210_v8 = vld [vmem:[%s3424_s5 + $0x108] sm:$0xff] }
  0x23   :  { %303 = vmatpush.msra.mxu3 %v197_v49  ;;  %281 = vmatpush.msra.mxu2 %v190_v52  ;;  %v211_v9 = vld [vmem:[%s3424_s5 + $0x110] sm:$0xff]  ;;  %v212_v10 = vld [vmem:[%s3424_s5 + $0x118] sm:$0xff]  ;;  %v205_v14 = vld [vmem:[%s3424_s5 + $0xe0] sm:$0xff] }
  0x24   :  { %102 = vmatpush.msra.mxu0 %v76_v15  ;;  %258 = vmatpush.msra.mxu1 %v189_v51  ;;  %v204_v13 = vld [vmem:[%s3424_s5 + $0xd8] sm:$0xff]  ;;  %v206_v15 = vld [vmem:[%s3424_s5 + $0xe8] sm:$0xff]  ;;  %v2075_v46 = vld [vmem:[%s3422_s3] ss:$0 sm:$0xff] }
  0x25   :  { %304 = vmatpush.msra.mxu3 %v191_v53  ;;  %282 = vmatpush.msra.mxu2 %v184_v55  ;;  %v182_v37 = vld [vmem:[%s3424_s5 + $0x28] sm:$0xff]  ;;  %v2076_v49 = vld [vmem:[%s3423_s4] ss:$0 sm:$0xff] }
  0x26   :  { %103 = vmatpush.msra.mxu0 %v75_v16  ;;  %259 = vmatpush.msra.mxu1 %v183_v54 }
  0x27   :  { %305 = vmatpush.msra.mxu3 %v185_v56  ;;  %283 = vmatpush.msra.mxu2 %v178_v59 }
  0x28   :  { %104 = vmatpush.msra.mxu0 %v74_v17  ;;  %260 = vmatpush.msra.mxu1 %v177_v58  ;;  %v198_v17 = vld [vmem:[%s3424_s5 + $0xa8] sm:$0xff] }
  0x29   :  { %306 = vmatpush.msra.mxu3 %v179_v60  ;;  %345 = vmatpush.msrb.mxu2 %v223_v0 }
  0x2a   :  { %105 = vmatpush.msra.mxu0 %v73_v18  ;;  %322 = vmatpush.msrb.mxu1 %v222_v63  ;;  %v199_v18 = vld [vmem:[%s3424_s5 + $0xb0] sm:$0xff] }
  0x2b   :  { %368 = vmatpush.msrb.mxu3 %v224_v1  ;;  %346 = vmatpush.msrb.mxu2 %v217_v5 }
  0x2c   :  { %323 = vmatpush.msrb.mxu1 %v216_v4 }
  0x2d   :  { %369 = vmatpush.msrb.mxu3 %v218_v6  ;;  %347 = vmatpush.msrb.mxu2 %v211_v9 }
  0x2e   :  { %324 = vmatpush.msrb.mxu1 %v210_v8 }
  0x2f   :  { %370 = vmatpush.msrb.mxu3 %v212_v10  ;;  %348 = vmatpush.msrb.mxu2 %v205_v14 }
  0x30   :  { %325 = vmatpush.msrb.mxu1 %v204_v13 }
  0x31   :  { %371 = vmatpush.msrb.mxu3 %v206_v15  ;;  %349 = vmatpush.msrb.mxu2 %v199_v18 }
  0x32   :  { %326 = vmatpush.msrb.mxu1 %v198_v17 }
  0x7d   :  { %v63_v21 = vpop.permute.xlu0 %62 }
  0x7e   :  { %vm67_vm0 = vcmp.eq.s32.totalorder %v63_v21, %v2312_v20  ;;  %v200_v21 = vld [vmem:[%s3424_s5 + $0xb8] sm:$0xff] }
  0x7f   :  { %1889 = vmatmul.msk.f32.vlgmr.msra.gmra.mxu0 %vm67_vm0, %v2163_v22  ;;  %372 = vmatpush.msrb.mxu3 %v200_v21 }
  0x85   :  { %v66_v23 = vpop.permute.xlu0 %65 }
  0x86   :  { %vm68_vm1 = vcmp.eq.s32.totalorder %v66_v23, %v2312_v20 }
  0x87   :  { %1890 = vmatmul.msk.f32.gmra.mxu0 %vm68_vm1, %v2163_v22 }
  0xfc   :  { %v107_v25 = vpop.f32.mrf.mxu0 }
  0xfd   :  { %v2319_v26 = vadd.f32 %v107_v25, %v89_v24  ;;  %v193_v25 = vld [vmem:[%s3424_s5 + $0x80] sm:$0xff] }
  0xfe   :  { %350 = vmatpush.msrb.mxu2 %v193_v25 }
  0xff   :  { %v119_v27 = vsel %vm118_vm2, %v2319_v26, 0.0  ;;  %v125_v28 = vmul.f32 %v2319_v26, %v2319_v26 }
 0x100   :  { %120 = vadd.xlane.f32.xlu1 %v119_v27  ;;  %v194_v27 = vld [vmem:[%s3424_s5 + $0x88] sm:$0xff] }
 0x101   :  { %v127_v31 = vsel %vm118_vm2, %v125_v28, 0.0  ;;  %v186_v28 = vld [vmem:[%s3424_s5 + $0x48] sm:$0xff]  ;;  %373 = vmatpush.msrb.mxu3 %v194_v27 }
 0x104   :  { %v110_v29 = vpop.f32.mrf.mxu0 }
 0x105   :  { %v2325_v30 = vadd.f32 %v110_v29, %v89_v24  ;;  %v192_v24 = vld [vmem:[%s3424_s5 + $0x78] sm:$0xff]  ;;  %v187_v29 = vld [vmem:[%s3424_s5 + $0x50] sm:$0xff] }
 0x106   :  { %327 = vmatpush.msrb.mxu1 %v192_v24  ;;  %351 = vmatpush.msrb.mxu2 %v187_v29 }
 0x107   :  { %v122_v32 = vsel %vm118_vm2, %v2325_v30, 0.0  ;;  %v126_v33 = vmul.f32 %v2325_v30, %v2325_v30 }
 0x108   :  { %128 = vadd.xlane.f32.xlu1 %v127_v31  ;;  %123 = vadd.xlane.f32.xlu2 %v122_v32  ;;  %v188_v32 = vld [vmem:[%s3424_s5 + $0x58] sm:$0xff] }
 0x109   :  { %v130_v34 = vsel %vm118_vm2, %v126_v33, 0.0  ;;  %v180_v33 = vld [vmem:[%s3424_s5 + $0x18] sm:$0xff]  ;;  %328 = vmatpush.msrb.mxu1 %v186_v28  ;;  %374 = vmatpush.msrb.mxu3 %v188_v32 }
 0x10b   :  { %329 = vmatpush.msrb.mxu1 %v180_v33  ;;  %375 = vmatpush.msrb.mxu3 %v182_v37 }
 0x110   :  { %131 = vadd.xlane.f32.xlu2 %v130_v34  ;;  %v181_v34 = vld [vmem:[%s3424_s5 + $0x20] sm:$0xff] }
 0x111   :  { %352 = vmatpush.msrb.mxu2 %v181_v34 }
 0x173   :  { %v121_v50 = vpop.xlane.xlu1 %120 }
 0x174   :  { %v2396_v57 = vmul.f32 0.015625, %v121_v50 }
 0x176   :  { %v137_v2 = vmul.f32 %v2396_v57, %v2396_v57  ;;  %v141_v45 = vsub.f32 %v2319_v26, %v2396_v57 }
 0x17b   :  { %v129_v61 = vpop.xlane.xlu1 %128  ;;  %v124_v62 = vpop.xlane.xlu2 %123 }
 0x17c   :  { %v135_v3 = vmul.f32 0.015625, %v129_v61  ;;  %v2436_v12 = vmul.f32 0.015625, %v124_v62  ;;  %v2510_v61 = vld [vmem:[%s3425_s6] sm:$0x3f] }
 0x17d   :  { %v228_v63 = vperm.slane %v2510_v61, 1  ;;  %v229_v0 = vperm.slane %v2510_v61, 2  ;;  %v227_v1 = vperm.slane %v2510_v61, 0  ;;  %v230_v13 = vperm.slane %v2510_v61, 3 }
 0x17e   :  { %v139_v7 = vsub.f32 %v135_v3, %v137_v2  ;;  %v138_v22 = vmul.f32 %v2436_v12, %v2436_v12  ;;  %v142_v56 = vsub.f32 %v2325_v30, %v2436_v12  ;;  %v232_v12 = vperm.slane %v2510_v61, 5 }
 0x180   :  { %v143_v11 = vadd.f32 1e-05, %v139_v7 }
 0x182   :  { %2088 = vrsqrt.f32 %v143_v11  ;;  %vm151_vm4 = vweird.f32 %v143_v11 }
 0x183   :  { %v132_v16 = vpop.xlane.xlu2 %131 }
 0x184   :  { %v136_v23 = vmul.f32 0.015625, %v132_v16 }
 0x186   :  { %v140_v31 = vsub.f32 %v136_v23, %v138_v22 }
 0x188   :  { %v2089_v35 = vpop.eup %2088  ;;  %v144_v36 = vadd.f32 1e-05, %v140_v31  ;;  %v114_v31 = vshrl.u32 %v59_v19, 7 }
 0x189   :  { %v146_v38 = vmul.f32 %v2089_v35, %v143_v11  ;;  %vm152_vm3 = vweird.f32 %v2089_v35  ;;  %v231_v11 = vperm.slane %v2510_v61, 4  ;;  %v388_v61 = vld [vmem:[%s3426_s7 + $0x28] sm:$0xff] }
 0x18a   :  { %2090 = vrsqrt.f32 %v144_v36  ;;  %vm153_vm5 = vmor %vm151_vm4, %vm152_vm3  ;;  %vm161_vm7 = vweird.f32 %v144_v36  ;;  %vm2526_vm9 = vcmp.ge.s32.totalorder %v114_v31, %v2312_v20  ;;  %v391_v31 = vld [vmem:[%s3426_s7 + $0x40] sm:$0xff] }
 0x18b   :  { %v147_v39 = vmul.f32 %v2089_v35, %v146_v38 }
 0x18d   :  { %v148_v40 = vmul.f32 0.5, %v147_v39 }
 0x18f   :  { %v149_v41 = vsub.f32 1.5, %v148_v40 }
 0x190   :  { %v2091_v42 = vpop.eup %2090 }
 0x191   :  { %v150_v43 = vmul.f32 %v2089_v35, %v149_v41  ;;  %v156_v44 = vmul.f32 %v2091_v42, %v144_v36  ;;  %vm162_vm6 = vweird.f32 %v2091_v42 }
 0x192   :  { %vm163_vm8 = vmor %vm161_vm7, %vm162_vm6 }
 0x193   :  { %v154_v47 = vsel %vm153_vm5, %v2089_v35, %v150_v43  ;;  %v157_v48 = vmul.f32 %v2091_v42, %v156_v44 }
 0x194   :  { %v165_v50 = vmul.f32 %v154_v47, %v141_v45 }
 0x195   :  { %v158_v51 = vmul.f32 0.5, %v157_v48 }
 0x196   :  { %v170_v52 = vmul.f32 %v2075_v46, %v165_v50 }
 0x197   :  { %v159_v53 = vsub.f32 1.5, %v158_v51 }
 0x198   :  { %v175_v54 = vadd.f32 %v2076_v49, %v170_v52 }
 0x199   :  { %v160_v55 = vmul.f32 %v2091_v42, %v159_v53 }
 0x19a   :  { %1891 = vmatmul.msk.f32.vlgmr.msra.gmra.mxu1 %vm118_vm2, %v175_v54  ;;  %1893 = vmatmul.msk.f32.vlgmr.msra.gmra.mxu2 %vm118_vm2, %v175_v54 }
 0x19b   :  { %v164_v57 = vsel %vm163_vm8, %v2091_v42, %v160_v55  ;;  %1895 = vmatmul.msk.f32.vlgmr.msra.gmra.mxu3 %vm118_vm2, %v175_v54 }
 0x19c   :  { %v166_v58 = vmul.f32 %v164_v57, %v142_v56 }
 0x19e   :  { %v171_v59 = vmul.f32 %v2075_v46, %v166_v58 }
 0x1a0   :  { %v176_v60 = vadd.f32 %v2076_v49, %v171_v59 }
 0x1a2   :  { %1892 = vmatmul.msk.f32.gmra.mxu1 %vm118_vm2, %v176_v60  ;;  %1894 = vmatmul.msk.f32.gmra.mxu2 %vm118_vm2, %v176_v60 }
 0x1a3   :  { %1896 = vmatmul.msk.f32.gmra.mxu3 %vm118_vm2, %v176_v60 }
 0x1aa   :  { %1897 = vmatmul.msk.f32.vlgmr.msrb.gmra.mxu1 %vm118_vm2, %v175_v54  ;;  %1899 = vmatmul.msk.f32.vlgmr.msrb.gmra.mxu2 %vm118_vm2, %v175_v54 }
 0x1ab   :  { %1901 = vmatmul.msk.f32.vlgmr.msrb.gmra.mxu3 %vm118_vm2, %v175_v54 }
 0x1b2   :  { %1898 = vmatmul.msk.f32.gmra.mxu1 %vm118_vm2, %v176_v60  ;;  %1900 = vmatmul.msk.f32.gmra.mxu2 %vm118_vm2, %v176_v60 }
 0x1b3   :  { %1902 = vmatmul.msk.f32.gmra.mxu3 %vm118_vm2, %v176_v60 }
 0x217   :  { %v262_v62 = vpop.f32.mrf.mxu1 }
 0x218   :  { %v263_v6 = vadd.f32 %v262_v62, %v227_v1 }
 0x21d   :  { %v285_v2 = vpop.f32.mrf.mxu2 }
 0x21e   :  { %v286_v3 = vadd.f32 %v285_v2, %v228_v63  ;;  %v308_v4 = vpop.f32.mrf.mxu3 }
 0x21f   :  { %v309_v5 = vadd.f32 %v308_v4, %v229_v0  ;;  %v265_v7 = vpop.f32.mrf.mxu1 }
 0x220   :  { %430 = vmatpush.xpose.msra.mxu3 %v286_v3  ;;  %v266_v25 = vadd.f32 %v265_v7, %v227_v1  ;;  %v2559_v7 = vld [vmem:[%s3426_s7 + $0x78] sm:$0xff] }
 0x221   :  { %556 = vmatpush.msra.mxu1 %v2559_v7 }
 0x223   :  { %431 = vmatmul.f32.vlgmr.msra.gmra.mxu3 %v263_v6 }
 0x224   :  { %471 = vmatpush.msrb.mxu3 %v309_v5 }
 0x225   :  { %v288_v8 = vpop.f32.mrf.mxu2 }
 0x226   :  { %v311_v9 = vpop.f32.mrf.mxu3  ;;  %v289_v18 = vadd.f32 %v288_v8, %v228_v63  ;;  %v2564_v8 = vld [vmem:[%s3426_s7 + $0x70] sm:$0xff] }
 0x227   :  { %v2515_v10 = vadd.f32 %v311_v9, %v229_v0  ;;  %v331_v15 = vpop.f32.mrf.mxu1  ;;  %v2571_v9 = vld [vmem:[%s3426_s7 + $0x68] sm:$0xff]  ;;  %557 = vmatpush.msra.mxu1 %v2564_v8 }
 0x228   :  { %v332_v22 = vadd.f32 %v331_v15, %v230_v13  ;;  %v2592_v15 = vld [vmem:[%s3426_s7 + $0x58] sm:$0xff] }
 0x229   :  { %558 = vmatpush.msra.mxu1 %v2571_v9 }
 0x22d   :  { %v354_v14 = vpop.f32.mrf.mxu2 }
 0x22e   :  { %v355_v16 = vadd.f32 %v354_v14, %v231_v11  ;;  %v377_v17 = vpop.f32.mrf.mxu3  ;;  %v412_v14 = vld [vmem:[%s3426_s7 + $0xe8] sm:$0xff] }
 0x22f   :  { %v378_v21 = vadd.f32 %v377_v17, %v232_v12  ;;  %v334_v27 = vpop.f32.mrf.mxu1 }
 0x230   :  { %491 = vmatpush.xpose.msra.mxu2 %v355_v16  ;;  %v335_v28 = vadd.f32 %v334_v27, %v230_v13  ;;  %v413_v13 = vld [vmem:[%s3426_s7 + $0xf0] sm:$0xff]  ;;  %v411_v16 = vld [vmem:[%s3426_s7 + $0xe0] sm:$0xff] }
 0x231   :  { %531 = vmatpush.msra.mxu3 %v378_v21  ;;  %v409_v27 = vld [vmem:[%s3426_s7 + $0xd0] sm:$0xff] }
 0x233   :  { %492 = vmatmul.f32.vlgmr.msra.gmra.mxu2 %v332_v22  ;;  %v393_v22 = vld [vmem:[%s3426_s7 + $0x50] sm:$0xff] }
 0x234   :  { %591 = vmatpush.xpose.msrb.mxu2 %v289_v18 }
 0x235   :  { %v357_v23 = vpop.f32.mrf.mxu2 }
 0x236   :  { %v358_v24 = vadd.f32 %v357_v23, %v231_v11  ;;  %v2522_v29 = vpop.f32.mrf.mxu3  ;;  %v414_v11 = vld [vmem:[%s3426_s7 + $0xf8] sm:$0xff] }
 0x237   :  { %536 = vmatpush.msrb.mxu0 %v414_v11  ;;  %v410_v23 = vld [vmem:[%s3426_s7 + $0xd8] sm:$0xff] }
 0x238   :  { %651 = vmatpush.xpose.msra.mxu2 %v358_v24 }
 0x239   :  { %537 = vmatpush.msrb.mxu0 %v413_v13 }
 0x23b   :  { %592 = vmatmul.f32.vlgmr.msrb.gmra.mxu2 %v266_v25  ;;  %538 = vmatpush.msrb.mxu0 %v412_v14  ;;  %v392_v25 = vld [vmem:[%s3426_s7 + $0x48] sm:$0xff] }
 0x23c   :  { %696 = vmatpush.msrb.mxu2 %v414_v11 }
 0x23d   :  { %539 = vmatpush.msrb.mxu0 %v411_v16 }
 0x23e   :  { %697 = vmatpush.msrb.mxu2 %v413_v13 }
 0x23f   :  { %540 = vmatpush.msrb.mxu0 %v410_v23 }
 0x240   :  { %698 = vmatpush.msrb.mxu2 %v412_v14 }
 0x241   :  { %541 = vmatpush.msrb.mxu0 %v409_v27 }
 0x242   :  { %699 = vmatpush.msrb.mxu2 %v411_v16 }
 0x243   :  { %652 = vmatmul.f32.vlgmr.msra.gmra.mxu2 %v335_v28 }
 0x244   :  { %700 = vmatpush.msrb.mxu2 %v410_v23  ;;  %v815_v23 = vld [vmem:[%s3430_s11 + $0x58] sm:$0xff] }
 0x246   :  { %701 = vmatpush.msrb.mxu2 %v409_v27  ;;  %v810_v27 = vld [vmem:[%s3430_s11 + $0x30] sm:$0xff] }
 0x2a6   :  { %v432_v33 = vpop.f32.mrf.mxu3 }
 0x2a7   :  { %vm435_vm10 = vcmp.ne.f32.partialorder %v432_v33, 0.0 }
 0x2a8   :  { %vm436_vm12 = vmand %vm2526_vm9, %vm435_vm10 }
 0x2a9   :  { %v437_v34 = vsel %vm436_vm12, %v432_v33, -inf  ;;  %v408_v33 = vld [vmem:[%s3426_s7 + $0xc8] sm:$0xff] }
 0x2aa   :  { %v439_v35 = vsel %vm438_vm11, %v437_v34, -inf  ;;  %542 = vmatpush.msrb.mxu0 %v408_v33  ;;  %702 = vmatpush.msrb.mxu2 %v408_v33  ;;  %v809_v33 = vld [vmem:[%s3430_s11 + $0x28] sm:$0xff] }
 0x2ab   :  { %440 = vmax.xlane.f32.xlu0 %v439_v35  ;;  %v390_v35 = vld [vmem:[%s3426_s7 + $0x38] sm:$0xff] }
 0x2b6   :  { %v493_v36 = vpop.f32.mrf.mxu2 }
 0x2b7   :  { %vm496_vm13 = vcmp.ne.f32.partialorder %v493_v36, 0.0 }
 0x2b8   :  { %vm497_vm14 = vmand %vm2526_vm9, %vm496_vm13 }
 0x2b9   :  { %v498_v19 = vsel %vm497_vm14, %v493_v36, -inf }
 0x2ba   :  { %v499_v20 = vsel %vm438_vm11, %v498_v19, -inf }
 0x2bb   :  { %500 = vmax.xlane.f32.xlu1 %v499_v20 }
 0x2be   :  { %v593_v37 = vpop.f32.mrf.mxu2 }
 0x2bf   :  { %vm596_vm15 = vcmp.ne.f32.partialorder %v593_v37, 0.0 }
 0x2c0   :  { %vm597_vm0 = vmand %vm2526_vm9, %vm596_vm15 }
 0x2c1   :  { %v598_v38 = vsel %vm597_vm0, %v593_v37, -inf }
 0x2c2   :  { %v599_v39 = vsel %vm438_vm11, %v598_v38, -inf }
 0x2c3   :  { %600 = vmax.xlane.f32.xlu2 %v599_v39 }
 0x2c6   :  { %v653_v40 = vpop.f32.mrf.mxu2 }
 0x2c7   :  { %vm656_vm1 = vcmp.ne.f32.partialorder %v653_v40, 0.0 }
 0x2c8   :  { %vm657_vm3 = vmand %vm2526_vm9, %vm656_vm1 }
 0x2c9   :  { %v658_v41 = vsel %vm657_vm3, %v653_v40, -inf }
 0x2ca   :  { %v659_v42 = vsel %vm438_vm11, %v658_v41, -inf }
 0x2cb   :  { %660 = vmax.xlane.f32.xlu1 %v659_v42 }
 0x31e   :  { %v441_v43 = vpop.xlane.xlu0 %440 }
 0x31f   :  { %v442_v44 = vsub.f32 %v437_v34, %v441_v43 }
 0x321   :  { %v443_v45 = vmul.f32 1.442695, %v442_v44  ;;  %v385_v44 = vld [vmem:[%s3426_s7 + $0x10] sm:$0xff] }
 0x323   :  { %2092 = vpow2.f32 %v443_v45 }
 0x329   :  { %v2093_v46 = vpop.eup %2092 }
 0x32a   :  { %v445_v47 = vsel %vm438_vm11, %v2093_v46, 0.0 }
 0x32b   :  { %446 = vadd.xlane.f32.xlu2 %v445_v47 }
 0x32e   :  { %v501_v48 = vpop.xlane.xlu1 %500 }
 0x32f   :  { %v502_v49 = vsub.f32 %v498_v19, %v501_v48  ;;  %v381_v19 = vadd.f32 %v2522_v29, %v232_v12  ;;  %v387_v29 = vld [vmem:[%s3426_s7 + $0x20] sm:$0xff] }
 0x331   :  { %v503_v50 = vmul.f32 1.442695, %v502_v49  ;;  %v407_v49 = vld [vmem:[%s3426_s7 + $0xc0] sm:$0xff] }
 0x332   :  { %543 = vmatpush.msrb.mxu0 %v407_v49  ;;  %703 = vmatpush.msrb.mxu2 %v407_v49  ;;  %v896_v49 = vld [vmem:[%s3432_s13 + $0x70] sm:$0xff] }
 0x333   :  { %2094 = vpow2.f32 %v503_v50  ;;  %v383_v50 = vld [vmem:[%s3426_s7] sm:$0xff] }
 0x336   :  { %v601_v51 = vpop.xlane.xlu2 %600 }
 0x337   :  { %v602_v52 = vsub.f32 %v598_v38, %v601_v51  ;;  %v389_v38 = vld [vmem:[%s3426_s7 + $0x30] sm:$0xff]  ;;  %v406_v51 = vld [vmem:[%s3426_s7 + $0xb8] sm:$0xff] }
 0x338   :  { %544 = vmatpush.msrb.mxu0 %v406_v51  ;;  %704 = vmatpush.msrb.mxu2 %v406_v51 }
 0x339   :  { %v2543_v53 = vpop.eup %2094  ;;  %v603_v54 = vmul.f32 1.442695, %v602_v52  ;;  %v405_v52 = vld [vmem:[%s3426_s7 + $0xb0] sm:$0xff] }
 0x33a   :  { %v505_v55 = vsel %vm438_vm11, %v2543_v53, 0.0  ;;  %545 = vmatpush.msrb.mxu0 %v405_v52  ;;  %705 = vmatpush.msrb.mxu2 %v405_v52 }
 0x33b   :  { %2096 = vpow2.f32 %v603_v54  ;;  %506 = vadd.xlane.f32.xlu1 %v505_v55  ;;  %v403_v54 = vld [vmem:[%s3426_s7 + $0xa0] sm:$0xff]  ;;  %v402_v55 = vld [vmem:[%s3426_s7 + $0x98] sm:$0xff] }
 0x33e   :  { %v661_v56 = vpop.xlane.xlu1 %660 }
 0x33f   :  { %v662_v57 = vsub.f32 %v658_v41, %v661_v56  ;;  %v386_v41 = vld [vmem:[%s3426_s7 + $0x18] sm:$0xff]  ;;  %v401_v56 = vld [vmem:[%s3426_s7 + $0x90] sm:$0xff] }
 0x341   :  { %v2547_v58 = vpop.eup %2096  ;;  %v663_v59 = vmul.f32 1.442695, %v662_v57  ;;  %v400_v57 = vld [vmem:[%s3426_s7 + $0x88] sm:$0xff] }
 0x342   :  { %v605_v60 = vsel %vm438_vm11, %v2547_v58, 0.0 }
 0x343   :  { %2098 = vpow2.f32 %v663_v59  ;;  %606 = vadd.xlane.f32.xlu2 %v605_v60 }
 0x349   :  { %v2551_v62 = vpop.eup %2098 }
 0x34a   :  { %v665_v63 = vsel %vm438_vm11, %v2551_v62, 0.0 }
 0x34b   :  { %666 = vadd.xlane.f32.xlu1 %v665_v63 }
 0x39e   :  { %v447_v0 = vpop.xlane.xlu2 %446 }
 0x39f   :  { %2100 = vrcp.f32 %v447_v0 }
 0x3a5   :  { %v2101_v1 = vpop.eup %2100 }
 0x3a6   :  { %v449_v2 = vmul.f32 %v2101_v1, %v447_v0 }
 0x3a8   :  { %v450_v3 = vsub.f32 2.0, %v449_v2 }
 0x3aa   :  { %v451_v4 = vmul.f32 %v2101_v1, %v450_v3  ;;  %v2077_v3 = vld [vmem:[%s3427_s8] ss:$0 sm:$0xff] }
 0x3ac   :  { %v452_v5 = vmul.f32 %v2093_v46, %v451_v4  ;;  %v384_v46 = vld [vmem:[%s3426_s7 + $0x8] sm:$0xff] }
 0x3ae   :  { %v507_v6 = vpop.xlane.xlu1 %506  ;;  %1903 = vmatmul.msk.f32.vlgmr.msrb.gmra.mxu3 %vm438_vm11, %v452_v5 }
 0x3af   :  { %2102 = vrcp.f32 %v507_v6  ;;  %631 = vmatpush.msrb.mxu3 %v2515_v10  ;;  %v2583_v10 = vld [vmem:[%s3426_s7 + $0x60] sm:$0xff] }
 0x3b0   :  { %559 = vmatpush.msra.mxu1 %v2583_v10 }
 0x3b2   :  { %560 = vmatpush.msra.mxu1 %v2592_v15 }
 0x3b4   :  { %561 = vmatpush.msra.mxu1 %v393_v22 }
 0x3b5   :  { %v2103_v17 = vpop.eup %2102 }
 0x3b6   :  { %v509_v18 = vmul.f32 %v2103_v17, %v507_v6  ;;  %v607_v21 = vpop.xlane.xlu2 %606  ;;  %562 = vmatpush.msra.mxu1 %v392_v25 }
 0x3b7   :  { %2104 = vrcp.f32 %v607_v21 }
 0x3b8   :  { %v510_v24 = vsub.f32 2.0, %v509_v18  ;;  %563 = vmatpush.msra.mxu1 %v391_v31  ;;  %v816_v18 = vld [vmem:[%s3430_s11 + $0x60] sm:$0xff] }
 0x3ba   :  { %v511_v28 = vmul.f32 %v2103_v17, %v510_v24  ;;  %564 = vmatpush.msra.mxu1 %v390_v35  ;;  %v818_v17 = vld [vmem:[%s3430_s11 + $0x70] sm:$0xff]  ;;  %v812_v24 = vld [vmem:[%s3430_s11 + $0x40] sm:$0xff] }
 0x3bc   :  { %v512_v34 = vmul.f32 %v2543_v53, %v511_v28  ;;  %565 = vmatpush.msra.mxu1 %v389_v38  ;;  %v404_v53 = vld [vmem:[%s3426_s7 + $0xa8] sm:$0xff]  ;;  %v811_v28 = vld [vmem:[%s3430_s11 + $0x38] sm:$0xff] }
 0x3bd   :  { %v2105_v36 = vpop.eup %2104  ;;  %546 = vmatpush.msrb.mxu0 %v404_v53  ;;  %706 = vmatpush.msrb.mxu2 %v404_v53  ;;  %v912_v53 = vld [vmem:[%s3432_s13 + $0xf0] sm:$0xff] }
 0x3be   :  { %v609_v20 = vmul.f32 %v2105_v36, %v607_v21  ;;  %v667_v37 = vpop.xlane.xlu1 %666  ;;  %1904 = vmatmul.msk.f32.vlgmr.msra.gmra.mxu3 %vm438_vm11, %v512_v34  ;;  %566 = vmatpush.msra.mxu1 %v388_v61  ;;  %v817_v21 = vld [vmem:[%s3430_s11 + $0x68] sm:$0xff]  ;;  %v806_v34 = vld [vmem:[%s3430_s11 + $0x10] sm:$0xff] }
 0x3bf   :  { %2106 = vrcp.f32 %v667_v37  ;;  %691 = vmatpush.msra.mxu3 %v381_v19  ;;  %547 = vmatpush.msrb.mxu0 %v403_v54  ;;  %v804_v19 = vld [vmem:[%s3430_s11] sm:$0xff] }
 0x3c0   :  { %v610_v39 = vsub.f32 2.0, %v609_v20  ;;  %567 = vmatpush.msra.mxu1 %v387_v29  ;;  %707 = vmatpush.msrb.mxu2 %v403_v54  ;;  %v805_v20 = vld [vmem:[%s3430_s11 + $0x8] sm:$0xff] }
 0x3c1   :  { %548 = vmatpush.msrb.mxu0 %v402_v55 }
 0x3c2   :  { %v611_v12 = vmul.f32 %v2105_v36, %v610_v39  ;;  %568 = vmatpush.msra.mxu1 %v386_v41  ;;  %708 = vmatpush.msrb.mxu2 %v402_v55 }
 0x3c3   :  { %549 = vmatpush.msrb.mxu0 %v401_v56 }
 0x3c4   :  { %v612_v40 = vmul.f32 %v2547_v58, %v611_v12  ;;  %569 = vmatpush.msra.mxu1 %v385_v44  ;;  %709 = vmatpush.msrb.mxu2 %v401_v56  ;;  %v399_v58 = vld [vmem:[%s3426_s7 + $0x80] sm:$0xff] }
 0x3c5   :  { %v2107_v42 = vpop.eup %2106  ;;  %550 = vmatpush.msrb.mxu0 %v400_v57 }
 0x3c6   :  { %v669_v43 = vmul.f32 %v2107_v42, %v667_v37  ;;  %1905 = vmatmul.msk.f32.vlgmr.msrb.gmra.mxu3 %vm438_vm11, %v612_v40  ;;  %570 = vmatpush.msra.mxu1 %v384_v46 }
 0x3c7   :  { %716 = vmatpush.msrb.mxu3 %v2559_v7  ;;  %710 = vmatpush.msrb.mxu2 %v400_v57  ;;  %v895_v57 = vld [vmem:[%s3432_s13 + $0x68] sm:$0xff] }
 0x3c8   :  { %v670_v45 = vsub.f32 2.0, %v669_v43  ;;  %571 = vmatpush.msra.mxu1 %v383_v50  ;;  %551 = vmatpush.msrb.mxu0 %v399_v58 }
 0x3c9   :  { %717 = vmatpush.msrb.mxu3 %v2564_v8  ;;  %711 = vmatpush.msrb.mxu2 %v399_v58  ;;  %v911_v58 = vld [vmem:[%s3432_s13 + $0xe8] sm:$0xff] }
 0x3ca   :  { %v671_v47 = vmul.f32 %v2107_v42, %v670_v45  ;;  %840 = vmatpush.msra.mxu0 %v818_v17  ;;  %v905_v17 = vld [vmem:[%s3432_s13 + $0xb8] sm:$0xff] }
 0x3cb   :  { %718 = vmatpush.msrb.mxu3 %v2571_v9 }
 0x3cc   :  { %v672_v48 = vmul.f32 %v2551_v62, %v671_v47  ;;  %841 = vmatpush.msra.mxu0 %v816_v18  ;;  %v897_v47 = vld [vmem:[%s3432_s13 + $0x78] sm:$0xff]  ;;  %v888_v18 = vld [vmem:[%s3432_s13 + $0x30] sm:$0xff] }
 0x3cd   :  { %719 = vmatpush.msrb.mxu3 %v2583_v10 }
 0x3ce   :  { %1906 = vmatmul.msk.f32.vlgmr.msra.gmra.mxu3 %vm438_vm11, %v672_v48  ;;  %v913_v48 = vld [vmem:[%s3432_s13 + $0xf8] sm:$0xff] }
 0x3cf   :  { %720 = vmatpush.msrb.mxu3 %v2592_v15 }
 0x3d1   :  { %721 = vmatpush.msrb.mxu3 %v393_v22  ;;  %v814_v22 = vld [vmem:[%s3430_s11 + $0x50] sm:$0xff] }
 0x3d2   :  { %842 = vmatpush.msra.mxu0 %v814_v22 }
 0x3d3   :  { %722 = vmatpush.msrb.mxu3 %v392_v25  ;;  %v813_v25 = vld [vmem:[%s3430_s11 + $0x48] sm:$0xff] }
 0x3d4   :  { %843 = vmatpush.msra.mxu0 %v812_v24  ;;  %v903_v24 = vld [vmem:[%s3432_s13 + $0xa8] sm:$0xff] }
 0x3d5   :  { %723 = vmatpush.msrb.mxu3 %v391_v31  ;;  %v808_v31 = vld [vmem:[%s3430_s11 + $0x20] sm:$0xff] }
 0x3d6   :  { %844 = vmatpush.msra.mxu0 %v810_v27  ;;  %v886_v27 = vld [vmem:[%s3432_s13 + $0x20] sm:$0xff] }
 0x3d7   :  { %724 = vmatpush.msrb.mxu3 %v390_v35  ;;  %v807_v35 = vld [vmem:[%s3430_s11 + $0x18] sm:$0xff] }
 0x3d8   :  { %845 = vmatpush.msra.mxu0 %v808_v31 }
 0x3d9   :  { %725 = vmatpush.msrb.mxu3 %v389_v38 }
 0x3da   :  { %846 = vmatpush.msra.mxu0 %v806_v34  ;;  %v901_v34 = vld [vmem:[%s3432_s13 + $0x98] sm:$0xff] }
 0x3db   :  { %726 = vmatpush.msrb.mxu3 %v388_v61 }
 0x3dc   :  { %847 = vmatpush.msra.mxu0 %v804_v19 }
 0x3dd   :  { %727 = vmatpush.msrb.mxu3 %v387_v29 }
 0x3df   :  { %728 = vmatpush.msrb.mxu3 %v386_v41 }
 0x3e1   :  { %729 = vmatpush.msrb.mxu3 %v385_v44 }
 0x3e3   :  { %730 = vmatpush.msrb.mxu3 %v384_v46 }
 0x3e5   :  { %731 = vmatpush.msrb.mxu3 %v383_v50  ;;  %v2763_v50 = vld [vmem:[%s3428_s9] ss:$0 sm:$0xff] }
 0x431   :  { %v473_v59 = vpop.f32.mrf.mxu3 }
 0x432   :  { %572 = vmatmul.f32.vlgmr.msra.gmra.mxu1 %v473_v59 }
 0x441   :  { %v533_v60 = vpop.f32.mrf.mxu3 }
 0x442   :  { %552 = vmatmul.f32.vlgmr.msrb.gmra.mxu0 %v533_v60 }
 0x443   :  { %918 = vmatpush.msrb.mxu0 %v897_v47 }
 0x445   :  { %919 = vmatpush.msrb.mxu0 %v896_v49 }
 0x447   :  { %920 = vmatpush.msrb.mxu0 %v895_v57  ;;  %v2080_v57 = vld [vmem:[%s3433_s14] ss:$0 sm:$0xff] }
 0x449   :  { %v633_v62 = vpop.f32.mrf.mxu3 }
 0x44a   :  { %732 = vmatmul.f32.vlgmr.msrb.gmra.mxu3 %v633_v62 }
 0x451   :  { %v693_v63 = vpop.f32.mrf.mxu3 }
 0x452   :  { %712 = vmatmul.f32.vlgmr.msrb.gmra.mxu2 %v693_v63  ;;  %v2079_v63 = vld [vmem:[%s3429_s10] ss:$0 sm:$0xff] }
 0x4af   :  { %v573_v0 = vpop.f32.mrf.mxu1 }
 0x4bf   :  { %v553_v1 = vpop.f32.mrf.mxu0 }
 0x4c0   :  { %v574_v2 = vadd.f32 %v573_v0, %v553_v1  ;;  %v894_v0 = vld [vmem:[%s3432_s13 + $0x60] sm:$0xff] }
 0x4c1   :  { %v910_v1 = vld [vmem:[%s3432_s13 + $0xe0] sm:$0xff]  ;;  %921 = vmatpush.msrb.mxu0 %v894_v0 }
 0x4c2   :  { %v736_v4 = vadd.f32 %v574_v2, %v2319_v26 }
 0x4c4   :  { %v2686_v5 = vadd.f32 %v2077_v3, %v736_v4  ;;  %v893_v4 = vld [vmem:[%s3432_s13 + $0x58] sm:$0xff] }
 0x4c5   :  { %922 = vmatpush.msrb.mxu0 %v893_v4 }
 0x4c6   :  { %v746_v6 = vsel %vm118_vm2, %v2686_v5, 0.0  ;;  %v752_v7 = vmul.f32 %v2686_v5, %v2686_v5 }
 0x4c7   :  { %747 = vadd.xlane.f32.xlu2 %v746_v6  ;;  %v909_v6 = vld [vmem:[%s3432_s13 + $0xd8] sm:$0xff] }
 0x4c8   :  { %v754_v8 = vsel %vm118_vm2, %v752_v7, 0.0 }
 0x4c9   :  { %755 = vadd.xlane.f32.xlu1 %v754_v8  ;;  %v892_v8 = vld [vmem:[%s3432_s13 + $0x50] sm:$0xff] }
 0x4ca   :  { %923 = vmatpush.msrb.mxu0 %v892_v8 }
 0x4cd   :  { %v733_v9 = vpop.f32.mrf.mxu3 }
 0x4d5   :  { %v713_v11 = vpop.f32.mrf.mxu2 }
 0x4d6   :  { %v734_v13 = vadd.f32 %v733_v9, %v713_v11  ;;  %v908_v9 = vld [vmem:[%s3432_s13 + $0xd0] sm:$0xff]  ;;  %v891_v11 = vld [vmem:[%s3432_s13 + $0x48] sm:$0xff] }
 0x4d7   :  { %924 = vmatpush.msrb.mxu0 %v891_v11 }
 0x4d8   :  { %v737_v10 = vadd.f32 %v734_v13, %v2325_v30  ;;  %v819_v30 = vld [vmem:[%s3430_s11 + $0x78] sm:$0xff]  ;;  %v907_v13 = vld [vmem:[%s3432_s13 + $0xc8] sm:$0xff] }
 0x4d9   :  { %863 = vmatpush.msrb.mxu1 %v819_v30 }
 0x4da   :  { %v2694_v14 = vadd.f32 %v2077_v3, %v737_v10  ;;  %v890_v10 = vld [vmem:[%s3432_s13 + $0x40] sm:$0xff] }
 0x4db   :  { %864 = vmatpush.msrb.mxu1 %v817_v21  ;;  %925 = vmatpush.msrb.mxu0 %v890_v10  ;;  %v904_v21 = vld [vmem:[%s3432_s13 + $0xb0] sm:$0xff]  ;;  %v1956_v10 = vld [vmem:[%s3424_s5 + $0x2d8] sm:$0xff] }
 0x4dc   :  { %v749_v26 = vsel %vm118_vm2, %v2694_v14, 0.0  ;;  %v753_v15 = vmul.f32 %v2694_v14, %v2694_v14  ;;  %1129 = vmatpush.msra.mxu3 %v1956_v10 }
 0x4dd   :  { %750 = vadd.xlane.f32.xlu2 %v749_v26  ;;  %865 = vmatpush.msrb.mxu1 %v815_v23  ;;  %v906_v26 = vld [vmem:[%s3432_s13 + $0xc0] sm:$0xff]  ;;  %v887_v23 = vld [vmem:[%s3432_s13 + $0x28] sm:$0xff] }
 0x4de   :  { %v757_v16 = vsel %vm118_vm2, %v753_v15, 0.0 }
 0x4df   :  { %758 = vadd.xlane.f32.xlu1 %v757_v16  ;;  %866 = vmatpush.msrb.mxu1 %v813_v25  ;;  %v889_v16 = vld [vmem:[%s3432_s13 + $0x38] sm:$0xff] }
 0x4e0   :  { %926 = vmatpush.msrb.mxu0 %v889_v16  ;;  %v1950_v16 = vld [vmem:[%s3424_s5 + $0x2a8] sm:$0xff] }
 0x4e1   :  { %867 = vmatpush.msrb.mxu1 %v811_v28  ;;  %v902_v28 = vld [vmem:[%s3432_s13 + $0xa0] sm:$0xff]  ;;  %1130 = vmatpush.msra.mxu3 %v1950_v16  ;;  %v1922_v16 = vld [vmem:[%s3424_s5 + $0x1c8] sm:$0xff] }
 0x4e2   :  { %927 = vmatpush.msrb.mxu0 %v888_v18  ;;  %v1943_v18 = vld [vmem:[%s3424_s5 + $0x270] sm:$0xff] }
 0x4e3   :  { %868 = vmatpush.msrb.mxu1 %v809_v33  ;;  %v885_v33 = vld [vmem:[%s3432_s13 + $0x18] sm:$0xff] }
 0x4e4   :  { %928 = vmatpush.msrb.mxu0 %v887_v23  ;;  %v1948_v23 = vld [vmem:[%s3424_s5 + $0x298] sm:$0xff] }
 0x4e5   :  { %869 = vmatpush.msrb.mxu1 %v807_v35 }
 0x4e6   :  { %929 = vmatpush.msrb.mxu0 %v886_v27  ;;  %v1941_v27 = vld [vmem:[%s3424_s5 + $0x260] sm:$0xff] }
 0x4e7   :  { %870 = vmatpush.msrb.mxu1 %v805_v20 }
 0x4e8   :  { %930 = vmatpush.msrb.mxu0 %v885_v33  ;;  %v1932_v33 = vld [vmem:[%s3424_s5 + $0x218] sm:$0xff] }
 0x4e9   :  { %941 = vmatpush.msra.mxu1 %v913_v48 }
 0x4eb   :  { %942 = vmatpush.msra.mxu1 %v912_v53 }
 0x4ed   :  { %943 = vmatpush.msra.mxu1 %v911_v58 }
 0x4ef   :  { %944 = vmatpush.msra.mxu1 %v910_v1 }
 0x4f1   :  { %945 = vmatpush.msra.mxu1 %v909_v6 }
 0x4f3   :  { %946 = vmatpush.msra.mxu1 %v908_v9 }
 0x4f5   :  { %947 = vmatpush.msra.mxu1 %v907_v13  ;;  %v1955_v13 = vld [vmem:[%s3424_s5 + $0x2d0] sm:$0xff] }
 0x4f6   :  { %1106 = vmatpush.msra.mxu2 %v1955_v13 }
 0x4f7   :  { %948 = vmatpush.msra.mxu1 %v906_v26  ;;  %v1960_v26 = vld [vmem:[%s3424_s5 + $0x2f8] sm:$0xff] }
 0x4f9   :  { %949 = vmatpush.msra.mxu1 %v905_v17  ;;  %v1953_v17 = vld [vmem:[%s3424_s5 + $0x2c0] sm:$0xff] }
 0x4fb   :  { %950 = vmatpush.msra.mxu1 %v904_v21  ;;  %v1944_v21 = vld [vmem:[%s3424_s5 + $0x278] sm:$0xff] }
 0x4fc   :  { %1131 = vmatpush.msra.mxu3 %v1944_v21  ;;  %v1915_v21 = vld [vmem:[%s3424_s5 + $0x190] sm:$0xff] }
 0x4fd   :  { %951 = vmatpush.msra.mxu1 %v903_v24  ;;  %v1937_v24 = vld [vmem:[%s3424_s5 + $0x240] sm:$0xff] }
 0x4ff   :  { %952 = vmatpush.msra.mxu1 %v902_v28  ;;  %v1942_v28 = vld [vmem:[%s3424_s5 + $0x268] sm:$0xff] }
 0x501   :  { %953 = vmatpush.msra.mxu1 %v901_v34  ;;  %v1935_v34 = vld [vmem:[%s3424_s5 + $0x230] sm:$0xff] }
 0x53a   :  { %v748_v36 = vpop.xlane.xlu2 %747 }
 0x53b   :  { %v760_v37 = vmul.f32 0.015625, %v748_v36 }
 0x53c   :  { %v756_v38 = vpop.xlane.xlu1 %755 }
 0x53d   :  { %v764_v39 = vmul.f32 %v760_v37, %v760_v37  ;;  %v762_v61 = vmul.f32 0.015625, %v756_v38  ;;  %v768_v54 = vsub.f32 %v2686_v5, %v760_v37 }
 0x53f   :  { %v766_v12 = vsub.f32 %v762_v61, %v764_v39  ;;  %v884_v39 = vld [vmem:[%s3432_s13 + $0x10] sm:$0xff] }
 0x540   :  { %v900_v61 = vld [vmem:[%s3432_s13 + $0x90] sm:$0xff]  ;;  %931 = vmatpush.msrb.mxu0 %v884_v39  ;;  %v1920_v39 = vld [vmem:[%s3424_s5 + $0x1b8] sm:$0xff] }
 0x541   :  { %v770_v29 = vadd.f32 1e-05, %v766_v12  ;;  %954 = vmatpush.msra.mxu1 %v900_v61  ;;  %v883_v12 = vld [vmem:[%s3432_s13 + $0x8] sm:$0xff]  ;;  %v1923_v61 = vld [vmem:[%s3424_s5 + $0x1d0] sm:$0xff] }
 0x542   :  { %932 = vmatpush.msrb.mxu0 %v883_v12  ;;  %v1924_v12 = vld [vmem:[%s3424_s5 + $0x1d8] sm:$0xff] }
 0x543   :  { %2108 = vrsqrt.f32 %v770_v29  ;;  %vm778_vm5 = vweird.f32 %v770_v29 }
 0x549   :  { %v2109_v40 = vpop.eup %2108 }
 0x54a   :  { %v773_v41 = vmul.f32 %v2109_v40, %v770_v29  ;;  %vm779_vm4 = vweird.f32 %v2109_v40  ;;  %v899_v29 = vld [vmem:[%s3432_s13 + $0x88] sm:$0xff] }
 0x54b   :  { %vm780_vm6 = vmor %vm778_vm5, %vm779_vm4  ;;  %955 = vmatpush.msra.mxu1 %v899_v29 }
 0x54c   :  { %v774_v42 = vmul.f32 %v2109_v40, %v773_v41  ;;  %v898_v41 = vld [vmem:[%s3432_s13 + $0x80] sm:$0xff] }
 0x54d   :  { %956 = vmatpush.msra.mxu1 %v898_v41  ;;  %v1914_v41 = vld [vmem:[%s3424_s5 + $0x188] sm:$0xff] }
 0x54e   :  { %v775_v43 = vmul.f32 0.5, %v774_v42  ;;  %v820_v42 = vld [vmem:[%s3447_s30] sm:$0x3] }
 0x550   :  { %v776_v44 = vsub.f32 1.5, %v775_v43  ;;  %v751_v45 = vpop.xlane.xlu2 %750  ;;  %v822_v43 = vperm.slane %v820_v42, 0 }
 0x551   :  { %v2749_v46 = vmul.f32 0.015625, %v751_v45 }
 0x552   :  { %v777_v51 = vmul.f32 %v2109_v40, %v776_v44  ;;  %v759_v52 = vpop.xlane.xlu1 %758  ;;  %v823_v44 = vperm.slane %v820_v42, 1  ;;  %v1917_v42 = vld [vmem:[%s3424_s5 + $0x1a0] sm:$0xff] }
 0x553   :  { %v765_v55 = vmul.f32 %v2749_v46, %v2749_v46  ;;  %v763_v56 = vmul.f32 0.015625, %v759_v52  ;;  %v769_v36 = vsub.f32 %v2694_v14, %v2749_v46 }
 0x554   :  { %v781_v59 = vsel %vm780_vm6, %v2109_v40, %v777_v51  ;;  %v882_v40 = vld [vmem:[%s3432_s13] sm:$0xff] }
 0x555   :  { %v792_v60 = vmul.f32 %v781_v59, %v768_v54  ;;  %v767_v62 = vsub.f32 %v763_v56, %v765_v55  ;;  %933 = vmatpush.msrb.mxu0 %v882_v40  ;;  %v1913_v40 = vld [vmem:[%s3424_s5 + $0x180] sm:$0xff] }
 0x557   :  { %v797_v2 = vmul.f32 %v2763_v50, %v792_v60  ;;  %v771_v3 = vadd.f32 1e-05, %v767_v62 }
 0x559   :  { %2110 = vrsqrt.f32 %v771_v3  ;;  %v802_v7 = vadd.f32 %v2079_v63, %v797_v2  ;;  %vm788_vm8 = vweird.f32 %v771_v3 }
 0x55b   :  { %1907 = vmatmul.msk.f32.vlgmr.msra.gmra.mxu0 %vm118_vm2, %v802_v7  ;;  %1909 = vmatmul.msk.f32.vlgmr.msrb.gmra.mxu1 %vm118_vm2, %v802_v7 }
 0x55c   :  { %1221 = vmatpush.msrb.mxu1 %v1960_v26 }
 0x55f   :  { %v2111_v15 = vpop.eup %2110 }
 0x560   :  { %v783_v30 = vmul.f32 %v2111_v15, %v771_v3  ;;  %vm789_vm7 = vweird.f32 %v2111_v15 }
 0x561   :  { %vm790_vm10 = vmor %vm788_vm8, %vm789_vm7 }
 0x562   :  { %v784_v22 = vmul.f32 %v2111_v15, %v783_v30  ;;  %v1954_v30 = vld [vmem:[%s3424_s5 + $0x2c8] sm:$0xff] }
 0x563   :  { %1222 = vmatpush.msrb.mxu1 %v1954_v30 }
 0x564   :  { %v785_v25 = vmul.f32 0.5, %v784_v22  ;;  %v1947_v22 = vld [vmem:[%s3424_s5 + $0x290] sm:$0xff] }
 0x565   :  { %1223 = vmatpush.msrb.mxu1 %v1948_v23 }
 0x566   :  { %v786_v31 = vsub.f32 1.5, %v785_v25  ;;  %v1938_v25 = vld [vmem:[%s3424_s5 + $0x248] sm:$0xff] }
 0x567   :  { %1132 = vmatpush.msra.mxu3 %v1938_v25  ;;  %1224 = vmatpush.msrb.mxu1 %v1942_v28 }
 0x568   :  { %v787_v35 = vmul.f32 %v2111_v15, %v786_v31  ;;  %v1931_v31 = vld [vmem:[%s3424_s5 + $0x210] sm:$0xff] }
 0x569   :  { %1133 = vmatpush.msra.mxu3 %v1932_v33 }
 0x56a   :  { %v791_v19 = vsel %vm790_vm10, %v2111_v15, %v787_v35  ;;  %v1949_v15 = vld [vmem:[%s3424_s5 + $0x2a0] sm:$0xff]  ;;  %v1936_v35 = vld [vmem:[%s3424_s5 + $0x238] sm:$0xff] }
 0x56b   :  { %v793_v20 = vmul.f32 %v791_v19, %v769_v36  ;;  %1107 = vmatpush.msra.mxu2 %v1949_v15  ;;  %1225 = vmatpush.msrb.mxu1 %v1936_v35  ;;  %v1925_v36 = vld [vmem:[%s3424_s5 + $0x1e0] sm:$0xff]  ;;  %v1926_v19 = vld [vmem:[%s3424_s5 + $0x1e8] sm:$0xff] }
 0x56c   :  { %1134 = vmatpush.msra.mxu3 %v1926_v19  ;;  %v1921_v15 = vld [vmem:[%s3424_s5 + $0x1c0] sm:$0xff] }
 0x56d   :  { %v798_v37 = vmul.f32 %v2763_v50, %v793_v20  ;;  %1108 = vmatpush.msra.mxu2 %v1943_v18  ;;  %v1929_v20 = vld [vmem:[%s3424_s5 + $0x200] sm:$0xff] }
 0x56e   :  { %1135 = vmatpush.msra.mxu3 %v1920_v39  ;;  %v3055_v39 = vld [vmem:[%s3425_s6 + $0x6] sm:$0x3f] }
 0x56f   :  { %v803_v38 = vadd.f32 %v2079_v63, %v798_v37  ;;  %1109 = vmatpush.msra.mxu2 %v1937_v24  ;;  %v1930_v37 = vld [vmem:[%s3424_s5 + $0x208] sm:$0xff] }
 0x570   :  { %1226 = vmatpush.msrb.mxu1 %v1930_v37  ;;  %1136 = vmatpush.msra.mxu3 %v1914_v41 }
 0x571   :  { %1908 = vmatmul.msk.f32.gmra.mxu0 %vm118_vm2, %v803_v38  ;;  %1910 = vmatmul.msk.f32.gmra.mxu1 %vm118_vm2, %v803_v38  ;;  %v1919_v38 = vld [vmem:[%s3424_s5 + $0x1b0] sm:$0xff] }
 0x572   :  { %1110 = vmatpush.msra.mxu2 %v1931_v31  ;;  %1227 = vmatpush.msrb.mxu1 %v1924_v12  ;;  %v1084_v12 = vperm.slane %v3055_v39, 4 }
 0x574   :  { %1111 = vmatpush.msra.mxu2 %v1925_v36 }
 0x576   :  { %1112 = vmatpush.msra.mxu2 %v1919_v38 }
 0x578   :  { %1113 = vmatpush.msra.mxu2 %v1913_v40  ;;  %v1080_v40 = vperm.slane %v3055_v39, 0 }
 0x5d8   :  { %v849_v45 = vpop.f32.mrf.mxu0  ;;  %v872_v46 = vpop.f32.mrf.mxu1 }
 0x5d9   :  { %v850_v47 = vadd.f32 %v849_v45, %v822_v43  ;;  %v873_v48 = vadd.f32 %v872_v46, %v823_v44 }
 0x5db   :  { %v878_v49 = vmax.f32 %v850_v47, 0.0  ;;  %v879_v50 = vmax.f32 %v873_v48, 0.0 }
 0x5dd   :  { %934 = vmatmul.f32.vlgmr.msrb.gmra.mxu0 %v878_v49  ;;  %957 = vmatmul.f32.vlgmr.msra.gmra.mxu1 %v879_v50 }
 0x5ee   :  { %v852_v51 = vpop.f32.mrf.mxu0  ;;  %v875_v52 = vpop.f32.mrf.mxu1 }
 0x5ef   :  { %v853_v53 = vadd.f32 %v852_v51, %v822_v43  ;;  %v876_v54 = vadd.f32 %v875_v52, %v823_v44  ;;  %v1918_v44 = vld [vmem:[%s3424_s5 + $0x1a8] sm:$0xff]  ;;  %v1957_v52 = vld [vmem:[%s3424_s5 + $0x2e0] sm:$0xff] }
 0x5f0   :  { %1228 = vmatpush.msrb.mxu1 %v1918_v44  ;;  %1152 = vmatpush.msrb.mxu2 %v1957_v52 }
 0x5f1   :  { %v880_v55 = vmax.f32 %v853_v53, 0.0  ;;  %v881_v56 = vmax.f32 %v876_v54, 0.0  ;;  %v1958_v53 = vld [vmem:[%s3424_s5 + $0x2e8] sm:$0xff] }
 0x5f2   :  { %1175 = vmatpush.msrb.mxu3 %v1958_v53 }
 0x5f3   :  { %937 = vmatmul.f32.gmra.mxu0 %v880_v55  ;;  %960 = vmatmul.f32.gmra.mxu1 %v881_v56  ;;  %v1951_v55 = vld [vmem:[%s3424_s5 + $0x2b0] sm:$0xff]  ;;  %v1952_v56 = vld [vmem:[%s3424_s5 + $0x2b8] sm:$0xff] }
 0x5f4   :  { %1153 = vmatpush.msrb.mxu2 %v1951_v55  ;;  %1176 = vmatpush.msrb.mxu3 %v1952_v56 }
 0x65a   :  { %v935_v58 = vpop.f32.mrf.mxu0  ;;  %v958_v60 = vpop.f32.mrf.mxu1 }
 0x65b   :  { %v936_v59 = vadd.f32 %v2080_v57, %v935_v58  ;;  %v1945_v58 = vld [vmem:[%s3424_s5 + $0x280] sm:$0xff] }
 0x65c   :  { %1154 = vmatpush.msrb.mxu2 %v1945_v58 }
 0x65d   :  { %v959_v62 = vadd.f32 %v958_v60, %v936_v59  ;;  %v1946_v59 = vld [vmem:[%s3424_s5 + $0x288] sm:$0xff]  ;;  %v1939_v60 = vld [vmem:[%s3424_s5 + $0x250] sm:$0xff] }
 0x65e   :  { %1177 = vmatpush.msrb.mxu3 %v1946_v59  ;;  %1155 = vmatpush.msrb.mxu2 %v1939_v60 }
 0x65f   :  { %v2873_v63 = vadd.f32 %v959_v62, %v2686_v5  ;;  %v1940_v62 = vld [vmem:[%s3424_s5 + $0x258] sm:$0xff] }
 0x660   :  { %1178 = vmatpush.msrb.mxu3 %v1940_v62 }
 0x661   :  { %v970_v0 = vsel %vm118_vm2, %v2873_v63, 0.0  ;;  %v976_v1 = vmul.f32 %v2873_v63, %v2873_v63 }
 0x662   :  { %971 = vadd.xlane.f32.xlu2 %v970_v0 }
 0x663   :  { %v978_v2 = vsel %vm118_vm2, %v976_v1, 0.0 }
 0x664   :  { %979 = vadd.xlane.f32.xlu0 %v978_v2 }
 0x670   :  { %v938_v3 = vpop.f32.mrf.mxu0  ;;  %v961_v6 = vpop.f32.mrf.mxu1 }
 0x671   :  { %v939_v4 = vadd.f32 %v2080_v57, %v938_v3 }
 0x673   :  { %v962_v7 = vadd.f32 %v961_v6, %v939_v4  ;;  %v1933_v6 = vld [vmem:[%s3424_s5 + $0x220] sm:$0xff] }
 0x674   :  { %1156 = vmatpush.msrb.mxu2 %v1933_v6 }
 0x675   :  { %v2881_v8 = vadd.f32 %v962_v7, %v2694_v14  ;;  %v1959_v14 = vld [vmem:[%s3424_s5 + $0x2f0] sm:$0xff]  ;;  %v1934_v7 = vld [vmem:[%s3424_s5 + $0x228] sm:$0xff] }
 0x676   :  { %1198 = vmatpush.msra.mxu0 %v1959_v14  ;;  %1179 = vmatpush.msrb.mxu3 %v1934_v7  ;;  %v1928_v14 = vld [vmem:[%s3424_s5 + $0x1f8] sm:$0xff] }
 0x677   :  { %v973_v5 = vsel %vm118_vm2, %v2881_v8, 0.0  ;;  %v977_v9 = vmul.f32 %v2881_v8, %v2881_v8 }
 0x678   :  { %974 = vadd.xlane.f32.xlu1 %v973_v5  ;;  %1199 = vmatpush.msra.mxu0 %v1953_v17  ;;  %v1927_v5 = vld [vmem:[%s3424_s5 + $0x1f0] sm:$0xff]  ;;  %v2082_v17 = vld [vmem:[%s3423_s4 + $0x1] ss:$0 sm:$0xff] }
 0x679   :  { %v981_v11 = vsel %vm118_vm2, %v977_v9, 0.0  ;;  %1157 = vmatpush.msrb.mxu2 %v1927_v5  ;;  %1180 = vmatpush.msrb.mxu3 %v1928_v14 }
 0x67a   :  { %982 = vadd.xlane.f32.xlu2 %v981_v11  ;;  %1200 = vmatpush.msra.mxu0 %v1947_v22  ;;  %v2081_v11 = vld [vmem:[%s3422_s3 + $0x1] ss:$0 sm:$0xff]  ;;  %v1916_v22 = vld [vmem:[%s3424_s5 + $0x198] sm:$0xff] }
 0x67b   :  { %1158 = vmatpush.msrb.mxu2 %v1921_v15  ;;  %1181 = vmatpush.msrb.mxu3 %v1922_v16 }
 0x67c   :  { %1201 = vmatpush.msra.mxu0 %v1941_v27 }
 0x67d   :  { %1159 = vmatpush.msrb.mxu2 %v1915_v21  ;;  %1182 = vmatpush.msrb.mxu3 %v1916_v22 }
 0x67e   :  { %1202 = vmatpush.msra.mxu0 %v1935_v34 }
 0x680   :  { %1203 = vmatpush.msra.mxu0 %v1929_v20 }
 0x682   :  { %1204 = vmatpush.msra.mxu0 %v1923_v61  ;;  %v1081_v61 = vperm.slane %v3055_v39, 1 }
 0x684   :  { %1205 = vmatpush.msra.mxu0 %v1917_v42 }
 0x6d5   :  { %v972_v29 = vpop.xlane.xlu2 %971 }
 0x6d6   :  { %v984_v43 = vmul.f32 0.015625, %v972_v29 }
 0x6d7   :  { %v980_v45 = vpop.xlane.xlu0 %979 }
 0x6d8   :  { %v988_v46 = vmul.f32 %v984_v43, %v984_v43  ;;  %v986_v47 = vmul.f32 0.015625, %v980_v45  ;;  %v992_v9 = vsub.f32 %v2873_v63, %v984_v43 }
 0x6da   :  { %v990_v48 = vsub.f32 %v986_v47, %v988_v46 }
 0x6dc   :  { %v994_v49 = vadd.f32 1e-05, %v990_v48 }
 0x6de   :  { %2112 = vrsqrt.f32 %v994_v49  ;;  %vm1002_vm13 = vweird.f32 %v994_v49 }
 0x6e4   :  { %v2113_v50 = vpop.eup %2112 }
 0x6e5   :  { %v997_v51 = vmul.f32 %v2113_v50, %v994_v49  ;;  %vm1003_vm12 = vweird.f32 %v2113_v50  ;;  %v1082_v49 = vperm.slane %v3055_v39, 2 }
 0x6e6   :  { %vm1004_vm14 = vmor %vm1002_vm13, %vm1003_vm12 }
 0x6e7   :  { %v998_v54 = vmul.f32 %v2113_v50, %v997_v51  ;;  %v1085_v51 = vperm.slane %v3055_v39, 5 }
 0x6e9   :  { %v999_v57 = vmul.f32 0.5, %v998_v54 }
 0x6eb   :  { %v1000_v0 = vsub.f32 1.5, %v999_v57  ;;  %v975_v1 = vpop.xlane.xlu1 %974 }
 0x6ec   :  { %v985_v2 = vmul.f32 0.015625, %v975_v1 }
 0x6ed   :  { %v1001_v3 = vmul.f32 %v2113_v50, %v1000_v0  ;;  %v983_v4 = vpop.xlane.xlu2 %982 }
 0x6ee   :  { %v989_v13 = vmul.f32 %v985_v2, %v985_v2  ;;  %v987_v10 = vmul.f32 0.015625, %v983_v4  ;;  %v993_v36 = vsub.f32 %v2881_v8, %v985_v2 }
 0x6ef   :  { %v1005_v26 = vsel %vm1004_vm14, %v2113_v50, %v1001_v3  ;;  %v1083_v50 = vperm.slane %v3055_v39, 3 }
 0x6f0   :  { %v1016_v30 = vmul.f32 %v1005_v26, %v992_v9  ;;  %v991_v18 = vsub.f32 %v987_v10, %v989_v13 }
 0x6f2   :  { %v1021_v23 = vmul.f32 %v2081_v11, %v1016_v30  ;;  %v995_v24 = vadd.f32 1e-05, %v991_v18 }
 0x6f4   :  { %v1026_v25 = vadd.f32 %v2082_v17, %v1021_v23  ;;  %2114 = vrsqrt.f32 %v995_v24  ;;  %vm1012_vm0 = vweird.f32 %v995_v24 }
 0x6f6   :  { %1962 = vmatmul.msk.f32.vlgmr.msra.gmra.mxu2 %vm118_vm2, %v1026_v25  ;;  %1964 = vmatmul.msk.f32.vlgmr.msra.gmra.mxu3 %vm118_vm2, %v1026_v25 }
 0x6f7   :  { %1970 = vmatmul.msk.f32.vlgmr.msra.gmra.mxu0 %vm118_vm2, %v1026_v25  ;;  %1972 = vmatmul.msk.f32.vlgmr.msrb.gmra.mxu1 %vm118_vm2, %v1026_v25 }
 0x6fa   :  { %v2115_v27 = vpop.eup %2114 }
 0x6fb   :  { %v1007_v28 = vmul.f32 %v2115_v27, %v995_v24  ;;  %vm1013_vm15 = vweird.f32 %v2115_v27 }
 0x6fc   :  { %vm1014_vm1 = vmor %vm1012_vm0, %vm1013_vm15 }
 0x6fd   :  { %v1008_v31 = vmul.f32 %v2115_v27, %v1007_v28 }
 0x6ff   :  { %v1009_v33 = vmul.f32 0.5, %v1008_v31 }
 0x701   :  { %v1010_v34 = vsub.f32 1.5, %v1009_v33 }
 0x703   :  { %v1011_v35 = vmul.f32 %v2115_v27, %v1010_v34 }
 0x705   :  { %v1015_v19 = vsel %vm1014_vm1, %v2115_v27, %v1011_v35 }
 0x706   :  { %v1017_v20 = vmul.f32 %v1015_v19, %v993_v36 }
 0x708   :  { %v1022_v37 = vmul.f32 %v2081_v11, %v1017_v20 }
 0x70a   :  { %v1027_v38 = vadd.f32 %v2082_v17, %v1022_v37 }
 0x70c   :  { %1963 = vmatmul.msk.f32.gmra.mxu2 %vm118_vm2, %v1027_v38  ;;  %1965 = vmatmul.msk.f32.gmra.mxu3 %vm118_vm2, %v1027_v38 }
 0x70d   :  { %1971 = vmatmul.msk.f32.gmra.mxu0 %vm118_vm2, %v1027_v38  ;;  %1973 = vmatmul.msk.f32.gmra.mxu1 %vm118_vm2, %v1027_v38 }
 0x714   :  { %1966 = vmatmul.msk.f32.vlgmr.msrb.gmra.mxu2 %vm118_vm2, %v1026_v25  ;;  %1968 = vmatmul.msk.f32.vlgmr.msrb.gmra.mxu3 %vm118_vm2, %v1026_v25 }
 0x71c   :  { %1967 = vmatmul.msk.f32.gmra.mxu2 %vm118_vm2, %v1027_v38  ;;  %1969 = vmatmul.msk.f32.gmra.mxu3 %vm118_vm2, %v1027_v38 }
 0x774   :  { %v1207_v29 = vpop.f32.mrf.mxu0  ;;  %v1230_v52 = vpop.f32.mrf.mxu1 }
 0x775   :  { %v1208_v44 = vadd.f32 %v1207_v29, %v1084_v12  ;;  %v1231_v58 = vadd.f32 %v1230_v52, %v1085_v51 }
 0x779   :  { %v1138_v41 = vpop.f32.mrf.mxu3  ;;  %v1115_v42 = vpop.f32.mrf.mxu2 }
 0x77a   :  { %v1139_v43 = vadd.f32 %v1138_v41, %v1081_v61  ;;  %v1116_v45 = vadd.f32 %v1115_v42, %v1080_v40 }
 0x77c   :  { %1284 = vmatpush.xpose.msra.mxu2 %v1139_v43  ;;  %v1989_v43 = vld [vmem:[%s3426_s7 + $0x178] sm:$0xff] }
 0x77d   :  { %1409 = vmatpush.msra.mxu1 %v1989_v43 }
 0x77f   :  { %1285 = vmatmul.f32.vlgmr.msra.gmra.mxu2 %v1116_v45  ;;  %v1987_v45 = vld [vmem:[%s3426_s7 + $0x168] sm:$0xff] }
 0x780   :  { %1344 = vmatpush.xpose.msrb.mxu2 %v1208_v44  ;;  %v1988_v44 = vld [vmem:[%s3426_s7 + $0x170] sm:$0xff] }
 0x781   :  { %1410 = vmatpush.msra.mxu1 %v1988_v44 }
 0x783   :  { %1411 = vmatpush.msra.mxu1 %v1987_v45 }
 0x78a   :  { %v1210_v53 = vpop.f32.mrf.mxu0 }
 0x78b   :  { %v1211_v59 = vadd.f32 %v1210_v53, %v1084_v12 }
 0x78f   :  { %v1118_v46 = vpop.f32.mrf.mxu2  ;;  %v1141_v47 = vpop.f32.mrf.mxu3 }
 0x790   :  { %v1142_v48 = vadd.f32 %v1141_v47, %v1081_v61  ;;  %v1119_v60 = vadd.f32 %v1118_v46, %v1080_v40  ;;  %v1986_v46 = vld [vmem:[%s3426_s7 + $0x160] sm:$0xff]  ;;  %v2005_v47 = vld [vmem:[%s3426_s7 + $0x1f8] sm:$0xff] }
 0x791   :  { %1389 = vmatpush.msrb.mxu0 %v2005_v47  ;;  %1412 = vmatpush.msra.mxu1 %v1986_v46 }
 0x792   :  { %1444 = vmatpush.xpose.msra.mxu2 %v1142_v48  ;;  %v2004_v48 = vld [vmem:[%s3426_s7 + $0x1f0] sm:$0xff] }
 0x793   :  { %1390 = vmatpush.msrb.mxu0 %v2004_v48 }
 0x797   :  { %v1161_v54 = vpop.f32.mrf.mxu2  ;;  %v1184_v55 = vpop.f32.mrf.mxu3 }
 0x798   :  { %v1162_v56 = vadd.f32 %v1161_v54, %v1082_v49  ;;  %v1185_v57 = vadd.f32 %v1184_v55, %v1083_v50  ;;  %v1984_v54 = vld [vmem:[%s3426_s7 + $0x150] sm:$0xff] }
 0x79a   :  { %1324 = vmatpush.msra.mxu3 %v1162_v56  ;;  %1345 = vmatmul.f32.vlgmr.msrb.gmra.mxu2 %v1185_v57  ;;  %v1983_v56 = vld [vmem:[%s3426_s7 + $0x148] sm:$0xff]  ;;  %v1233_v57 = vpop.f32.mrf.mxu1 }
 0x79b   :  { %1504 = vmatpush.xpose.msrb.mxu2 %v1211_v59  ;;  %v1982_v59 = vld [vmem:[%s3426_s7 + $0x140] sm:$0xff] }
 0x79c   :  { %1384 = vmatpush.msrb.mxu3 %v1231_v58 }
 0x79f   :  { %v1187_v62 = vpop.f32.mrf.mxu3  ;;  %v1164_v1 = vpop.f32.mrf.mxu2 }
 0x7a0   :  { %v1188_v0 = vadd.f32 %v1187_v62, %v1083_v50  ;;  %v1165_v41 = vadd.f32 %v1164_v1, %v1082_v49  ;;  %v1985_v49 = vld [vmem:[%s3426_s7 + $0x158] sm:$0xff]  ;;  %v1234_v1 = vadd.f32 %v1233_v57, %v1085_v51  ;;  %v1978_v51 = vld [vmem:[%s3426_s7 + $0x120] sm:$0xff] }
 0x7a1   :  { %1413 = vmatpush.msra.mxu1 %v1985_v49  ;;  %v1981_v62 = vld [vmem:[%s3426_s7 + $0x138] sm:$0xff] }
 0x7a2   :  { %1445 = vmatmul.f32.vlgmr.msra.gmra.mxu2 %v1119_v60  ;;  %v2024_v57 = vld [vmem:[%s3430_s11 + $0xd8] sm:$0xff] }
 0x7a3   :  { %1549 = vmatpush.msra.mxu2 %v2005_v47  ;;  %1414 = vmatpush.msra.mxu1 %v1984_v54 }
 0x7a5   :  { %1550 = vmatpush.msra.mxu2 %v2004_v48  ;;  %1415 = vmatpush.msra.mxu1 %v1983_v56 }
 0x7a7   :  { %1416 = vmatpush.msra.mxu1 %v1982_v59 }
 0x7a9   :  { %1417 = vmatpush.msra.mxu1 %v1981_v62 }
 0x7aa   :  { %1505 = vmatmul.f32.vlgmr.msrb.gmra.mxu2 %v1188_v0 }
 0x802   :  { %v1286_v2 = vpop.f32.mrf.mxu2 }
 0x803   :  { %vm1289_vm3 = vcmp.ne.f32.partialorder %v1286_v2, 0.0 }
 0x804   :  { %vm1290_vm4 = vmand %vm2526_vm9, %vm1289_vm3 }
 0x805   :  { %v1291_v3 = vsel %vm1290_vm4, %v1286_v2, -inf }
 0x806   :  { %v1292_v4 = vsel %vm438_vm11, %v1291_v3, -inf }
 0x807   :  { %1293 = vmax.xlane.f32.xlu0 %v1292_v4  ;;  %v1980_v4 = vld [vmem:[%s3426_s7 + $0x130] sm:$0xff] }
 0x808   :  { %1418 = vmatpush.msra.mxu1 %v1980_v4 }
 0x81d   :  { %v1346_v6 = vpop.f32.mrf.mxu2 }
 0x81e   :  { %vm1349_vm5 = vcmp.ne.f32.partialorder %v1346_v6, 0.0 }
 0x81f   :  { %vm1350_vm6 = vmand %vm2526_vm9, %vm1349_vm5 }
 0x820   :  { %v1351_v7 = vsel %vm1350_vm6, %v1346_v6, -inf }
 0x821   :  { %v1352_v5 = vsel %vm438_vm11, %v1351_v7, -inf }
 0x822   :  { %1353 = vmax.xlane.f32.xlu1 %v1352_v5 }
 0x825   :  { %v1446_v9 = vpop.f32.mrf.mxu2 }
 0x826   :  { %vm1449_vm7 = vcmp.ne.f32.partialorder %v1446_v9, 0.0 }
 0x827   :  { %vm1450_vm8 = vmand %vm2526_vm9, %vm1449_vm7 }
 0x828   :  { %v1451_v11 = vsel %vm1450_vm8, %v1446_v9, -inf  ;;  %v1977_v9 = vld [vmem:[%s3426_s7 + $0x118] sm:$0xff] }
 0x829   :  { %v1452_v13 = vsel %vm438_vm11, %v1451_v11, -inf }
 0x82a   :  { %1453 = vmax.xlane.f32.xlu2 %v1452_v13 }
 0x82d   :  { %v1506_v10 = vpop.f32.mrf.mxu2 }
 0x82e   :  { %vm1509_vm10 = vcmp.ne.f32.partialorder %v1506_v10, 0.0 }
 0x82f   :  { %vm1510_vm12 = vmand %vm2526_vm9, %vm1509_vm10 }
 0x830   :  { %v1511_v14 = vsel %vm1510_vm12, %v1506_v10, -inf  ;;  %v1976_v10 = vld [vmem:[%s3426_s7 + $0x110] sm:$0xff] }
 0x831   :  { %v1512_v26 = vsel %vm438_vm11, %v1511_v14, -inf }
 0x832   :  { %1513 = vmax.xlane.f32.xlu0 %v1512_v26  ;;  %v1975_v26 = vld [vmem:[%s3426_s7 + $0x108] sm:$0xff] }
 0x87a   :  { %v1294_v15 = vpop.xlane.xlu0 %1293 }
 0x87b   :  { %v1295_v16 = vsub.f32 %v1291_v3, %v1294_v15 }
 0x87d   :  { %v1296_v17 = vmul.f32 1.442695, %v1295_v16 }
 0x87f   :  { %2116 = vpow2.f32 %v1296_v17  ;;  %v1974_v17 = vld [vmem:[%s3426_s7 + $0x100] sm:$0xff] }
 0x885   :  { %v2117_v30 = vpop.eup %2116 }
 0x886   :  { %v1298_v18 = vsel %vm438_vm11, %v2117_v30, 0.0 }
 0x887   :  { %1299 = vadd.xlane.f32.xlu1 %v1298_v18  ;;  %v2002_v18 = vld [vmem:[%s3426_s7 + $0x1e0] sm:$0xff] }
 0x895   :  { %v1354_v21 = vpop.xlane.xlu1 %1353 }
 0x896   :  { %v1355_v22 = vsub.f32 %v1351_v7, %v1354_v21  ;;  %v1979_v7 = vld [vmem:[%s3426_s7 + $0x128] sm:$0xff]  ;;  %v2001_v21 = vld [vmem:[%s3426_s7 + $0x1d8] sm:$0xff] }
 0x897   :  { %1419 = vmatpush.msra.mxu1 %v1979_v7 }
 0x898   :  { %v1356_v23 = vmul.f32 1.442695, %v1355_v22  ;;  %v2000_v22 = vld [vmem:[%s3426_s7 + $0x1d0] sm:$0xff] }
 0x899   :  { %1420 = vmatpush.msra.mxu1 %v1978_v51 }
 0x89a   :  { %2118 = vpow2.f32 %v1356_v23  ;;  %v1999_v23 = vld [vmem:[%s3426_s7 + $0x1c8] sm:$0xff] }
 0x89b   :  { %1421 = vmatpush.msra.mxu1 %v1977_v9 }
 0x89d   :  { %v1454_v24 = vpop.xlane.xlu2 %1453  ;;  %1422 = vmatpush.msra.mxu1 %v1976_v10 }
 0x89e   :  { %v1455_v25 = vsub.f32 %v1451_v11, %v1454_v24  ;;  %v1998_v24 = vld [vmem:[%s3426_s7 + $0x1c0] sm:$0xff] }
 0x89f   :  { %1423 = vmatpush.msra.mxu1 %v1975_v26 }
 0x8a0   :  { %v2119_v32 = vpop.eup %2118  ;;  %v1456_v27 = vmul.f32 1.442695, %v1455_v25  ;;  %v1997_v25 = vld [vmem:[%s3426_s7 + $0x1b8] sm:$0xff] }
 0x8a1   :  { %v1358_v28 = vsel %vm438_vm11, %v2119_v32, 0.0  ;;  %1424 = vmatpush.msra.mxu1 %v1974_v17 }
 0x8a2   :  { %2120 = vpow2.f32 %v1456_v27  ;;  %1359 = vadd.xlane.f32.xlu2 %v1358_v28  ;;  %v1995_v27 = vld [vmem:[%s3426_s7 + $0x1a8] sm:$0xff]  ;;  %v1994_v28 = vld [vmem:[%s3426_s7 + $0x1a0] sm:$0xff] }
 0x8a5   :  { %v1514_v31 = vpop.xlane.xlu0 %1513 }
 0x8a6   :  { %v1515_v33 = vsub.f32 %v1511_v14, %v1514_v31  ;;  %v1993_v31 = vld [vmem:[%s3426_s7 + $0x198] sm:$0xff] }
 0x8a8   :  { %v3081_v34 = vpop.eup %2120  ;;  %v1516_v35 = vmul.f32 1.442695, %v1515_v33  ;;  %v1992_v33 = vld [vmem:[%s3426_s7 + $0x190] sm:$0xff] }
 0x8a9   :  { %v1458_v36 = vsel %vm438_vm11, %v3081_v34, 0.0 }
 0x8aa   :  { %2122 = vpow2.f32 %v1516_v35  ;;  %1459 = vadd.xlane.f32.xlu0 %v1458_v36  ;;  %v1990_v35 = vld [vmem:[%s3426_s7 + $0x180] sm:$0xff] }
 0x8b0   :  { %v3085_v19 = vpop.eup %2122 }
 0x8b1   :  { %v1518_v20 = vsel %vm438_vm11, %v3085_v19, 0.0 }
 0x8b2   :  { %1519 = vadd.xlane.f32.xlu1 %v1518_v20 }
 0x8fa   :  { %v1300_v37 = vpop.xlane.xlu1 %1299 }
 0x8fb   :  { %2124 = vrcp.f32 %v1300_v37 }
 0x901   :  { %v2125_v38 = vpop.eup %2124 }
 0x902   :  { %v1302_v61 = vmul.f32 %v2125_v38, %v1300_v37 }
 0x904   :  { %v1303_v12 = vsub.f32 2.0, %v1302_v61 }
 0x906   :  { %v1304_v29 = vmul.f32 %v2125_v38, %v1303_v12 }
 0x908   :  { %v1305_v40 = vmul.f32 %v2117_v30, %v1304_v29  ;;  %v2003_v30 = vld [vmem:[%s3426_s7 + $0x1e8] sm:$0xff]  ;;  %v2083_v29 = vld [vmem:[%s3427_s8 + $0x1] ss:$0 sm:$0xff]  ;;  %s1875_s8 = sshll.u32 %s3436_s17, 4  ;;  %s1876_s8 = int_to_ptr.hbm [resolvable:$true] %s1875_s8 }
 0x909   :  { %1391 = vmatpush.msrb.mxu0 %v2003_v30  ;;  %1551 = vmatpush.msra.mxu2 %v2003_v30 }
 0x90a   :  { %2006 = vmatmul.msk.f32.vlgmr.msra.gmra.mxu3 %vm438_vm11, %v1305_v40 }
 0x90b   :  { %1484 = vmatpush.msra.mxu3 %v1165_v41  ;;  %1392 = vmatpush.msrb.mxu0 %v2002_v18 }
 0x90c   :  { %1552 = vmatpush.msra.mxu2 %v2002_v18  ;;  %v2049_v18 = vld [vmem:[%s3432_s13 + $0x178] sm:$0xff] }
 0x90d   :  { %1393 = vmatpush.msrb.mxu0 %v2001_v21 }
 0x90e   :  { %1553 = vmatpush.msra.mxu2 %v2001_v21  ;;  %v2065_v21 = vld [vmem:[%s3432_s13 + $0x1f8] sm:$0xff] }
 0x90f   :  { %1394 = vmatpush.msrb.mxu0 %v2000_v22 }
 0x910   :  { %1554 = vmatpush.msra.mxu2 %v2000_v22  ;;  %v2048_v22 = vld [vmem:[%s3432_s13 + $0x170] sm:$0xff] }
 0x911   :  { %1395 = vmatpush.msrb.mxu0 %v1999_v23 }
 0x912   :  { %1555 = vmatpush.msra.mxu2 %v1999_v23  ;;  %v3276_v23 = vld [vmem:[%s3428_s9 + $0x1] ss:$0 sm:$0xff] }
 0x913   :  { %1396 = vmatpush.msrb.mxu0 %v1998_v24 }
 0x914   :  { %1556 = vmatpush.msra.mxu2 %v1998_v24 }
 0x915   :  { %v1360_v42 = vpop.xlane.xlu2 %1359  ;;  %1397 = vmatpush.msrb.mxu0 %v1997_v25 }
 0x916   :  { %2126 = vrcp.f32 %v1360_v42  ;;  %1557 = vmatpush.msra.mxu2 %v1997_v25 }
 0x91c   :  { %v2127_v50 = vpop.eup %2126 }
 0x91d   :  { %v1362_v52 = vmul.f32 %v2127_v50, %v1360_v42  ;;  %v1460_v53 = vpop.xlane.xlu0 %1459 }
 0x91e   :  { %2128 = vrcp.f32 %v1460_v53 }
 0x91f   :  { %v1363_v55 = vsub.f32 2.0, %v1362_v52 }
 0x921   :  { %v1364_v58 = vmul.f32 %v2127_v50, %v1363_v55  ;;  %v2026_v55 = vld [vmem:[%s3430_s11 + $0xe8] sm:$0xff] }
 0x923   :  { %v1365_v60 = vmul.f32 %v2119_v32, %v1364_v58  ;;  %v1996_v32 = vld [vmem:[%s3426_s7 + $0x1b0] sm:$0xff]  ;;  %v2021_v58 = vld [vmem:[%s3430_s11 + $0xc0] sm:$0xff] }
 0x924   :  { %v2129_v0 = vpop.eup %2128  ;;  %1398 = vmatpush.msrb.mxu0 %v1996_v32  ;;  %1558 = vmatpush.msra.mxu2 %v1996_v32  ;;  %v2064_v32 = vld [vmem:[%s3432_s13 + $0x1f0] sm:$0xff] }
 0x925   :  { %v1462_v2 = vmul.f32 %v2129_v0, %v1460_v53  ;;  %v1520_v3 = vpop.xlane.xlu1 %1519  ;;  %2007 = vmatmul.msk.f32.vlgmr.msrb.gmra.mxu3 %vm438_vm11, %v1365_v60  ;;  %v2027_v53 = vld [vmem:[%s3430_s11 + $0xf0] sm:$0xff] }
 0x926   :  { %2130 = vrcp.f32 %v1520_v3  ;;  %1544 = vmatpush.msrb.mxu3 %v1234_v1  ;;  %1399 = vmatpush.msrb.mxu0 %v1995_v27  ;;  %v2019_v60 = vld [vmem:[%s3430_s11 + $0xb0] sm:$0xff]  ;;  %v2018_v1 = vld [vmem:[%s3430_s11 + $0xa8] sm:$0xff] }
 0x927   :  { %v1463_v6 = vsub.f32 2.0, %v1462_v2  ;;  %1559 = vmatpush.msra.mxu2 %v1995_v27  ;;  %v2015_v2 = vld [vmem:[%s3430_s11 + $0x90] sm:$0xff] }
 0x928   :  { %1400 = vmatpush.msrb.mxu0 %v1994_v28 }
 0x929   :  { %v1464_v39 = vmul.f32 %v2129_v0, %v1463_v6  ;;  %1560 = vmatpush.msra.mxu2 %v1994_v28  ;;  %v2017_v0 = vld [vmem:[%s3430_s11 + $0xa0] sm:$0xff] }
 0x92a   :  { %1401 = vmatpush.msrb.mxu0 %v1993_v31  ;;  %v2013_v6 = vld [vmem:[%s3430_s11 + $0x80] sm:$0xff] }
 0x92b   :  { %v1465_v5 = vmul.f32 %v3081_v34, %v1464_v39  ;;  %v1991_v34 = vld [vmem:[%s3426_s7 + $0x188] sm:$0xff]  ;;  %1561 = vmatpush.msra.mxu2 %v1993_v31 }
 0x92c   :  { %v2131_v11 = vpop.eup %2130  ;;  %1402 = vmatpush.msrb.mxu0 %v1992_v33 }
 0x92d   :  { %v1522_v13 = vmul.f32 %v2131_v11, %v1520_v3  ;;  %2008 = vmatmul.msk.f32.vlgmr.msra.gmra.mxu3 %vm438_vm11, %v1465_v5  ;;  %1562 = vmatpush.msra.mxu2 %v1992_v33  ;;  %v2016_v3 = vld [vmem:[%s3430_s11 + $0x98] sm:$0xff]  ;;  %v2047_v33 = vld [vmem:[%s3432_s13 + $0x168] sm:$0xff] }
 0x92e   :  { %1569 = vmatpush.msra.mxu3 %v1989_v43  ;;  %1403 = vmatpush.msrb.mxu0 %v1991_v34 }
 0x92f   :  { %v1523_v14 = vsub.f32 2.0, %v1522_v13  ;;  %1563 = vmatpush.msra.mxu2 %v1991_v34  ;;  %v2063_v34 = vld [vmem:[%s3432_s13 + $0x1e8] sm:$0xff] }
 0x930   :  { %1570 = vmatpush.msra.mxu3 %v1988_v44  ;;  %1404 = vmatpush.msrb.mxu0 %v1990_v35 }
 0x931   :  { %v1524_v15 = vmul.f32 %v2131_v11, %v1523_v14  ;;  %1564 = vmatpush.msra.mxu2 %v1990_v35 }
 0x932   :  { %1571 = vmatpush.msra.mxu3 %v1987_v45  ;;  %1698 = vmatpush.msra.mxu0 %v2027_v53 }
 0x933   :  { %v1525_v16 = vmul.f32 %v3085_v19, %v1524_v15 }
 0x934   :  { %1572 = vmatpush.msra.mxu3 %v1986_v46 }
 0x935   :  { %2009 = vmatmul.msk.f32.vlgmr.msrb.gmra.mxu3 %vm438_vm11, %v1525_v16 }
 0x936   :  { %1573 = vmatpush.msra.mxu3 %v1985_v49 }
 0x938   :  { %1574 = vmatpush.msra.mxu3 %v1984_v54  ;;  %v2025_v54 = vld [vmem:[%s3430_s11 + $0xe0] sm:$0xff] }
 0x939   :  { %1699 = vmatpush.msra.mxu0 %v2025_v54  ;;  %v2056_v54 = vld [vmem:[%s3432_s13 + $0x1b0] sm:$0xff] }
 0x93a   :  { %1575 = vmatpush.msra.mxu3 %v1983_v56  ;;  %v2023_v56 = vld [vmem:[%s3430_s11 + $0xd0] sm:$0xff] }
 0x93b   :  { %1700 = vmatpush.msra.mxu0 %v2023_v56  ;;  %v2039_v56 = vld [vmem:[%s3432_s13 + $0x128] sm:$0xff] }
 0x93c   :  { %1576 = vmatpush.msra.mxu3 %v1982_v59  ;;  %v2022_v59 = vld [vmem:[%s3430_s11 + $0xc8] sm:$0xff] }
 0x93d   :  { %1701 = vmatpush.msra.mxu0 %v2021_v58 }
 0x93e   :  { %1577 = vmatpush.msra.mxu3 %v1981_v62  ;;  %v2020_v62 = vld [vmem:[%s3430_s11 + $0xb8] sm:$0xff] }
 0x93f   :  { %1702 = vmatpush.msra.mxu0 %v2019_v60  ;;  %v2054_v60 = vld [vmem:[%s3432_s13 + $0x1a0] sm:$0xff] }
 0x940   :  { %1578 = vmatpush.msra.mxu3 %v1980_v4 }
 0x941   :  { %1703 = vmatpush.msra.mxu0 %v2017_v0  ;;  %v2037_v0 = vld [vmem:[%s3432_s13 + $0x118] sm:$0xff] }
 0x942   :  { %1579 = vmatpush.msra.mxu3 %v1979_v7  ;;  %v2014_v7 = vld [vmem:[%s3430_s11 + $0x88] sm:$0xff] }
 0x943   :  { %1704 = vmatpush.msra.mxu0 %v2015_v2 }
 0x944   :  { %1580 = vmatpush.msra.mxu3 %v1978_v51 }
 0x945   :  { %1705 = vmatpush.msra.mxu0 %v2013_v6 }
 0x946   :  { %1581 = vmatpush.msra.mxu3 %v1977_v9 }
 0x948   :  { %1582 = vmatpush.msra.mxu3 %v1976_v10 }
 0x94a   :  { %1583 = vmatpush.msra.mxu3 %v1975_v26 }
 0x94c   :  { %1584 = vmatpush.msra.mxu3 %v1974_v17 }
 0x98d   :  { %v1326_v36 = vpop.f32.mrf.mxu3 }
 0x98e   :  { %1425 = vmatmul.f32.vlgmr.msra.gmra.mxu1 %v1326_v36 }
 0x9a8   :  { %v1386_v19 = vpop.f32.mrf.mxu3 }
 0x9a9   :  { %1405 = vmatmul.f32.vlgmr.msrb.gmra.mxu0 %v1386_v19 }
 0x9aa   :  { %1778 = vmatpush.msrb.mxu0 %v2049_v18  ;;  %v1830_v18 = vld [vmem:[%s3434_s15 + $0x20] sm:$0xff] }
 0x9ac   :  { %1779 = vmatpush.msrb.mxu0 %v2048_v22 }
 0x9ae   :  { %1780 = vmatpush.msrb.mxu0 %v2047_v33 }
 0x9b0   :  { %v1486_v20 = vpop.f32.mrf.mxu3 }
 0x9b1   :  { %1585 = vmatmul.f32.vlgmr.msra.gmra.mxu3 %v1486_v20  ;;  %v2085_v20 = vld [vmem:[%s3429_s10 + $0x1] ss:$0 sm:$0xff] }
 0x9b8   :  { %v1546_v37 = vpop.f32.mrf.mxu3 }
 0x9b9   :  { %1565 = vmatmul.f32.vlgmr.msra.gmra.mxu2 %v1546_v37  ;;  %v2046_v37 = vld [vmem:[%s3432_s13 + $0x160] sm:$0xff] }
 0x9ba   :  { %1781 = vmatpush.msrb.mxu0 %v2046_v37  ;;  %v1826_v37 = vld [vmem:[%s3434_s15] sm:$0xff] }
 0xa0b   :  { %v1426_v38 = vpop.f32.mrf.mxu1 }
 0xa26   :  { %v1406_v61 = vpop.f32.mrf.mxu0 }
 0xa27   :  { %v1427_v12 = vadd.f32 %v1426_v38, %v1406_v61  ;;  %v2062_v38 = vld [vmem:[%s3432_s13 + $0x1e0] sm:$0xff] }
 0xa29   :  { %v1589_v40 = vadd.f32 %v1427_v12, %v2873_v63 }
 0xa2b   :  { %v3199_v41 = vadd.f32 %v2083_v29, %v1589_v40  ;;  %v2061_v40 = vld [vmem:[%s3432_s13 + $0x1d8] sm:$0xff] }
 0xa2d   :  { %v1602_v42 = vsel %vm118_vm2, %v3199_v41, 0.0  ;;  %v1608_v43 = vmul.f32 %v3199_v41, %v3199_v41 }
 0xa2e   :  { %1603 = vadd.xlane.f32.xlu2 %v1602_v42 }
 0xa2f   :  { %v1610_v44 = vsel %vm118_vm2, %v1608_v43, 0.0  ;;  %v2044_v43 = vld [vmem:[%s3432_s13 + $0x150] sm:$0xff] }
 0xa30   :  { %1611 = vadd.xlane.f32.xlu0 %v1610_v44  ;;  %v2060_v44 = vld [vmem:[%s3432_s13 + $0x1d0] sm:$0xff] }
 0xa34   :  { %v1586_v45 = vpop.f32.mrf.mxu3 }
 0xa3c   :  { %v1566_v46 = vpop.f32.mrf.mxu2 }
 0xa3d   :  { %v1587_v47 = vadd.f32 %v1586_v45, %v1566_v46  ;;  %v2043_v45 = vld [vmem:[%s3432_s13 + $0x148] sm:$0xff] }
 0xa3e   :  { %v2059_v46 = vld [vmem:[%s3432_s13 + $0x1c8] sm:$0xff] }
 0xa3f   :  { %v1590_v48 = vadd.f32 %v1587_v47, %v2881_v8  ;;  %v2028_v8 = vld [vmem:[%s3430_s11 + $0xf8] sm:$0xff]  ;;  %v2042_v47 = vld [vmem:[%s3432_s13 + $0x140] sm:$0xff] }
 0xa40   :  { %1721 = vmatpush.msrb.mxu1 %v2028_v8  ;;  %v2040_v8 = vld [vmem:[%s3432_s13 + $0x130] sm:$0xff] }
 0xa41   :  { %v3207_v49 = vadd.f32 %v2083_v29, %v1590_v48  ;;  %v2045_v29 = vld [vmem:[%s3432_s13 + $0x158] sm:$0xff]  ;;  %v2058_v48 = vld [vmem:[%s3432_s13 + $0x1c0] sm:$0xff] }
 0xa42   :  { %1722 = vmatpush.msrb.mxu1 %v2026_v55  ;;  %1782 = vmatpush.msrb.mxu0 %v2045_v29 }
 0xa43   :  { %v1605_v63 = vsel %vm118_vm2, %v3207_v49, 0.0  ;;  %v1609_v50 = vmul.f32 %v3207_v49, %v3207_v49 }
 0xa44   :  { %1606 = vadd.xlane.f32.xlu1 %v1605_v63  ;;  %1723 = vmatpush.msrb.mxu1 %v2024_v57  ;;  %v2055_v57 = vld [vmem:[%s3432_s13 + $0x1a8] sm:$0xff] }
 0xa45   :  { %v1613_v52 = vsel %vm118_vm2, %v1609_v50, 0.0  ;;  %1783 = vmatpush.msrb.mxu0 %v2044_v43  ;;  %v2041_v50 = vld [vmem:[%s3432_s13 + $0x138] sm:$0xff] }
 0xa46   :  { %1614 = vadd.xlane.f32.xlu2 %v1613_v52  ;;  %1724 = vmatpush.msrb.mxu1 %v2022_v59  ;;  %v2057_v52 = vld [vmem:[%s3432_s13 + $0x1b8] sm:$0xff]  ;;  %v2038_v59 = vld [vmem:[%s3432_s13 + $0x120] sm:$0xff] }
 0xa47   :  { %1784 = vmatpush.msrb.mxu0 %v2043_v45 }
 0xa48   :  { %1725 = vmatpush.msrb.mxu1 %v2020_v62 }
 0xa49   :  { %1785 = vmatpush.msrb.mxu0 %v2042_v47 }
 0xa4a   :  { %1726 = vmatpush.msrb.mxu1 %v2018_v1  ;;  %v2053_v1 = vld [vmem:[%s3432_s13 + $0x198] sm:$0xff] }
 0xa4b   :  { %1786 = vmatpush.msrb.mxu0 %v2041_v50 }
 0xa4c   :  { %1727 = vmatpush.msrb.mxu1 %v2016_v3 }
 0xa4d   :  { %1787 = vmatpush.msrb.mxu0 %v2040_v8 }
 0xa4e   :  { %1728 = vmatpush.msrb.mxu1 %v2014_v7 }
 0xa4f   :  { %1788 = vmatpush.msrb.mxu0 %v2039_v56 }
 0xa50   :  { %1801 = vmatpush.msra.mxu1 %v2065_v21 }
 0xa51   :  { %1789 = vmatpush.msrb.mxu0 %v2038_v59 }
 0xa52   :  { %1802 = vmatpush.msra.mxu1 %v2064_v32 }
 0xa53   :  { %1790 = vmatpush.msrb.mxu0 %v2037_v0 }
 0xa54   :  { %1803 = vmatpush.msra.mxu1 %v2063_v34 }
 0xa56   :  { %1804 = vmatpush.msra.mxu1 %v2062_v38  ;;  %v2086_v38 = vld [vmem:[%s3433_s14 + $0x1] ss:$0 sm:$0xff]  ;;  %s2164_s14 = smov [#allocation2]  }
 0xa57   :  { %s1873_s9 = sshll.u32 %s2164_s14, 4  ;;  %s1874_s9 = int_to_ptr.vmem [resolvable:$true] %s1873_s9 }
 0xa58   :  { %1805 = vmatpush.msra.mxu1 %v2061_v40 }
 0xa5a   :  { %1806 = vmatpush.msra.mxu1 %v2060_v44 }
 0xa5c   :  { %1807 = vmatpush.msra.mxu1 %v2059_v46 }
 0xa5e   :  { %1808 = vmatpush.msra.mxu1 %v2058_v48  ;;  %v2087_v48 = vld [vmem:[%s3435_s16] ss:$0 sm:$0xff] }
 0xa60   :  { %1809 = vmatpush.msra.mxu1 %v2057_v52 }
 0xa62   :  { %1810 = vmatpush.msra.mxu1 %v2056_v54 }
 0xa64   :  { %1811 = vmatpush.msra.mxu1 %v2055_v57 }
 0xa66   :  { %1812 = vmatpush.msra.mxu1 %v2054_v60 }
 0xa68   :  { %1813 = vmatpush.msra.mxu1 %v2053_v1 }
 0xaa1   :  { %v1604_v4 = vpop.xlane.xlu2 %1603 }
 0xaa2   :  { %v1616_v39 = vmul.f32 0.015625, %v1604_v4 }
 0xaa3   :  { %v1612_v51 = vpop.xlane.xlu0 %1611 }
 0xaa4   :  { %v1620_v5 = vmul.f32 %v1616_v39, %v1616_v39  ;;  %v1618_v9 = vmul.f32 0.015625, %v1612_v51  ;;  %v1624_v27 = vsub.f32 %v3199_v41, %v1616_v39  ;;  %v2036_v51 = vld [vmem:[%s3432_s13 + $0x110] sm:$0xff] }
 0xaa5   :  { %1791 = vmatpush.msrb.mxu0 %v2036_v51 }
 0xaa6   :  { %v1622_v11 = vsub.f32 %v1618_v9, %v1620_v5  ;;  %v2052_v5 = vld [vmem:[%s3432_s13 + $0x190] sm:$0xff]  ;;  %v2035_v9 = vld [vmem:[%s3432_s13 + $0x108] sm:$0xff] }
 0xaa7   :  { %1814 = vmatpush.msra.mxu1 %v2052_v5  ;;  %1792 = vmatpush.msrb.mxu0 %v2035_v9 }
 0xaa8   :  { %v1626_v13 = vadd.f32 1e-05, %v1622_v11  ;;  %v2051_v11 = vld [vmem:[%s3432_s13 + $0x188] sm:$0xff] }
 0xaa9   :  { %1815 = vmatpush.msra.mxu1 %v2051_v11 }
 0xaaa   :  { %2132 = vrsqrt.f32 %v1626_v13  ;;  %vm1634_vm11 = vweird.f32 %v1626_v13 }
 0xab0   :  { %v2133_v10 = vpop.eup %2132 }
 0xab1   :  { %v1629_v14 = vmul.f32 %v2133_v10, %v1626_v13  ;;  %vm1635_vm9 = vweird.f32 %v2133_v10  ;;  %v2034_v13 = vld [vmem:[%s3432_s13 + $0x100] sm:$0xff] }
 0xab2   :  { %vm1636_vm13 = vmor %vm1634_vm11, %vm1635_vm9  ;;  %1793 = vmatpush.msrb.mxu0 %v2034_v13 }
 0xab3   :  { %v1630_v26 = vmul.f32 %v2133_v10, %v1629_v14  ;;  %v2029_v14 = vld [vmem:[%s3447_s30 + $0x2] sm:$0x3] }
 0xab5   :  { %v1631_v15 = vmul.f32 0.5, %v1630_v26  ;;  %v1833_v26 = vld [vmem:[%s3434_s15 + $0x38] sm:$0xff] }
 0xab6   :  { %1852 = vmatpush.msrb.mxu2 %v1833_v26 }
 0xab7   :  { %v1632_v16 = vsub.f32 1.5, %v1631_v15  ;;  %v1607_v17 = vpop.xlane.xlu1 %1606  ;;  %v1832_v15 = vld [vmem:[%s3434_s15 + $0x30] sm:$0xff] }
 0xab8   :  { %v3262_v30 = vmul.f32 0.015625, %v1607_v17  ;;  %v1681_v17 = vperm.slane %v2029_v14, 1  ;;  %1853 = vmatpush.msrb.mxu2 %v1832_v15 }
 0xab9   :  { %v1633_v24 = vmul.f32 %v2133_v10, %v1632_v16  ;;  %v1615_v25 = vpop.xlane.xlu2 %1614  ;;  %v1680_v16 = vperm.slane %v2029_v14, 0 }
 0xaba   :  { %v1621_v28 = vmul.f32 %v3262_v30, %v3262_v30  ;;  %v1619_v31 = vmul.f32 0.015625, %v1615_v25  ;;  %v1625_v3 = vsub.f32 %v3207_v49, %v3262_v30  ;;  %v1831_v30 = vld [vmem:[%s3434_s15 + $0x28] sm:$0xff] }
 0xabb   :  { %v1637_v35 = vsel %vm1636_vm13, %v2133_v10, %v1633_v24  ;;  %v2050_v10 = vld [vmem:[%s3432_s13 + $0x180] sm:$0xff]  ;;  %1854 = vmatpush.msrb.mxu2 %v1831_v30 }
 0xabc   :  { %v1648_v36 = vmul.f32 %v1637_v35, %v1624_v27  ;;  %v1623_v19 = vsub.f32 %v1619_v31, %v1621_v28  ;;  %1816 = vmatpush.msra.mxu1 %v2050_v10 }
 0xabd   :  { %1855 = vmatpush.msrb.mxu2 %v1830_v18 }
 0xabe   :  { %v1653_v61 = vmul.f32 %v3276_v23, %v1648_v36  ;;  %v1627_v12 = vadd.f32 1e-05, %v1623_v19  ;;  %v1829_v36 = vld [vmem:[%s3434_s15 + $0x18] sm:$0xff]  ;;  %v1828_v19 = vld [vmem:[%s3434_s15 + $0x10] sm:$0xff] }
 0xabf   :  { %1856 = vmatpush.msrb.mxu2 %v1829_v36 }
 0xac0   :  { %2134 = vrsqrt.f32 %v1627_v12  ;;  %v1658_v42 = vadd.f32 %v2085_v20, %v1653_v61  ;;  %vm1644_vm15 = vweird.f32 %v1627_v12 }
 0xac1   :  { %1857 = vmatpush.msrb.mxu2 %v1828_v19 }
 0xac2   :  { %2030 = vmatmul.msk.f32.vlgmr.msra.gmra.mxu0 %vm118_vm2, %v1658_v42  ;;  %2032 = vmatmul.msk.f32.vlgmr.msrb.gmra.mxu1 %vm118_vm2, %v1658_v42 }
 0xac6   :  { %v2135_v63 = vpop.eup %2134 }
 0xac7   :  { %v1639_v53 = vmul.f32 %v2135_v63, %v1627_v12  ;;  %vm1645_vm14 = vweird.f32 %v2135_v63 }
 0xac8   :  { %vm1646_vm0 = vmor %vm1644_vm15, %vm1645_vm14 }
 0xac9   :  { %v1640_v55 = vmul.f32 %v2135_v63, %v1639_v53 }
 0xacb   :  { %v1641_v58 = vmul.f32 0.5, %v1640_v55 }
 0xacd   :  { %v1642_v62 = vsub.f32 1.5, %v1641_v58 }
 0xacf   :  { %v1643_v2 = vmul.f32 %v2135_v63, %v1642_v62 }
 0xad1   :  { %v1647_v4 = vsel %vm1646_vm0, %v2135_v63, %v1643_v2 }
 0xad2   :  { %v1649_v6 = vmul.f32 %v1647_v4, %v1625_v3 }
 0xad4   :  { %v1654_v7 = vmul.f32 %v3276_v23, %v1649_v6 }
 0xad6   :  { %v1659_v39 = vadd.f32 %v2085_v20, %v1654_v7  ;;  %v1827_v20 = vld [vmem:[%s3434_s15 + $0x8] sm:$0xff] }
 0xad7   :  { %1858 = vmatpush.msrb.mxu2 %v1827_v20 }
 0xad8   :  { %2031 = vmatmul.msk.f32.gmra.mxu0 %vm118_vm2, %v1659_v39  ;;  %2033 = vmatmul.msk.f32.gmra.mxu1 %vm118_vm2, %v1659_v39 }
 0xad9   :  { %1859 = vmatpush.msrb.mxu2 %v1826_v37 }
 0xb3f   :  { %v1707_v21 = vpop.f32.mrf.mxu0  ;;  %v1730_v22 = vpop.f32.mrf.mxu1 }
 0xb40   :  { %v1708_v23 = vadd.f32 %v1707_v21, %v1680_v16  ;;  %v1731_v24 = vadd.f32 %v1730_v22, %v1681_v17 }
 0xb42   :  { %v1736_v25 = vmax.f32 %v1708_v23, 0.0  ;;  %v1737_v32 = vmax.f32 %v1731_v24, 0.0 }
 0xb44   :  { %1794 = vmatmul.f32.vlgmr.msrb.gmra.mxu0 %v1736_v25  ;;  %1817 = vmatmul.f32.vlgmr.msra.gmra.mxu1 %v1737_v32 }
 0xb55   :  { %v1710_v27 = vpop.f32.mrf.mxu0  ;;  %v1733_v28 = vpop.f32.mrf.mxu1 }
 0xb56   :  { %v1711_v31 = vadd.f32 %v1710_v27, %v1680_v16  ;;  %v1734_v33 = vadd.f32 %v1733_v28, %v1681_v17 }
 0xb58   :  { %v1738_v34 = vmax.f32 %v1711_v31, 0.0  ;;  %v1739_v35 = vmax.f32 %v1734_v33, 0.0 }
 0xb5a   :  { %1797 = vmatmul.f32.gmra.mxu0 %v1738_v34  ;;  %1820 = vmatmul.f32.gmra.mxu1 %v1739_v35 }
 0xbc1   :  { %v1795_v61 = vpop.f32.mrf.mxu0  ;;  %v1818_v29 = vpop.f32.mrf.mxu1 }
 0xbc2   :  { %v1796_v12 = vadd.f32 %v2086_v38, %v1795_v61 }
 0xbc4   :  { %v1819_v40 = vadd.f32 %v1818_v29, %v1796_v12 }
 0xbc6   :  { %v1824_v42 = vadd.f32 %v1819_v40, %v3199_v41 }
 0xbc8   :  { %2067 = vmatmul.msk.f32.vlgmr.msrb.gmra.mxu2 %vm118_vm2, %v1824_v42 }
 0xbd7   :  { %v1798_v43 = vpop.f32.mrf.mxu0  ;;  %v1821_v45 = vpop.f32.mrf.mxu1 }
 0xbd8   :  { %v1799_v44 = vadd.f32 %v2086_v38, %v1798_v43 }
 0xbda   :  { %v1822_v46 = vadd.f32 %v1821_v45, %v1799_v44 }
 0xbdc   :  { %v1825_v47 = vadd.f32 %v1822_v46, %v3207_v49 }
 0xbde   :  { %2068 = vmatmul.msk.f32.gmra.mxu2 %vm118_vm2, %v1825_v47 }
 0xc4b   :  { %v1861_v63 = vpop.f32.mrf.mxu2 }
 0xc4c   :  { %v1862_v50 = vadd.f32 %v2087_v48, %v1861_v63 }
 0xc4e   :  { %1867 = vst [vmem:[#allocation2] sm:$0xff] %v1862_v50 }
 0xc61   :  { %v1864_v41 = vpop.f32.mrf.mxu2 }
 0xc62   :  { %v1865_v52 = vadd.f32 %v2087_v48, %v1864_v41 }
 0xc64   :  { %1868 = vst [vmem:[#allocation2 + $0x8] sm:$0xff] %v1865_v52 }
 0xc65   :  { %1881 = dma.vmem_to_hbm [thread:$0]  %s1874_s9, 256, %s1876_s8, [#allocation3], %s2165_s25, %s2165_s25, %s2166_s27  }
 0xc66   :  { %2160 = dma.done.wait [#allocation3], 256  }
 0xc67   :  { %2161 = vsyncadd [#allocation3], 4294967040 }
 0xc68   :  { %1886 = vsyncpa [#allocation3], 1 }

</bundles_post_ra>
